<compile_context>
chip_gen: v5e
topology: v5e:2x2
jax: 0.10.0
libtpu: 0.0.40
codegen_flags: <defaults>
</compile_context>

<pallas_src>
import jax
import jax.numpy as jnp
from jax.experimental import pallas as pl
from jax.experimental.pallas import tpu as pltpu


def _round_up(x, m):
    return (x + m - 1) // m * m


# ----------------------------- fused model kernel -----------------------------
def _make_fused_kernel(T, B, H, num_layers, unroll):
    """Fused multi-layer LSTM + FC kernel (all operands VMEM-resident).

    B and H are the PADDED batch (multiple of 8) and hidden width (multiple of
    128).  Packed gate order is [i, f, o, g].

    Ref layout:
      refs[0]                      x        (T*B, F_pad)        bf16
      refs[1 : 1+3L]               per layer: w_ih (Fin_pad,4H) bf16,
                                              w_hh (H, 4H)      bf16,
                                              b    (1, 4H)      f32
      refs[1+3L], refs[2+3L]       fc_w (H, O_pad) bf16, fc_b (1, O_pad) f32
      refs[3+3L]                   out (B, O_pad) f32
      refs[4+3L:]                  scratch: preact (T*B, 4H) f32,
                                            seq    (seq_rows, H) f32
    """
    bf16 = jnp.bfloat16

    def kernel(*refs):
        x_ref = refs[0]
        layer_refs = refs[1:1 + 3 * num_layers]
        fc_w_ref = refs[1 + 3 * num_layers]
        fc_b_ref = refs[2 + 3 * num_layers]
        out_ref = refs[3 + 3 * num_layers]
        preact_sc, seq_sc = refs[4 + 3 * num_layers:]

        h = jnp.zeros((B, H), jnp.float32)
        c = jnp.zeros((B, H), jnp.float32)

        for layer in range(num_layers):          # static python loop over layers
            w_ih_ref = layer_refs[3 * layer]
            w_hh_ref = layer_refs[3 * layer + 1]
            b_ref = layer_refs[3 * layer + 2]
            last = layer == num_layers - 1

            # ---- cuDNN-style hoist: input projection (+ bias) for ALL T
            #      timesteps as one large MXU matmul, out of the time loop ----
            inp = x_ref[...] if layer == 0 else seq_sc[...].astype(bf16)
            preact_sc[...] = (
                jnp.dot(inp, w_ih_ref[...], preferred_element_type=jnp.float32)
                + b_ref[...])

            # NOTE: for layer > 0 the layer's input (seq_sc) has been fully
            # consumed into preact_sc above, so overwriting seq_sc rows inside
            # the time loop below is safe.
            def step(t, carry, last=last, w_hh_ref=w_hh_ref):
                h, c = carry                           # f32, live in vregs
                row = pl.multiple_of(t * B, 8)
                gates = (preact_sc[pl.ds(row, B), :]
                         + jnp.dot(h.astype(bf16), w_hh_ref[...],
                                   preferred_element_type=jnp.float32))
                # gate order [i, f, o | g]: one sigmoid slab + one tanh.
                sig = jax.nn.sigmoid(gates[:, :3 * H])
                i_g = sig[:, 0:H]
                f_g = sig[:, H:2 * H]
                o_g = sig[:, 2 * H:3 * H]
                g_g = jnp.tanh(gates[:, 3 * H:])
                c = f_g * c + i_g * g_g
                h = o_g * jnp.tanh(c)
                if not last:
                    # only non-final layers feed a hidden sequence onward
                    # (kept in VMEM scratch, never written back to HBM).
                    seq_sc[pl.ds(row, B), :] = h
                return (h, c)

            h = jnp.zeros((B, H), jnp.float32)
            c = jnp.zeros((B, H), jnp.float32)
            h, c = jax.lax.fori_loop(0, T, step, (h, c), unroll=unroll)

        # nn.LSTM inter-layer dropout and self.dropout: identity at inference.
        # TODO(synk): training-mode dropout (pltpu.prng_random_bits mask).
        out_ref[...] = (jnp.dot(h.astype(bf16), fc_w_ref[...],
                                preferred_element_type=jnp.float32)
                        + fc_b_ref[...])

    return kernel


# ------------------------------- model forward --------------------------------
def local_lstm_forward(x_btf, kp):
    """Replicates localLSTMModel.forward (inference / eval mode)."""
    B, T, F = x_btf.shape
    Hp, Fp, Op = kp["H_pad"], kp["F_pad"], kp["O_pad"]
    num_layers = kp["num_layers"]
    Bp = _round_up(B, 8)

    # (B,T,F) -> time-major, pad batch to 8 sublanes / features to 128 lanes,
    # flatten to 2-D so no reshapes are needed inside the kernel.
    # TODO(synk): produce x time-major upstream (or stream it via chunked DMA
    # on v7x) to avoid this extra HBM transpose pass.
    x = jnp.transpose(x_btf, (1, 0, 2))
    x = jnp.pad(x, ((0, 0), (0, Bp - B), (0, Fp - F)))
    x = x.reshape(T * Bp, Fp).astype(jnp.bfloat16)

    inputs = [x]
    for (w_ih, w_hh, b) in kp["layers"]:
        inputs += [w_ih, w_hh, b]
    inputs += [kp["fc_w"], kp["fc_b"]]

    seq_rows = T * Bp if num_layers > 1 else 8
    kernel = _make_fused_kernel(T, Bp, Hp, num_layers, unroll=min(T, 8))

    # Size the scoped-VMEM limit to actual residency (+ headroom), capped at
    # v7x's 64 MiB physical VMEM.
    resident = sum(int(a.size) * a.dtype.itemsize for a in inputs)
    resident += Bp * Op * 4                  # output
    resident += T * Bp * 4 * Hp * 4          # preactivation scratch (f32)
    resident += seq_rows * Hp * 4            # inter-layer hidden sequence (f32)
    vmem_limit = int(min(64 * 2**20, max(32 * 2**20, 2 * resident)))

    vmem = pltpu.MemorySpace.VMEM
    out = pl.pallas_call(
        kernel,
        out_shape=jax.ShapeDtypeStruct((Bp, Op), jnp.float32),
        in_specs=[pl.BlockSpec(memory_space=vmem)] * len(inputs),
        out_specs=pl.BlockSpec(memory_space=vmem),
        scratch_shapes=[
            pltpu.VMEM((T * Bp, 4 * Hp), jnp.float32),   # per-layer preacts
            pltpu.VMEM((seq_rows, Hp), jnp.float32),     # inter-layer hidden seq
        ],
        compiler_params=pltpu.CompilerParams(vmem_limit_bytes=vmem_limit),
    )(*inputs)
    # TODO(synk): on v7x, add a batch grid axis with dimension_semantics=
    # ("parallel",) to occupy both TensorCores when the batch is large.
    return out[:B, :kp["O"]]


# ------------------------------- parameter init --------------------------------
def init_params(key, input_size, hidden_size, output_size, num_layers):
    """Raw (PyTorch-layout) params: w_ih (4H,Fin), w_hh (4H,H), gate order i,f,g,o."""
    H = hidden_size
    k = 1.0 / jnp.sqrt(jnp.float32(H))
    layers = []
    for layer in range(num_layers):
        f_in = input_size if layer == 0 else H
        key, k1, k2, k3, k4 = jax.random.split(key, 5)
        layers.append((
            jax.random.uniform(k1, (4 * H, f_in), jnp.float32, -k, k),
            jax.random.uniform(k2, (4 * H, H), jnp.float32, -k, k),
            jax.random.uniform(k3, (4 * H,), jnp.float32, -k, k),
            jax.random.uniform(k4, (4 * H,), jnp.float32, -k, k),
        ))
    key, k1, k2 = jax.random.split(key, 3)
    fc_w = jax.random.uniform(k1, (output_size, H), jnp.float32, -k, k)
    fc_b = jax.random.uniform(k2, (output_size,), jnp.float32, -k, k)
    return {"lstm": layers, "fc_w": fc_w, "fc_b": fc_b,
            "input_size": input_size, "hidden_size": H,
            "output_size": output_size, "num_layers": num_layers}


def pack_params(params):
    """Pad / reorder / cast raw params into kernel operands.

    * gate columns reordered [i, f, o, g] (sigmoid gates contiguous)
    * hidden & input widths zero-padded to 128-lane multiples (exact: padded
      hidden channels stay identically 0 through the recurrence)
    * matmul weights cast to bf16; biases stay f32
    """
    H = params["hidden_size"]
    F = params["input_size"]
    O = params["output_size"]
    Hp, Fp, Op = _round_up(H, 128), _round_up(F, 128), _round_up(O, 128)
    order = (0, 1, 3, 2)   # torch gate blocks (i,f,g,o) -> kernel (i,f,o,g)

    def pack_w(w, f_in, f_in_pad):
        blocks = jnp.split(w, 4, axis=0)               # each (H, f_in)
        out = jnp.zeros((f_in_pad, 4 * Hp), jnp.float32)
        for col, src in enumerate(order):
            out = out.at[:f_in, col * Hp:col * Hp + H].set(blocks[src].T)
        return out.astype(jnp.bfloat16)

    def pack_b(b_ih, b_hh):
        blocks = jnp.split(b_ih + b_hh, 4)
        out = jnp.zeros((1, 4 * Hp), jnp.float32)
        for col, src in enumerate(order):
            out = out.at[0, col * Hp:col * Hp + H].set(blocks[src])
        return out

    layers = []
    for li, (w_ih, w_hh, b_ih, b_hh) in enumerate(params["lstm"]):
        f_in = F if li == 0 else H
        f_in_pad = Fp if li == 0 else Hp
        layers.append((pack_w(w_ih, f_in, f_in_pad),
                       pack_w(w_hh, H, Hp),
                       pack_b(b_ih, b_hh)))

    fc_w = jnp.zeros((Hp, Op), jnp.float32).at[:H, :O].set(params["fc_w"].T)
    fc_b = jnp.zeros((1, Op), jnp.float32).at[0, :O].set(params["fc_b"])
    return {"layers": layers, "fc_w": fc_w.astype(jnp.bfloat16), "fc_b": fc_b,
            "H_pad": Hp, "F_pad": Fp, "O_pad": Op, "O": O,
            "num_layers": params["num_layers"]}


# ------------------------------- pure-JAX reference ----------------------------
def reference_forward(x_btf, params):
    """Pure-JAX reference using the same bf16-operand / f32-accumulate numerics."""
    bf16 = jnp.bfloat16
    B = x_btf.shape[0]
    H = params["hidden_size"]
    seq = jnp.transpose(x_btf, (1, 0, 2))       # (T, B, Fin), f32
    h = None
    for (w_ih, w_hh, b_ih, b_hh) in params["lstm"]:
        w_ih_t = w_ih.T.astype(bf16)
        w_hh_t = w_hh.T.astype(bf16)
        b = (b_ih + b_hh)[None, :]

        def step(carry, x_t, w_ih_t=w_ih_t, w_hh_t=w_hh_t, b=b):
            h, c = carry
            gates = (jnp.dot(x_t.astype(bf16), w_ih_t,
                             preferred_element_type=jnp.float32)
                     + jnp.dot(h.astype(bf16), w_hh_t,
                               preferred_element_type=jnp.float32)
                     + b)
            i = jax.nn.sigmoid(gates[:, 0 * H:1 * H])
            f = jax.nn.sigmoid(gates[:, 1 * H:2 * H])
            g = jnp.tanh(gates[:, 2 * H:3 * H])
            o = jax.nn.sigmoid(gates[:, 3 * H:4 * H])
            c = f * c + i * g
            h = o * jnp.tanh(c)
            return (h, c), h

        init = (jnp.zeros((B, H), jnp.float32), jnp.zeros((B, H), jnp.float32))
        (h, _), seq = jax.lax.scan(step, init, seq)
    return (jnp.dot(h.astype(bf16), params["fc_w"].T.astype(bf16),
                    preferred_element_type=jnp.float32)
            + params["fc_b"][None, :])


if __name__ == "__main__":
    B, T = 2, 8
    input_size, hidden_size, output_size, num_layers = 16, 32, 4, 2

    key = jax.random.PRNGKey(0)
    key, kx, kparams = jax.random.split(key, 3)
    x = jax.random.normal(kx, (B, T, input_size), jnp.float32)
    params = init_params(kparams, input_size, hidden_size, output_size, num_layers)
    kernel_params = pack_params(params)

    out = local_lstm_forward(x, kernel_params)
    jax.block_until_ready(out)
    assert out.shape == (B, output_size), out.shape

    ref = reference_forward(x, params)
    assert jnp.allclose(out, ref, atol=1e-3, rtol=1e-3), (out, ref)

    print("KERNEL_OK")
</pallas_src>

<mosaic_0001>
module attributes {stable_mosaic.version = 11 : i64} {
  func.func @kernel(%arg0: memref<64x128xbf16, #tpu.memory_space<vmem>>, %arg1: memref<128x512xbf16, #tpu.memory_space<vmem>>, %arg2: memref<128x512xbf16, #tpu.memory_space<vmem>>, %arg3: memref<1x512xf32, #tpu.memory_space<vmem>>, %arg4: memref<128x512xbf16, #tpu.memory_space<vmem>>, %arg5: memref<128x512xbf16, #tpu.memory_space<vmem>>, %arg6: memref<1x512xf32, #tpu.memory_space<vmem>>, %arg7: memref<128x128xbf16, #tpu.memory_space<vmem>>, %arg8: memref<1x128xf32, #tpu.memory_space<vmem>>, %arg9: memref<8x128xf32, #tpu.memory_space<vmem>>, %arg10: memref<64x512xf32, #tpu.memory_space<vmem>>, %arg11: memref<64x128xf32, #tpu.memory_space<vmem>>) attributes {dimension_semantics = [], scalar_prefetch = 0 : i64, scratch_operands = 2 : i64, tpu.core_type = #tpu.core_type<tc>} {
    %c0 = arith.constant 0 : index
    %c0_0 = arith.constant 0 : index
    %0 = vector.load %arg0[%c0, %c0_0] : memref<64x128xbf16, #tpu.memory_space<vmem>>, vector<64x128xbf16>
    %c0_1 = arith.constant 0 : index
    %c0_2 = arith.constant 0 : index
    %1 = vector.load %arg1[%c0_1, %c0_2] : memref<128x512xbf16, #tpu.memory_space<vmem>>, vector<128x512xbf16>
    %cst = arith.constant dense<0.000000e+00> : vector<64x512xf32>
    %2 = tpu.matmul %0, %1, %cst {dimension_numbers = #tpu.dot_dimension_numbers<[1], [0], [0], [1], [0, 0, 1, 1], [], []>} : vector<64x128xbf16>, vector<128x512xbf16>, vector<64x512xf32> -> vector<64x512xf32>
    %c0_3 = arith.constant 0 : index
    %c0_4 = arith.constant 0 : index
    %3 = vector.load %arg3[%c0_3, %c0_4] : memref<1x512xf32, #tpu.memory_space<vmem>>, vector<1x512xf32>
    %4 = vector.broadcast %3 : vector<1x512xf32> to vector<64x512xf32>
    %5 = arith.addf %2, %4 : vector<64x512xf32>
    %c0_5 = arith.constant 0 : index
    %c0_6 = arith.constant 0 : index
    %6 = vector.load %arg10[%c0_5, %c0_6] : memref<64x512xf32, #tpu.memory_space<vmem>>, vector<64x512xf32>
    tpu.vector_store %arg10[%c0_5, %c0_6], %5 {strides = array<i32>} : memref<64x512xf32, #tpu.memory_space<vmem>>, vector<64x512xf32>,
    %cst_7 = arith.constant 0.000000e+00 : f32
    %7 = vector.broadcast %cst_7 : f32 to vector<8x128xf32>
    %cst_8 = arith.constant 0.000000e+00 : f32
    %8 = vector.broadcast %cst_8 : f32 to vector<8x128xf32>
    %c0_i32 = arith.constant 0 : i32
    %c8_i32 = arith.constant 8 : i32
    %9 = arith.muli %c0_i32, %c8_i32 : i32
    %10 = tpu.assume_multiple %9, 8 : i32
    %11 = arith.index_cast %10 : i32 to index
    %c0_9 = arith.constant 0 : index
    %12 = vector.load %arg10[%11, %c0_9] : memref<64x512xf32, #tpu.memory_space<vmem>>, vector<8x512xf32>
    %13 = arith.truncf %7 : vector<8x128xf32> to vector<8x128xbf16>
    %c0_10 = arith.constant 0 : index
    %c0_11 = arith.constant 0 : index
    %14 = vector.load %arg2[%c0_10, %c0_11] : memref<128x512xbf16, #tpu.memory_space<vmem>>, vector<128x512xbf16>
    %cst_12 = arith.constant dense<0.000000e+00> : vector<8x512xf32>
    %15 = tpu.matmul %13, %14, %cst_12 {dimension_numbers = #tpu.dot_dimension_numbers<[1], [0], [0], [1], [0, 0, 1, 1], [], []>} : vector<8x128xbf16>, vector<128x512xbf16>, vector<8x512xf32> -> vector<8x512xf32>
    %16 = arith.addf %12, %15 : vector<8x512xf32>
    %17 = vector.extract_strided_slice %16 {offsets = [0, 0], sizes = [8, 384], strides = [1, 1]} : vector<8x512xf32> to vector<8x384xf32>
    %18 = arith.negf %17 : vector<8x384xf32>
    %19 = math.exp %18 : vector<8x384xf32>
    %cst_13 = arith.constant 1.000000e+00 : f32
    %20 = vector.broadcast %cst_13 : f32 to vector<8x384xf32>
    %21 = arith.addf %20, %19 : vector<8x384xf32>
    %22 = arith.divf %20, %21 : vector<8x384xf32>
    %23 = vector.extract_strided_slice %22 {offsets = [0, 0], sizes = [8, 128], strides = [1, 1]} : vector<8x384xf32> to vector<8x128xf32>
    %24 = vector.extract_strided_slice %22 {offsets = [0, 128], sizes = [8, 128], strides = [1, 1]} : vector<8x384xf32> to vector<8x128xf32>
    %25 = vector.extract_strided_slice %22 {offsets = [0, 256], sizes = [8, 128], strides = [1, 1]} : vector<8x384xf32> to vector<8x128xf32>
    %26 = vector.extract_strided_slice %16 {offsets = [0, 384], sizes = [8, 128], strides = [1, 1]} : vector<8x512xf32> to vector<8x128xf32>
    %27 = math.tanh %26 : vector<8x128xf32>
    %28 = arith.mulf %24, %8 : vector<8x128xf32>
    %29 = arith.mulf %23, %27 : vector<8x128xf32>
    %30 = arith.addf %28, %29 : vector<8x128xf32>
    %31 = math.tanh %30 : vector<8x128xf32>
    %32 = arith.mulf %25, %31 : vector<8x128xf32>
    %33 = arith.index_cast %10 : i32 to index
    %c0_14 = arith.constant 0 : index
    %34 = vector.load %arg11[%33, %c0_14] : memref<64x128xf32, #tpu.memory_space<vmem>>, vector<8x128xf32>
    tpu.vector_store %arg11[%33, %c0_14], %32 {strides = array<i32>} : memref<64x128xf32, #tpu.memory_space<vmem>>, vector<8x128xf32>,
    %c1_i32 = arith.constant 1 : i32
    %c8_i32_15 = arith.constant 8 : i32
    %35 = arith.muli %c1_i32, %c8_i32_15 : i32
    %36 = tpu.assume_multiple %35, 8 : i32
    %37 = arith.index_cast %36 : i32 to index
    %c0_16 = arith.constant 0 : index
    %38 = vector.load %arg10[%37, %c0_16] : memref<64x512xf32, #tpu.memory_space<vmem>>, vector<8x512xf32>
    %39 = arith.truncf %32 : vector<8x128xf32> to vector<8x128xbf16>
    %c0_17 = arith.constant 0 : index
    %c0_18 = arith.constant 0 : index
    %40 = vector.load %arg2[%c0_17, %c0_18] : memref<128x512xbf16, #tpu.memory_space<vmem>>, vector<128x512xbf16>
    %cst_19 = arith.constant dense<0.000000e+00> : vector<8x512xf32>
    %41 = tpu.matmul %39, %40, %cst_19 {dimension_numbers = #tpu.dot_dimension_numbers<[1], [0], [0], [1], [0, 0, 1, 1], [], []>} : vector<8x128xbf16>, vector<128x512xbf16>, vector<8x512xf32> -> vector<8x512xf32>
    %42 = arith.addf %38, %41 : vector<8x512xf32>
    %43 = vector.extract_strided_slice %42 {offsets = [0, 0], sizes = [8, 384], strides = [1, 1]} : vector<8x512xf32> to vector<8x384xf32>
    %44 = arith.negf %43 : vector<8x384xf32>
    %45 = math.exp %44 : vector<8x384xf32>
    %cst_20 = arith.constant 1.000000e+00 : f32
    %46 = vector.broadcast %cst_20 : f32 to vector<8x384xf32>
    %47 = arith.addf %46, %45 : vector<8x384xf32>
    %48 = arith.divf %46, %47 : vector<8x384xf32>
    %49 = vector.extract_strided_slice %48 {offsets = [0, 0], sizes = [8, 128], strides = [1, 1]} : vector<8x384xf32> to vector<8x128xf32>
    %50 = vector.extract_strided_slice %48 {offsets = [0, 128], sizes = [8, 128], strides = [1, 1]} : vector<8x384xf32> to vector<8x128xf32>
    %51 = vector.extract_strided_slice %48 {offsets = [0, 256], sizes = [8, 128], strides = [1, 1]} : vector<8x384xf32> to vector<8x128xf32>
    %52 = vector.extract_strided_slice %42 {offsets = [0, 384], sizes = [8, 128], strides = [1, 1]} : vector<8x512xf32> to vector<8x128xf32>
    %53 = math.tanh %52 : vector<8x128xf32>
    %54 = arith.mulf %50, %30 : vector<8x128xf32>
    %55 = arith.mulf %49, %53 : vector<8x128xf32>
    %56 = arith.addf %54, %55 : vector<8x128xf32>
    %57 = math.tanh %56 : vector<8x128xf32>
    %58 = arith.mulf %51, %57 : vector<8x128xf32>
    %59 = arith.index_cast %36 : i32 to index
    %c0_21 = arith.constant 0 : index
    %60 = vector.load %arg11[%59, %c0_21] : memref<64x128xf32, #tpu.memory_space<vmem>>, vector<8x128xf32>
    tpu.vector_store %arg11[%59, %c0_21], %58 {strides = array<i32>} : memref<64x128xf32, #tpu.memory_space<vmem>>, vector<8x128xf32>,
    %c2_i32 = arith.constant 2 : i32
    %c8_i32_22 = arith.constant 8 : i32
    %61 = arith.muli %c2_i32, %c8_i32_22 : i32
    %62 = tpu.assume_multiple %61, 8 : i32
    %63 = arith.index_cast %62 : i32 to index
    %c0_23 = arith.constant 0 : index
    %64 = vector.load %arg10[%63, %c0_23] : memref<64x512xf32, #tpu.memory_space<vmem>>, vector<8x512xf32>
    %65 = arith.truncf %58 : vector<8x128xf32> to vector<8x128xbf16>
    %c0_24 = arith.constant 0 : index
    %c0_25 = arith.constant 0 : index
    %66 = vector.load %arg2[%c0_24, %c0_25] : memref<128x512xbf16, #tpu.memory_space<vmem>>, vector<128x512xbf16>
    %cst_26 = arith.constant dense<0.000000e+00> : vector<8x512xf32>
    %67 = tpu.matmul %65, %66, %cst_26 {dimension_numbers = #tpu.dot_dimension_numbers<[1], [0], [0], [1], [0, 0, 1, 1], [], []>} : vector<8x128xbf16>, vector<128x512xbf16>, vector<8x512xf32> -> vector<8x512xf32>
    %68 = arith.addf %64, %67 : vector<8x512xf32>
    %69 = vector.extract_strided_slice %68 {offsets = [0, 0], sizes = [8, 384], strides = [1, 1]} : vector<8x512xf32> to vector<8x384xf32>
    %70 = arith.negf %69 : vector<8x384xf32>
    %71 = math.exp %70 : vector<8x384xf32>
    %cst_27 = arith.constant 1.000000e+00 : f32
    %72 = vector.broadcast %cst_27 : f32 to vector<8x384xf32>
    %73 = arith.addf %72, %71 : vector<8x384xf32>
    %74 = arith.divf %72, %73 : vector<8x384xf32>
    %75 = vector.extract_strided_slice %74 {offsets = [0, 0], sizes = [8, 128], strides = [1, 1]} : vector<8x384xf32> to vector<8x128xf32>
    %76 = vector.extract_strided_slice %74 {offsets = [0, 128], sizes = [8, 128], strides = [1, 1]} : vector<8x384xf32> to vector<8x128xf32>
    %77 = vector.extract_strided_slice %74 {offsets = [0, 256], sizes = [8, 128], strides = [1, 1]} : vector<8x384xf32> to vector<8x128xf32>
    %78 = vector.extract_strided_slice %68 {offsets = [0, 384], sizes = [8, 128], strides = [1, 1]} : vector<8x512xf32> to vector<8x128xf32>
    %79 = math.tanh %78 : vector<8x128xf32>
    %80 = arith.mulf %76, %56 : vector<8x128xf32>
    %81 = arith.mulf %75, %79 : vector<8x128xf32>
    %82 = arith.addf %80, %81 : vector<8x128xf32>
    %83 = math.tanh %82 : vector<8x128xf32>
    %84 = arith.mulf %77, %83 : vector<8x128xf32>
    %85 = arith.index_cast %62 : i32 to index
    %c0_28 = arith.constant 0 : index
    %86 = vector.load %arg11[%85, %c0_28] : memref<64x128xf32, #tpu.memory_space<vmem>>, vector<8x128xf32>
    tpu.vector_store %arg11[%85, %c0_28], %84 {strides = array<i32>} : memref<64x128xf32, #tpu.memory_space<vmem>>, vector<8x128xf32>,
    %c3_i32 = arith.constant 3 : i32
    %c8_i32_29 = arith.constant 8 : i32
    %87 = arith.muli %c3_i32, %c8_i32_29 : i32
    %88 = tpu.assume_multiple %87, 8 : i32
    %89 = arith.index_cast %88 : i32 to index
    %c0_30 = arith.constant 0 : index
    %90 = vector.load %arg10[%89, %c0_30] : memref<64x512xf32, #tpu.memory_space<vmem>>, vector<8x512xf32>
    %91 = arith.truncf %84 : vector<8x128xf32> to vector<8x128xbf16>
    %c0_31 = arith.constant 0 : index
    %c0_32 = arith.constant 0 : index
    %92 = vector.load %arg2[%c0_31, %c0_32] : memref<128x512xbf16, #tpu.memory_space<vmem>>, vector<128x512xbf16>
    %cst_33 = arith.constant dense<0.000000e+00> : vector<8x512xf32>
    %93 = tpu.matmul %91, %92, %cst_33 {dimension_numbers = #tpu.dot_dimension_numbers<[1], [0], [0], [1], [0, 0, 1, 1], [], []>} : vector<8x128xbf16>, vector<128x512xbf16>, vector<8x512xf32> -> vector<8x512xf32>
    %94 = arith.addf %90, %93 : vector<8x512xf32>
    %95 = vector.extract_strided_slice %94 {offsets = [0, 0], sizes = [8, 384], strides = [1, 1]} : vector<8x512xf32> to vector<8x384xf32>
    %96 = arith.negf %95 : vector<8x384xf32>
    %97 = math.exp %96 : vector<8x384xf32>
    %cst_34 = arith.constant 1.000000e+00 : f32
    %98 = vector.broadcast %cst_34 : f32 to vector<8x384xf32>
    %99 = arith.addf %98, %97 : vector<8x384xf32>
    %100 = arith.divf %98, %99 : vector<8x384xf32>
    %101 = vector.extract_strided_slice %100 {offsets = [0, 0], sizes = [8, 128], strides = [1, 1]} : vector<8x384xf32> to vector<8x128xf32>
    %102 = vector.extract_strided_slice %100 {offsets = [0, 128], sizes = [8, 128], strides = [1, 1]} : vector<8x384xf32> to vector<8x128xf32>
    %103 = vector.extract_strided_slice %100 {offsets = [0, 256], sizes = [8, 128], strides = [1, 1]} : vector<8x384xf32> to vector<8x128xf32>
    %104 = vector.extract_strided_slice %94 {offsets = [0, 384], sizes = [8, 128], strides = [1, 1]} : vector<8x512xf32> to vector<8x128xf32>
    %105 = math.tanh %104 : vector<8x128xf32>
    %106 = arith.mulf %102, %82 : vector<8x128xf32>
    %107 = arith.mulf %101, %105 : vector<8x128xf32>
    %108 = arith.addf %106, %107 : vector<8x128xf32>
    %109 = math.tanh %108 : vector<8x128xf32>
    %110 = arith.mulf %103, %109 : vector<8x128xf32>
    %111 = arith.index_cast %88 : i32 to index
    %c0_35 = arith.constant 0 : index
    %112 = vector.load %arg11[%111, %c0_35] : memref<64x128xf32, #tpu.memory_space<vmem>>, vector<8x128xf32>
    tpu.vector_store %arg11[%111, %c0_35], %110 {strides = array<i32>} : memref<64x128xf32, #tpu.memory_space<vmem>>, vector<8x128xf32>,
    %c4_i32 = arith.constant 4 : i32
    %c8_i32_36 = arith.constant 8 : i32
    %113 = arith.muli %c4_i32, %c8_i32_36 : i32
    %114 = tpu.assume_multiple %113, 8 : i32
    %115 = arith.index_cast %114 : i32 to index
    %c0_37 = arith.constant 0 : index
    %116 = vector.load %arg10[%115, %c0_37] : memref<64x512xf32, #tpu.memory_space<vmem>>, vector<8x512xf32>
    %117 = arith.truncf %110 : vector<8x128xf32> to vector<8x128xbf16>
    %c0_38 = arith.constant 0 : index
    %c0_39 = arith.constant 0 : index
    %118 = vector.load %arg2[%c0_38, %c0_39] : memref<128x512xbf16, #tpu.memory_space<vmem>>, vector<128x512xbf16>
    %cst_40 = arith.constant dense<0.000000e+00> : vector<8x512xf32>
    %119 = tpu.matmul %117, %118, %cst_40 {dimension_numbers = #tpu.dot_dimension_numbers<[1], [0], [0], [1], [0, 0, 1, 1], [], []>} : vector<8x128xbf16>, vector<128x512xbf16>, vector<8x512xf32> -> vector<8x512xf32>
    %120 = arith.addf %116, %119 : vector<8x512xf32>
    %121 = vector.extract_strided_slice %120 {offsets = [0, 0], sizes = [8, 384], strides = [1, 1]} : vector<8x512xf32> to vector<8x384xf32>
    %122 = arith.negf %121 : vector<8x384xf32>
    %123 = math.exp %122 : vector<8x384xf32>
    %cst_41 = arith.constant 1.000000e+00 : f32
    %124 = vector.broadcast %cst_41 : f32 to vector<8x384xf32>
    %125 = arith.addf %124, %123 : vector<8x384xf32>
    %126 = arith.divf %124, %125 : vector<8x384xf32>
    %127 = vector.extract_strided_slice %126 {offsets = [0, 0], sizes = [8, 128], strides = [1, 1]} : vector<8x384xf32> to vector<8x128xf32>
    %128 = vector.extract_strided_slice %126 {offsets = [0, 128], sizes = [8, 128], strides = [1, 1]} : vector<8x384xf32> to vector<8x128xf32>
    %129 = vector.extract_strided_slice %126 {offsets = [0, 256], sizes = [8, 128], strides = [1, 1]} : vector<8x384xf32> to vector<8x128xf32>
    %130 = vector.extract_strided_slice %120 {offsets = [0, 384], sizes = [8, 128], strides = [1, 1]} : vector<8x512xf32> to vector<8x128xf32>
    %131 = math.tanh %130 : vector<8x128xf32>
    %132 = arith.mulf %128, %108 : vector<8x128xf32>
    %133 = arith.mulf %127, %131 : vector<8x128xf32>
    %134 = arith.addf %132, %133 : vector<8x128xf32>
    %135 = math.tanh %134 : vector<8x128xf32>
    %136 = arith.mulf %129, %135 : vector<8x128xf32>
    %137 = arith.index_cast %114 : i32 to index
    %c0_42 = arith.constant 0 : index
    %138 = vector.load %arg11[%137, %c0_42] : memref<64x128xf32, #tpu.memory_space<vmem>>, vector<8x128xf32>
    tpu.vector_store %arg11[%137, %c0_42], %136 {strides = array<i32>} : memref<64x128xf32, #tpu.memory_space<vmem>>, vector<8x128xf32>,
    %c5_i32 = arith.constant 5 : i32
    %c8_i32_43 = arith.constant 8 : i32
    %139 = arith.muli %c5_i32, %c8_i32_43 : i32
    %140 = tpu.assume_multiple %139, 8 : i32
    %141 = arith.index_cast %140 : i32 to index
    %c0_44 = arith.constant 0 : index
    %142 = vector.load %arg10[%141, %c0_44] : memref<64x512xf32, #tpu.memory_space<vmem>>, vector<8x512xf32>
    %143 = arith.truncf %136 : vector<8x128xf32> to vector<8x128xbf16>
    %c0_45 = arith.constant 0 : index
    %c0_46 = arith.constant 0 : index
    %144 = vector.load %arg2[%c0_45, %c0_46] : memref<128x512xbf16, #tpu.memory_space<vmem>>, vector<128x512xbf16>
    %cst_47 = arith.constant dense<0.000000e+00> : vector<8x512xf32>
    %145 = tpu.matmul %143, %144, %cst_47 {dimension_numbers = #tpu.dot_dimension_numbers<[1], [0], [0], [1], [0, 0, 1, 1], [], []>} : vector<8x128xbf16>, vector<128x512xbf16>, vector<8x512xf32> -> vector<8x512xf32>
    %146 = arith.addf %142, %145 : vector<8x512xf32>
    %147 = vector.extract_strided_slice %146 {offsets = [0, 0], sizes = [8, 384], strides = [1, 1]} : vector<8x512xf32> to vector<8x384xf32>
    %148 = arith.negf %147 : vector<8x384xf32>
    %149 = math.exp %148 : vector<8x384xf32>
    %cst_48 = arith.constant 1.000000e+00 : f32
    %150 = vector.broadcast %cst_48 : f32 to vector<8x384xf32>
    %151 = arith.addf %150, %149 : vector<8x384xf32>
    %152 = arith.divf %150, %151 : vector<8x384xf32>
    %153 = vector.extract_strided_slice %152 {offsets = [0, 0], sizes = [8, 128], strides = [1, 1]} : vector<8x384xf32> to vector<8x128xf32>
    %154 = vector.extract_strided_slice %152 {offsets = [0, 128], sizes = [8, 128], strides = [1, 1]} : vector<8x384xf32> to vector<8x128xf32>
    %155 = vector.extract_strided_slice %152 {offsets = [0, 256], sizes = [8, 128], strides = [1, 1]} : vector<8x384xf32> to vector<8x128xf32>
    %156 = vector.extract_strided_slice %146 {offsets = [0, 384], sizes = [8, 128], strides = [1, 1]} : vector<8x512xf32> to vector<8x128xf32>
    %157 = math.tanh %156 : vector<8x128xf32>
    %158 = arith.mulf %154, %134 : vector<8x128xf32>
    %159 = arith.mulf %153, %157 : vector<8x128xf32>
    %160 = arith.addf %158, %159 : vector<8x128xf32>
    %161 = math.tanh %160 : vector<8x128xf32>
    %162 = arith.mulf %155, %161 : vector<8x128xf32>
    %163 = arith.index_cast %140 : i32 to index
    %c0_49 = arith.constant 0 : index
    %164 = vector.load %arg11[%163, %c0_49] : memref<64x128xf32, #tpu.memory_space<vmem>>, vector<8x128xf32>
    tpu.vector_store %arg11[%163, %c0_49], %162 {strides = array<i32>} : memref<64x128xf32, #tpu.memory_space<vmem>>, vector<8x128xf32>,
    %c6_i32 = arith.constant 6 : i32
    %c8_i32_50 = arith.constant 8 : i32
    %165 = arith.muli %c6_i32, %c8_i32_50 : i32
    %166 = tpu.assume_multiple %165, 8 : i32
    %167 = arith.index_cast %166 : i32 to index
    %c0_51 = arith.constant 0 : index
    %168 = vector.load %arg10[%167, %c0_51] : memref<64x512xf32, #tpu.memory_space<vmem>>, vector<8x512xf32>
    %169 = arith.truncf %162 : vector<8x128xf32> to vector<8x128xbf16>
    %c0_52 = arith.constant 0 : index
    %c0_53 = arith.constant 0 : index
    %170 = vector.load %arg2[%c0_52, %c0_53] : memref<128x512xbf16, #tpu.memory_space<vmem>>, vector<128x512xbf16>
    %cst_54 = arith.constant dense<0.000000e+00> : vector<8x512xf32>
    %171 = tpu.matmul %169, %170, %cst_54 {dimension_numbers = #tpu.dot_dimension_numbers<[1], [0], [0], [1], [0, 0, 1, 1], [], []>} : vector<8x128xbf16>, vector<128x512xbf16>, vector<8x512xf32> -> vector<8x512xf32>
    %172 = arith.addf %168, %171 : vector<8x512xf32>
    %173 = vector.extract_strided_slice %172 {offsets = [0, 0], sizes = [8, 384], strides = [1, 1]} : vector<8x512xf32> to vector<8x384xf32>
    %174 = arith.negf %173 : vector<8x384xf32>
    %175 = math.exp %174 : vector<8x384xf32>
    %cst_55 = arith.constant 1.000000e+00 : f32
    %176 = vector.broadcast %cst_55 : f32 to vector<8x384xf32>
    %177 = arith.addf %176, %175 : vector<8x384xf32>
    %178 = arith.divf %176, %177 : vector<8x384xf32>
    %179 = vector.extract_strided_slice %178 {offsets = [0, 0], sizes = [8, 128], strides = [1, 1]} : vector<8x384xf32> to vector<8x128xf32>
    %180 = vector.extract_strided_slice %178 {offsets = [0, 128], sizes = [8, 128], strides = [1, 1]} : vector<8x384xf32> to vector<8x128xf32>
    %181 = vector.extract_strided_slice %178 {offsets = [0, 256], sizes = [8, 128], strides = [1, 1]} : vector<8x384xf32> to vector<8x128xf32>
    %182 = vector.extract_strided_slice %172 {offsets = [0, 384], sizes = [8, 128], strides = [1, 1]} : vector<8x512xf32> to vector<8x128xf32>
    %183 = math.tanh %182 : vector<8x128xf32>
    %184 = arith.mulf %180, %160 : vector<8x128xf32>
    %185 = arith.mulf %179, %183 : vector<8x128xf32>
    %186 = arith.addf %184, %185 : vector<8x128xf32>
    %187 = math.tanh %186 : vector<8x128xf32>
    %188 = arith.mulf %181, %187 : vector<8x128xf32>
    %189 = arith.index_cast %166 : i32 to index
    %c0_56 = arith.constant 0 : index
    %190 = vector.load %arg11[%189, %c0_56] : memref<64x128xf32, #tpu.memory_space<vmem>>, vector<8x128xf32>
    tpu.vector_store %arg11[%189, %c0_56], %188 {strides = array<i32>} : memref<64x128xf32, #tpu.memory_space<vmem>>, vector<8x128xf32>,
    %c7_i32 = arith.constant 7 : i32
    %c8_i32_57 = arith.constant 8 : i32
    %191 = arith.muli %c7_i32, %c8_i32_57 : i32
    %192 = tpu.assume_multiple %191, 8 : i32
    %193 = arith.index_cast %192 : i32 to index
    %c0_58 = arith.constant 0 : index
    %194 = vector.load %arg10[%193, %c0_58] : memref<64x512xf32, #tpu.memory_space<vmem>>, vector<8x512xf32>
    %195 = arith.truncf %188 : vector<8x128xf32> to vector<8x128xbf16>
    %c0_59 = arith.constant 0 : index
    %c0_60 = arith.constant 0 : index
    %196 = vector.load %arg2[%c0_59, %c0_60] : memref<128x512xbf16, #tpu.memory_space<vmem>>, vector<128x512xbf16>
    %cst_61 = arith.constant dense<0.000000e+00> : vector<8x512xf32>
    %197 = tpu.matmul %195, %196, %cst_61 {dimension_numbers = #tpu.dot_dimension_numbers<[1], [0], [0], [1], [0, 0, 1, 1], [], []>} : vector<8x128xbf16>, vector<128x512xbf16>, vector<8x512xf32> -> vector<8x512xf32>
    %198 = arith.addf %194, %197 : vector<8x512xf32>
    %199 = vector.extract_strided_slice %198 {offsets = [0, 0], sizes = [8, 384], strides = [1, 1]} : vector<8x512xf32> to vector<8x384xf32>
    %200 = arith.negf %199 : vector<8x384xf32>
    %201 = math.exp %200 : vector<8x384xf32>
    %cst_62 = arith.constant 1.000000e+00 : f32
    %202 = vector.broadcast %cst_62 : f32 to vector<8x384xf32>
    %203 = arith.addf %202, %201 : vector<8x384xf32>
    %204 = arith.divf %202, %203 : vector<8x384xf32>
    %205 = vector.extract_strided_slice %204 {offsets = [0, 0], sizes = [8, 128], strides = [1, 1]} : vector<8x384xf32> to vector<8x128xf32>
    %206 = vector.extract_strided_slice %204 {offsets = [0, 128], sizes = [8, 128], strides = [1, 1]} : vector<8x384xf32> to vector<8x128xf32>
    %207 = vector.extract_strided_slice %204 {offsets = [0, 256], sizes = [8, 128], strides = [1, 1]} : vector<8x384xf32> to vector<8x128xf32>
    %208 = vector.extract_strided_slice %198 {offsets = [0, 384], sizes = [8, 128], strides = [1, 1]} : vector<8x512xf32> to vector<8x128xf32>
    %209 = math.tanh %208 : vector<8x128xf32>
    %210 = arith.mulf %206, %186 : vector<8x128xf32>
    %211 = arith.mulf %205, %209 : vector<8x128xf32>
    %212 = arith.addf %210, %211 : vector<8x128xf32>
    %213 = math.tanh %212 : vector<8x128xf32>
    %214 = arith.mulf %207, %213 : vector<8x128xf32>
    %215 = arith.index_cast %192 : i32 to index
    %c0_63 = arith.constant 0 : index
    %216 = vector.load %arg11[%215, %c0_63] : memref<64x128xf32, #tpu.memory_space<vmem>>, vector<8x128xf32>
    tpu.vector_store %arg11[%215, %c0_63], %214 {strides = array<i32>} : memref<64x128xf32, #tpu.memory_space<vmem>>, vector<8x128xf32>,
    %c8_i32_64 = arith.constant 8 : i32
    %c0_65 = arith.constant 0 : index
    %c0_66 = arith.constant 0 : index
    %217 = vector.load %arg11[%c0_65, %c0_66] : memref<64x128xf32, #tpu.memory_space<vmem>>, vector<64x128xf32>
    %218 = arith.truncf %217 : vector<64x128xf32> to vector<64x128xbf16>
    %c0_67 = arith.constant 0 : index
    %c0_68 = arith.constant 0 : index
    %219 = vector.load %arg4[%c0_67, %c0_68] : memref<128x512xbf16, #tpu.memory_space<vmem>>, vector<128x512xbf16>
    %cst_69 = arith.constant dense<0.000000e+00> : vector<64x512xf32>
    %220 = tpu.matmul %218, %219, %cst_69 {dimension_numbers = #tpu.dot_dimension_numbers<[1], [0], [0], [1], [0, 0, 1, 1], [], []>} : vector<64x128xbf16>, vector<128x512xbf16>, vector<64x512xf32> -> vector<64x512xf32>
    %c0_70 = arith.constant 0 : index
    %c0_71 = arith.constant 0 : index
    %221 = vector.load %arg6[%c0_70, %c0_71] : memref<1x512xf32, #tpu.memory_space<vmem>>, vector<1x512xf32>
    %222 = vector.broadcast %221 : vector<1x512xf32> to vector<64x512xf32>
    %223 = arith.addf %220, %222 : vector<64x512xf32>
    %c0_72 = arith.constant 0 : index
    %c0_73 = arith.constant 0 : index
    %224 = vector.load %arg10[%c0_72, %c0_73] : memref<64x512xf32, #tpu.memory_space<vmem>>, vector<64x512xf32>
    tpu.vector_store %arg10[%c0_72, %c0_73], %223 {strides = array<i32>} : memref<64x512xf32, #tpu.memory_space<vmem>>, vector<64x512xf32>,
    %cst_74 = arith.constant 0.000000e+00 : f32
    %225 = vector.broadcast %cst_74 : f32 to vector<8x128xf32>
    %cst_75 = arith.constant 0.000000e+00 : f32
    %226 = vector.broadcast %cst_75 : f32 to vector<8x128xf32>
    %c0_i32_76 = arith.constant 0 : i32
    %c8_i32_77 = arith.constant 8 : i32
    %227 = arith.muli %c0_i32_76, %c8_i32_77 : i32
    %228 = tpu.assume_multiple %227, 8 : i32
    %229 = arith.index_cast %228 : i32 to index
    %c0_78 = arith.constant 0 : index
    %230 = vector.load %arg10[%229, %c0_78] : memref<64x512xf32, #tpu.memory_space<vmem>>, vector<8x512xf32>
    %231 = arith.truncf %225 : vector<8x128xf32> to vector<8x128xbf16>
    %c0_79 = arith.constant 0 : index
    %c0_80 = arith.constant 0 : index
    %232 = vector.load %arg5[%c0_79, %c0_80] : memref<128x512xbf16, #tpu.memory_space<vmem>>, vector<128x512xbf16>
    %cst_81 = arith.constant dense<0.000000e+00> : vector<8x512xf32>
    %233 = tpu.matmul %231, %232, %cst_81 {dimension_numbers = #tpu.dot_dimension_numbers<[1], [0], [0], [1], [0, 0, 1, 1], [], []>} : vector<8x128xbf16>, vector<128x512xbf16>, vector<8x512xf32> -> vector<8x512xf32>
    %234 = arith.addf %230, %233 : vector<8x512xf32>
    %235 = vector.extract_strided_slice %234 {offsets = [0, 0], sizes = [8, 384], strides = [1, 1]} : vector<8x512xf32> to vector<8x384xf32>
    %236 = arith.negf %235 : vector<8x384xf32>
    %237 = math.exp %236 : vector<8x384xf32>
    %cst_82 = arith.constant 1.000000e+00 : f32
    %238 = vector.broadcast %cst_82 : f32 to vector<8x384xf32>
    %239 = arith.addf %238, %237 : vector<8x384xf32>
    %240 = arith.divf %238, %239 : vector<8x384xf32>
    %241 = vector.extract_strided_slice %240 {offsets = [0, 0], sizes = [8, 128], strides = [1, 1]} : vector<8x384xf32> to vector<8x128xf32>
    %242 = vector.extract_strided_slice %240 {offsets = [0, 128], sizes = [8, 128], strides = [1, 1]} : vector<8x384xf32> to vector<8x128xf32>
    %243 = vector.extract_strided_slice %240 {offsets = [0, 256], sizes = [8, 128], strides = [1, 1]} : vector<8x384xf32> to vector<8x128xf32>
    %244 = vector.extract_strided_slice %234 {offsets = [0, 384], sizes = [8, 128], strides = [1, 1]} : vector<8x512xf32> to vector<8x128xf32>
    %245 = math.tanh %244 : vector<8x128xf32>
    %246 = arith.mulf %242, %226 : vector<8x128xf32>
    %247 = arith.mulf %241, %245 : vector<8x128xf32>
    %248 = arith.addf %246, %247 : vector<8x128xf32>
    %249 = math.tanh %248 : vector<8x128xf32>
    %250 = arith.mulf %243, %249 : vector<8x128xf32>
    %c1_i32_83 = arith.constant 1 : i32
    %c8_i32_84 = arith.constant 8 : i32
    %251 = arith.muli %c1_i32_83, %c8_i32_84 : i32
    %252 = tpu.assume_multiple %251, 8 : i32
    %253 = arith.index_cast %252 : i32 to index
    %c0_85 = arith.constant 0 : index
    %254 = vector.load %arg10[%253, %c0_85] : memref<64x512xf32, #tpu.memory_space<vmem>>, vector<8x512xf32>
    %255 = arith.truncf %250 : vector<8x128xf32> to vector<8x128xbf16>
    %c0_86 = arith.constant 0 : index
    %c0_87 = arith.constant 0 : index
    %256 = vector.load %arg5[%c0_86, %c0_87] : memref<128x512xbf16, #tpu.memory_space<vmem>>, vector<128x512xbf16>
    %cst_88 = arith.constant dense<0.000000e+00> : vector<8x512xf32>
    %257 = tpu.matmul %255, %256, %cst_88 {dimension_numbers = #tpu.dot_dimension_numbers<[1], [0], [0], [1], [0, 0, 1, 1], [], []>} : vector<8x128xbf16>, vector<128x512xbf16>, vector<8x512xf32> -> vector<8x512xf32>
    %258 = arith.addf %254, %257 : vector<8x512xf32>
    %259 = vector.extract_strided_slice %258 {offsets = [0, 0], sizes = [8, 384], strides = [1, 1]} : vector<8x512xf32> to vector<8x384xf32>
    %260 = arith.negf %259 : vector<8x384xf32>
    %261 = math.exp %260 : vector<8x384xf32>
    %cst_89 = arith.constant 1.000000e+00 : f32
    %262 = vector.broadcast %cst_89 : f32 to vector<8x384xf32>
    %263 = arith.addf %262, %261 : vector<8x384xf32>
    %264 = arith.divf %262, %263 : vector<8x384xf32>
    %265 = vector.extract_strided_slice %264 {offsets = [0, 0], sizes = [8, 128], strides = [1, 1]} : vector<8x384xf32> to vector<8x128xf32>
    %266 = vector.extract_strided_slice %264 {offsets = [0, 128], sizes = [8, 128], strides = [1, 1]} : vector<8x384xf32> to vector<8x128xf32>
    %267 = vector.extract_strided_slice %264 {offsets = [0, 256], sizes = [8, 128], strides = [1, 1]} : vector<8x384xf32> to vector<8x128xf32>
    %268 = vector.extract_strided_slice %258 {offsets = [0, 384], sizes = [8, 128], strides = [1, 1]} : vector<8x512xf32> to vector<8x128xf32>
    %269 = math.tanh %268 : vector<8x128xf32>
    %270 = arith.mulf %266, %248 : vector<8x128xf32>
    %271 = arith.mulf %265, %269 : vector<8x128xf32>
    %272 = arith.addf %270, %271 : vector<8x128xf32>
    %273 = math.tanh %272 : vector<8x128xf32>
    %274 = arith.mulf %267, %273 : vector<8x128xf32>
    %c2_i32_90 = arith.constant 2 : i32
    %c8_i32_91 = arith.constant 8 : i32
    %275 = arith.muli %c2_i32_90, %c8_i32_91 : i32
    %276 = tpu.assume_multiple %275, 8 : i32
    %277 = arith.index_cast %276 : i32 to index
    %c0_92 = arith.constant 0 : index
    %278 = vector.load %arg10[%277, %c0_92] : memref<64x512xf32, #tpu.memory_space<vmem>>, vector<8x512xf32>
    %279 = arith.truncf %274 : vector<8x128xf32> to vector<8x128xbf16>
    %c0_93 = arith.constant 0 : index
    %c0_94 = arith.constant 0 : index
    %280 = vector.load %arg5[%c0_93, %c0_94] : memref<128x512xbf16, #tpu.memory_space<vmem>>, vector<128x512xbf16>
    %cst_95 = arith.constant dense<0.000000e+00> : vector<8x512xf32>
    %281 = tpu.matmul %279, %280, %cst_95 {dimension_numbers = #tpu.dot_dimension_numbers<[1], [0], [0], [1], [0, 0, 1, 1], [], []>} : vector<8x128xbf16>, vector<128x512xbf16>, vector<8x512xf32> -> vector<8x512xf32>
    %282 = arith.addf %278, %281 : vector<8x512xf32>
    %283 = vector.extract_strided_slice %282 {offsets = [0, 0], sizes = [8, 384], strides = [1, 1]} : vector<8x512xf32> to vector<8x384xf32>
    %284 = arith.negf %283 : vector<8x384xf32>
    %285 = math.exp %284 : vector<8x384xf32>
    %cst_96 = arith.constant 1.000000e+00 : f32
    %286 = vector.broadcast %cst_96 : f32 to vector<8x384xf32>
    %287 = arith.addf %286, %285 : vector<8x384xf32>
    %288 = arith.divf %286, %287 : vector<8x384xf32>
    %289 = vector.extract_strided_slice %288 {offsets = [0, 0], sizes = [8, 128], strides = [1, 1]} : vector<8x384xf32> to vector<8x128xf32>
    %290 = vector.extract_strided_slice %288 {offsets = [0, 128], sizes = [8, 128], strides = [1, 1]} : vector<8x384xf32> to vector<8x128xf32>
    %291 = vector.extract_strided_slice %288 {offsets = [0, 256], sizes = [8, 128], strides = [1, 1]} : vector<8x384xf32> to vector<8x128xf32>
    %292 = vector.extract_strided_slice %282 {offsets = [0, 384], sizes = [8, 128], strides = [1, 1]} : vector<8x512xf32> to vector<8x128xf32>
    %293 = math.tanh %292 : vector<8x128xf32>
    %294 = arith.mulf %290, %272 : vector<8x128xf32>
    %295 = arith.mulf %289, %293 : vector<8x128xf32>
    %296 = arith.addf %294, %295 : vector<8x128xf32>
    %297 = math.tanh %296 : vector<8x128xf32>
    %298 = arith.mulf %291, %297 : vector<8x128xf32>
    %c3_i32_97 = arith.constant 3 : i32
    %c8_i32_98 = arith.constant 8 : i32
    %299 = arith.muli %c3_i32_97, %c8_i32_98 : i32
    %300 = tpu.assume_multiple %299, 8 : i32
    %301 = arith.index_cast %300 : i32 to index
    %c0_99 = arith.constant 0 : index
    %302 = vector.load %arg10[%301, %c0_99] : memref<64x512xf32, #tpu.memory_space<vmem>>, vector<8x512xf32>
    %303 = arith.truncf %298 : vector<8x128xf32> to vector<8x128xbf16>
    %c0_100 = arith.constant 0 : index
    %c0_101 = arith.constant 0 : index
    %304 = vector.load %arg5[%c0_100, %c0_101] : memref<128x512xbf16, #tpu.memory_space<vmem>>, vector<128x512xbf16>
    %cst_102 = arith.constant dense<0.000000e+00> : vector<8x512xf32>
    %305 = tpu.matmul %303, %304, %cst_102 {dimension_numbers = #tpu.dot_dimension_numbers<[1], [0], [0], [1], [0, 0, 1, 1], [], []>} : vector<8x128xbf16>, vector<128x512xbf16>, vector<8x512xf32> -> vector<8x512xf32>
    %306 = arith.addf %302, %305 : vector<8x512xf32>
    %307 = vector.extract_strided_slice %306 {offsets = [0, 0], sizes = [8, 384], strides = [1, 1]} : vector<8x512xf32> to vector<8x384xf32>
    %308 = arith.negf %307 : vector<8x384xf32>
    %309 = math.exp %308 : vector<8x384xf32>
    %cst_103 = arith.constant 1.000000e+00 : f32
    %310 = vector.broadcast %cst_103 : f32 to vector<8x384xf32>
    %311 = arith.addf %310, %309 : vector<8x384xf32>
    %312 = arith.divf %310, %311 : vector<8x384xf32>
    %313 = vector.extract_strided_slice %312 {offsets = [0, 0], sizes = [8, 128], strides = [1, 1]} : vector<8x384xf32> to vector<8x128xf32>
    %314 = vector.extract_strided_slice %312 {offsets = [0, 128], sizes = [8, 128], strides = [1, 1]} : vector<8x384xf32> to vector<8x128xf32>
    %315 = vector.extract_strided_slice %312 {offsets = [0, 256], sizes = [8, 128], strides = [1, 1]} : vector<8x384xf32> to vector<8x128xf32>
    %316 = vector.extract_strided_slice %306 {offsets = [0, 384], sizes = [8, 128], strides = [1, 1]} : vector<8x512xf32> to vector<8x128xf32>
    %317 = math.tanh %316 : vector<8x128xf32>
    %318 = arith.mulf %314, %296 : vector<8x128xf32>
    %319 = arith.mulf %313, %317 : vector<8x128xf32>
    %320 = arith.addf %318, %319 : vector<8x128xf32>
    %321 = math.tanh %320 : vector<8x128xf32>
    %322 = arith.mulf %315, %321 : vector<8x128xf32>
    %c4_i32_104 = arith.constant 4 : i32
    %c8_i32_105 = arith.constant 8 : i32
    %323 = arith.muli %c4_i32_104, %c8_i32_105 : i32
    %324 = tpu.assume_multiple %323, 8 : i32
    %325 = arith.index_cast %324 : i32 to index
    %c0_106 = arith.constant 0 : index
    %326 = vector.load %arg10[%325, %c0_106] : memref<64x512xf32, #tpu.memory_space<vmem>>, vector<8x512xf32>
    %327 = arith.truncf %322 : vector<8x128xf32> to vector<8x128xbf16>
    %c0_107 = arith.constant 0 : index
    %c0_108 = arith.constant 0 : index
    %328 = vector.load %arg5[%c0_107, %c0_108] : memref<128x512xbf16, #tpu.memory_space<vmem>>, vector<128x512xbf16>
    %cst_109 = arith.constant dense<0.000000e+00> : vector<8x512xf32>
    %329 = tpu.matmul %327, %328, %cst_109 {dimension_numbers = #tpu.dot_dimension_numbers<[1], [0], [0], [1], [0, 0, 1, 1], [], []>} : vector<8x128xbf16>, vector<128x512xbf16>, vector<8x512xf32> -> vector<8x512xf32>
    %330 = arith.addf %326, %329 : vector<8x512xf32>
    %331 = vector.extract_strided_slice %330 {offsets = [0, 0], sizes = [8, 384], strides = [1, 1]} : vector<8x512xf32> to vector<8x384xf32>
    %332 = arith.negf %331 : vector<8x384xf32>
    %333 = math.exp %332 : vector<8x384xf32>
    %cst_110 = arith.constant 1.000000e+00 : f32
    %334 = vector.broadcast %cst_110 : f32 to vector<8x384xf32>
    %335 = arith.addf %334, %333 : vector<8x384xf32>
    %336 = arith.divf %334, %335 : vector<8x384xf32>
    %337 = vector.extract_strided_slice %336 {offsets = [0, 0], sizes = [8, 128], strides = [1, 1]} : vector<8x384xf32> to vector<8x128xf32>
    %338 = vector.extract_strided_slice %336 {offsets = [0, 128], sizes = [8, 128], strides = [1, 1]} : vector<8x384xf32> to vector<8x128xf32>
    %339 = vector.extract_strided_slice %336 {offsets = [0, 256], sizes = [8, 128], strides = [1, 1]} : vector<8x384xf32> to vector<8x128xf32>
    %340 = vector.extract_strided_slice %330 {offsets = [0, 384], sizes = [8, 128], strides = [1, 1]} : vector<8x512xf32> to vector<8x128xf32>
    %341 = math.tanh %340 : vector<8x128xf32>
    %342 = arith.mulf %338, %320 : vector<8x128xf32>
    %343 = arith.mulf %337, %341 : vector<8x128xf32>
    %344 = arith.addf %342, %343 : vector<8x128xf32>
    %345 = math.tanh %344 : vector<8x128xf32>
    %346 = arith.mulf %339, %345 : vector<8x128xf32>
    %c5_i32_111 = arith.constant 5 : i32
    %c8_i32_112 = arith.constant 8 : i32
    %347 = arith.muli %c5_i32_111, %c8_i32_112 : i32
    %348 = tpu.assume_multiple %347, 8 : i32
    %349 = arith.index_cast %348 : i32 to index
    %c0_113 = arith.constant 0 : index
    %350 = vector.load %arg10[%349, %c0_113] : memref<64x512xf32, #tpu.memory_space<vmem>>, vector<8x512xf32>
    %351 = arith.truncf %346 : vector<8x128xf32> to vector<8x128xbf16>
    %c0_114 = arith.constant 0 : index
    %c0_115 = arith.constant 0 : index
    %352 = vector.load %arg5[%c0_114, %c0_115] : memref<128x512xbf16, #tpu.memory_space<vmem>>, vector<128x512xbf16>
    %cst_116 = arith.constant dense<0.000000e+00> : vector<8x512xf32>
    %353 = tpu.matmul %351, %352, %cst_116 {dimension_numbers = #tpu.dot_dimension_numbers<[1], [0], [0], [1], [0, 0, 1, 1], [], []>} : vector<8x128xbf16>, vector<128x512xbf16>, vector<8x512xf32> -> vector<8x512xf32>
    %354 = arith.addf %350, %353 : vector<8x512xf32>
    %355 = vector.extract_strided_slice %354 {offsets = [0, 0], sizes = [8, 384], strides = [1, 1]} : vector<8x512xf32> to vector<8x384xf32>
    %356 = arith.negf %355 : vector<8x384xf32>
    %357 = math.exp %356 : vector<8x384xf32>
    %cst_117 = arith.constant 1.000000e+00 : f32
    %358 = vector.broadcast %cst_117 : f32 to vector<8x384xf32>
    %359 = arith.addf %358, %357 : vector<8x384xf32>
    %360 = arith.divf %358, %359 : vector<8x384xf32>
    %361 = vector.extract_strided_slice %360 {offsets = [0, 0], sizes = [8, 128], strides = [1, 1]} : vector<8x384xf32> to vector<8x128xf32>
    %362 = vector.extract_strided_slice %360 {offsets = [0, 128], sizes = [8, 128], strides = [1, 1]} : vector<8x384xf32> to vector<8x128xf32>
    %363 = vector.extract_strided_slice %360 {offsets = [0, 256], sizes = [8, 128], strides = [1, 1]} : vector<8x384xf32> to vector<8x128xf32>
    %364 = vector.extract_strided_slice %354 {offsets = [0, 384], sizes = [8, 128], strides = [1, 1]} : vector<8x512xf32> to vector<8x128xf32>
    %365 = math.tanh %364 : vector<8x128xf32>
    %366 = arith.mulf %362, %344 : vector<8x128xf32>
    %367 = arith.mulf %361, %365 : vector<8x128xf32>
    %368 = arith.addf %366, %367 : vector<8x128xf32>
    %369 = math.tanh %368 : vector<8x128xf32>
    %370 = arith.mulf %363, %369 : vector<8x128xf32>
    %c6_i32_118 = arith.constant 6 : i32
    %c8_i32_119 = arith.constant 8 : i32
    %371 = arith.muli %c6_i32_118, %c8_i32_119 : i32
    %372 = tpu.assume_multiple %371, 8 : i32
    %373 = arith.index_cast %372 : i32 to index
    %c0_120 = arith.constant 0 : index
    %374 = vector.load %arg10[%373, %c0_120] : memref<64x512xf32, #tpu.memory_space<vmem>>, vector<8x512xf32>
    %375 = arith.truncf %370 : vector<8x128xf32> to vector<8x128xbf16>
    %c0_121 = arith.constant 0 : index
    %c0_122 = arith.constant 0 : index
    %376 = vector.load %arg5[%c0_121, %c0_122] : memref<128x512xbf16, #tpu.memory_space<vmem>>, vector<128x512xbf16>
    %cst_123 = arith.constant dense<0.000000e+00> : vector<8x512xf32>
    %377 = tpu.matmul %375, %376, %cst_123 {dimension_numbers = #tpu.dot_dimension_numbers<[1], [0], [0], [1], [0, 0, 1, 1], [], []>} : vector<8x128xbf16>, vector<128x512xbf16>, vector<8x512xf32> -> vector<8x512xf32>
    %378 = arith.addf %374, %377 : vector<8x512xf32>
    %379 = vector.extract_strided_slice %378 {offsets = [0, 0], sizes = [8, 384], strides = [1, 1]} : vector<8x512xf32> to vector<8x384xf32>
    %380 = arith.negf %379 : vector<8x384xf32>
    %381 = math.exp %380 : vector<8x384xf32>
    %cst_124 = arith.constant 1.000000e+00 : f32
    %382 = vector.broadcast %cst_124 : f32 to vector<8x384xf32>
    %383 = arith.addf %382, %381 : vector<8x384xf32>
    %384 = arith.divf %382, %383 : vector<8x384xf32>
    %385 = vector.extract_strided_slice %384 {offsets = [0, 0], sizes = [8, 128], strides = [1, 1]} : vector<8x384xf32> to vector<8x128xf32>
    %386 = vector.extract_strided_slice %384 {offsets = [0, 128], sizes = [8, 128], strides = [1, 1]} : vector<8x384xf32> to vector<8x128xf32>
    %387 = vector.extract_strided_slice %384 {offsets = [0, 256], sizes = [8, 128], strides = [1, 1]} : vector<8x384xf32> to vector<8x128xf32>
    %388 = vector.extract_strided_slice %378 {offsets = [0, 384], sizes = [8, 128], strides = [1, 1]} : vector<8x512xf32> to vector<8x128xf32>
    %389 = math.tanh %388 : vector<8x128xf32>
    %390 = arith.mulf %386, %368 : vector<8x128xf32>
    %391 = arith.mulf %385, %389 : vector<8x128xf32>
    %392 = arith.addf %390, %391 : vector<8x128xf32>
    %393 = math.tanh %392 : vector<8x128xf32>
    %394 = arith.mulf %387, %393 : vector<8x128xf32>
    %c7_i32_125 = arith.constant 7 : i32
    %c8_i32_126 = arith.constant 8 : i32
    %395 = arith.muli %c7_i32_125, %c8_i32_126 : i32
    %396 = tpu.assume_multiple %395, 8 : i32
    %397 = arith.index_cast %396 : i32 to index
    %c0_127 = arith.constant 0 : index
    %398 = vector.load %arg10[%397, %c0_127] : memref<64x512xf32, #tpu.memory_space<vmem>>, vector<8x512xf32>
    %399 = arith.truncf %394 : vector<8x128xf32> to vector<8x128xbf16>
    %c0_128 = arith.constant 0 : index
    %c0_129 = arith.constant 0 : index
    %400 = vector.load %arg5[%c0_128, %c0_129] : memref<128x512xbf16, #tpu.memory_space<vmem>>, vector<128x512xbf16>
    %cst_130 = arith.constant dense<0.000000e+00> : vector<8x512xf32>
    %401 = tpu.matmul %399, %400, %cst_130 {dimension_numbers = #tpu.dot_dimension_numbers<[1], [0], [0], [1], [0, 0, 1, 1], [], []>} : vector<8x128xbf16>, vector<128x512xbf16>, vector<8x512xf32> -> vector<8x512xf32>
    %402 = arith.addf %398, %401 : vector<8x512xf32>
    %403 = vector.extract_strided_slice %402 {offsets = [0, 0], sizes = [8, 384], strides = [1, 1]} : vector<8x512xf32> to vector<8x384xf32>
    %404 = arith.negf %403 : vector<8x384xf32>
    %405 = math.exp %404 : vector<8x384xf32>
    %cst_131 = arith.constant 1.000000e+00 : f32
    %406 = vector.broadcast %cst_131 : f32 to vector<8x384xf32>
    %407 = arith.addf %406, %405 : vector<8x384xf32>
    %408 = arith.divf %406, %407 : vector<8x384xf32>
    %409 = vector.extract_strided_slice %408 {offsets = [0, 0], sizes = [8, 128], strides = [1, 1]} : vector<8x384xf32> to vector<8x128xf32>
    %410 = vector.extract_strided_slice %408 {offsets = [0, 128], sizes = [8, 128], strides = [1, 1]} : vector<8x384xf32> to vector<8x128xf32>
    %411 = vector.extract_strided_slice %408 {offsets = [0, 256], sizes = [8, 128], strides = [1, 1]} : vector<8x384xf32> to vector<8x128xf32>
    %412 = vector.extract_strided_slice %402 {offsets = [0, 384], sizes = [8, 128], strides = [1, 1]} : vector<8x512xf32> to vector<8x128xf32>
    %413 = math.tanh %412 : vector<8x128xf32>
    %414 = arith.mulf %410, %392 : vector<8x128xf32>
    %415 = arith.mulf %409, %413 : vector<8x128xf32>
    %416 = arith.addf %414, %415 : vector<8x128xf32>
    %417 = math.tanh %416 : vector<8x128xf32>
    %418 = arith.mulf %411, %417 : vector<8x128xf32>
    %c8_i32_132 = arith.constant 8 : i32
    %419 = arith.truncf %418 : vector<8x128xf32> to vector<8x128xbf16>
    %c0_133 = arith.constant 0 : index
    %c0_134 = arith.constant 0 : index
    %420 = vector.load %arg7[%c0_133, %c0_134] : memref<128x128xbf16, #tpu.memory_space<vmem>>, vector<128x128xbf16>
    %cst_135 = arith.constant dense<0.000000e+00> : vector<8x128xf32>
    %421 = tpu.matmul %419, %420, %cst_135 {dimension_numbers = #tpu.dot_dimension_numbers<[1], [0], [0], [1], [0, 0, 1, 1], [], []>} : vector<8x128xbf16>, vector<128x128xbf16>, vector<8x128xf32> -> vector<8x128xf32>
    %c0_136 = arith.constant 0 : index
    %c0_137 = arith.constant 0 : index
    %422 = vector.load %arg8[%c0_136, %c0_137] : memref<1x128xf32, #tpu.memory_space<vmem>>, vector<1x128xf32>
    %423 = vector.broadcast %422 : vector<1x128xf32> to vector<8x128xf32>
    %424 = arith.addf %421, %423 : vector<8x128xf32>
    %c0_138 = arith.constant 0 : index
    %c0_139 = arith.constant 0 : index
    %425 = vector.load %arg9[%c0_138, %c0_139] : memref<8x128xf32, #tpu.memory_space<vmem>>, vector<8x128xf32>
    tpu.vector_store %arg9[%c0_138, %c0_139], %424 {strides = array<i32>} : memref<8x128xf32, #tpu.memory_space<vmem>>, vector<8x128xf32>,
    return
  }
}

</mosaic_0001>

<bundles_post_ra>
// kernel: tpu_custom_call.1
= control target key start
LH: loop header
LB: loop body
LE: loop exit
PB: predicated region body
PF: predicated region fallthrough
CT: control target
= control target key end

     0   :  { %14 = vsyncpa [#allocation5], 0  ;;  %s7957_s0 = inlined_call_operand.hbm [shape: bf16[64,128], index: 0, kind: input, shape index: {}]   ;;  %s7958_s1 = inlined_call_operand.hbm [shape: bf16[128,512], index: 1, kind: input, shape index: {}]   ;;  %s7959_s2 = inlined_call_operand.hbm [shape: bf16[128,512], index: 2, kind: input, shape index: {}]   ;;  %s7960_s3 = inlined_call_operand.hbm [shape: f32[1,512], index: 3, kind: input, shape index: {}]   ;;  %s7961_s4 = inlined_call_operand.hbm [shape: bf16[128,512], index: 4, kind: input, shape index: {}]   ;;  %s7962_s5 = inlined_call_operand.hbm [shape: bf16[128,512], index: 5, kind: input, shape index: {}]   ;;  %s7963_s6 = inlined_call_operand.vmem [shape: f32[1,512], index: 6, kind: input, shape index: {}]   ;;  %s7964_s7 = inlined_call_operand.hbm [shape: bf16[128,128], index: 7, kind: input, shape index: {}]   ;;  %s7965_s8 = inlined_call_operand.vmem [shape: f32[1,128], index: 8, kind: input, shape index: {}]   ;;  %s7966_s9 = inlined_call_operand.hbm [shape: f32[8,128], index: 9, kind: output, shape index: {}]  }
   0x1   :  { %15 = vsyncpa [#allocation8], 0 }
   0x2   :  { %16 = vsyncpa [#allocation11], 0 }
   0x3   :  { %17 = vsyncpa [#allocation14], 0  ;;  %s36_s11 = sshll.u32 %s7958_s1, 4  ;;  %s37_s11 = int_to_ptr.hbm [resolvable:$true] %s36_s11 }
   0x4   :  { %18 = vsyncpa [#allocation6], 0  ;;  %s7084_s12 = smov [#allocation7]   ;;  %s63_s16 = sshll.u32 %s7960_s3, 4  ;;  %s64_s16 = int_to_ptr.hbm [resolvable:$true] %s63_s16 }
   0x5   :  { %s38_s13 = sshll.u32 %s7084_s12, 4  ;;  %s7085_s17 = smov 256   ;;  %s39_s13 = int_to_ptr.vmem [resolvable:$true] %s38_s13 }
   0x6   :  { %s7086_s18 = smov 16   ;;  %s7087_s19 = smov [#allocation10]  }
   0x7   :  { %44 = dma.hbm_to_vmem [thread:$0]  %s37_s11, 4096, %s39_s13, [#allocation8], %s7085_s17, %s7085_s17, %s7086_s18  }
   0x8   :  { %s65_s20 = sshll.u32 %s7087_s19, 4  ;;  %s86_s22 = sshll.u32 %s7962_s5, 4  ;;  %s66_s20 = int_to_ptr.vmem [resolvable:$true] %s65_s20  ;;  %s87_s22 = int_to_ptr.hbm [resolvable:$true] %s86_s22 }
   0x9   :  { %68 = dma.hbm_to_vmem [thread:$0]  %s64_s16, 64, %s66_s20, [#allocation11]  }
   0xa   :  { %s23_s3 = sshll.u32 %s7957_s0, 4  ;;  %s7088_s25 = smov [#allocation13]   ;;  %s24_s3 = int_to_ptr.hbm [resolvable:$true] %s23_s3 }
   0xb   :  { %s88_s26 = sshll.u32 %s7088_s25, 4  ;;  %s7089_s27 = smov [#allocation4]   ;;  %s89_s26 = int_to_ptr.vmem [resolvable:$true] %s88_s26 }
   0xc   :  { %94 = dma.hbm_to_vmem [thread:$0]  %s87_s22, 4096, %s89_s26, [#allocation14], %s7085_s17, %s7085_s17, %s7086_s18  }
   0xd   :  { %s25_s28 = sshll.u32 %s7089_s27, 4  ;;  %s7090_s29 = smov 64   ;;  %s26_s28 = int_to_ptr.vmem [resolvable:$true] %s25_s28 }
   0xe   :  { %s7091_s5 = smov 4   ;;  %s49_s11 = sshll.u32 %s7959_s2, 4  ;;  %s50_s11 = int_to_ptr.hbm [resolvable:$true] %s49_s11 }
   0xf   :  { %31 = dma.hbm_to_vmem [thread:$0]  %s24_s3, 512, %s26_s28, [#allocation5], %s7090_s29, %s7090_s29, %s7091_s5  }
  0x10   :  { %s7092_s0 = smov [#allocation9]   ;;  %s73_s15 = sshll.u32 %s7961_s4, 4  ;;  %s74_s15 = int_to_ptr.hbm [resolvable:$true] %s73_s15 }
  0x11   :  { %s51_s12 = sshll.u32 %s7092_s0, 4  ;;  %s7093_s16 = smov [#allocation12]   ;;  %s52_s12 = int_to_ptr.vmem [resolvable:$true] %s51_s12 }
  0x12   :  { %57 = dma.hbm_to_vmem [thread:$0]  %s50_s11, 4096, %s52_s12, [#allocation8], %s7085_s17, %s7085_s17, %s7086_s18  }
  0x13   :  { %s75_s19 = sshll.u32 %s7093_s16, 4  ;;  %s101_s1 = sshll.u32 %s7964_s7, 4  ;;  %s76_s19 = int_to_ptr.vmem [resolvable:$true] %s75_s19  ;;  %s102_s1 = int_to_ptr.hbm [resolvable:$true] %s101_s1 }
  0x14   :  { %81 = dma.hbm_to_vmem [thread:$0]  %s74_s15, 4096, %s76_s19, [#allocation11], %s7085_s17, %s7085_s17, %s7086_s18  }
  0x15   :  { %s7094_s2 = smov [#allocation15]  }
  0x16   :  { %s103_s22 = sshll.u32 %s7094_s2, 4  ;;  %s104_s22 = int_to_ptr.vmem [resolvable:$true] %s103_s22 }
  0x17   :  { %109 = dma.hbm_to_vmem [thread:$0]  %s102_s1, 1024, %s104_s22, [#allocation14], %s7090_s29, %s7090_s29, %s7091_s5  }
  0x18   :  { %7074 = dma.done.wait [#allocation5], 512  }
  0x19   :  { %7075 = vsyncadd [#allocation5], 4294966784 }
  0x1a   :  { %7076 = dma.done.wait [#allocation8], 8192  }
  0x1b   :  { %7077 = vsyncadd [#allocation8], 4294959104 }
  0x1c   :  { %7078 = dma.done.wait [#allocation11], 4160  }
  0x1d   :  { %7079 = vsyncadd [#allocation11], 4294963136 }
  0x1e   :  { %7080 = dma.done.wait [#allocation14], 5120  }
  0x1f   :  { %7081 = vsyncadd [#allocation14], 4294962176  ;;  %v4874_v0 = vld [vmem:[#allocation7 + $0xe0] sm:$0xf]  ;;  %v6282_v1 = vld [vmem:[#allocation7 + $0xec] sm:$0xf0] }
  0x20   :  { %v6280_v2 = vld [vmem:[#allocation7 + $0xe4] sm:$0xf]  ;;  %v4875_v3 = vor.u32 %v6282_v1, %v4874_v0  ;;  %v4876_v4 = vld [vmem:[#allocation7 + $0xf0] sm:$0xf0]  ;;  %v4882_v5 = vld [vmem:[#allocation7 + $0xe8] sm:$0xf] }
  0x21   :  { %v6283_v6 = vld [vmem:[#allocation7 + $0xf4] sm:$0xf0]  ;;  %v4879_v7 = vor.u32 %v6280_v2, %v4876_v4  ;;  %v6281_v9 = vld [vmem:[#allocation7 + $0xec] sm:$0xf]  ;;  %v4884_v10 = vld [vmem:[#allocation7 + $0xf8] sm:$0xf0] }
  0x22   :  { %v4883_v8 = vor.u32 %v6283_v6, %v4882_v5  ;;  %v4858_v11 = vld [vmem:[#allocation7 + $0xc0] sm:$0xf]  ;;  %375 = vmatpush.bf16.msra.mxu0 %v4875_v3  ;;  %v4887_v12 = vor.u32 %v6281_v9, %v4884_v10  ;;  %v6278_v13 = vld [vmem:[#allocation7 + $0xcc] sm:$0xf0]  ;;  %v6276_v14 = vld [vmem:[#allocation7 + $0xc4] sm:$0xf] }
  0x23   :  { %v4860_v15 = vld [vmem:[#allocation7 + $0xd0] sm:$0xf0]  ;;  %404 = vmatpush.bf16.msra.mxu1 %v4879_v7  ;;  %v4859_v16 = vor.u32 %v6278_v13, %v4858_v11  ;;  %v4866_v18 = vld [vmem:[#allocation7 + $0xc8] sm:$0xf]  ;;  %v6279_v19 = vld [vmem:[#allocation7 + $0xd4] sm:$0xf0] }
  0x24   :  { %433 = vmatpush.bf16.msra.mxu2 %v4883_v8  ;;  %v4863_v17 = vor.u32 %v6276_v14, %v4860_v15  ;;  %v6277_v20 = vld [vmem:[#allocation7 + $0xcc] sm:$0xf]  ;;  %462 = vmatpush.bf16.msra.mxu3 %v4887_v12  ;;  %v4867_v21 = vor.u32 %v6279_v19, %v4866_v18  ;;  %v4868_v22 = vld [vmem:[#allocation7 + $0xd8] sm:$0xf0]  ;;  %v4842_v23 = vld [vmem:[#allocation7 + $0xa0] sm:$0xf] }
  0x25   :  { %v6274_v24 = vld [vmem:[#allocation7 + $0xac] sm:$0xf0]  ;;  %v4871_v25 = vor.u32 %v6277_v20, %v4868_v22  ;;  %v6272_v26 = vld [vmem:[#allocation7 + $0xa4] sm:$0xf]  ;;  %v4844_v27 = vld [vmem:[#allocation7 + $0xb0] sm:$0xf0] }
  0x26   :  { %v4850_v28 = vld [vmem:[#allocation7 + $0xa8] sm:$0xf]  ;;  %376 = vmatpush.bf16.msra.mxu0 %v4859_v16  ;;  %v4843_v29 = vor.u32 %v6274_v24, %v4842_v23  ;;  %v6275_v30 = vld [vmem:[#allocation7 + $0xb4] sm:$0xf0]  ;;  %v6273_v31 = vld [vmem:[#allocation7 + $0xac] sm:$0xf]  ;;  %v4847_v33 = vor.u32 %v6272_v26, %v4844_v27 }
  0x27   :  { %v4852_v32 = vld [vmem:[#allocation7 + $0xb8] sm:$0xf0]  ;;  %405 = vmatpush.bf16.msra.mxu1 %v4863_v17  ;;  %v4851_v34 = vor.u32 %v6275_v30, %v4850_v28  ;;  %v4826_v35 = vld [vmem:[#allocation7 + $0x80] sm:$0xf]  ;;  %v6270_v36 = vld [vmem:[#allocation7 + $0x8c] sm:$0xf0] }
  0x28   :  { %434 = vmatpush.bf16.msra.mxu2 %v4867_v21  ;;  %v6268_v37 = vld [vmem:[#allocation7 + $0x84] sm:$0xf]  ;;  %463 = vmatpush.bf16.msra.mxu3 %v4871_v25  ;;  %v4855_v38 = vor.u32 %v6273_v31, %v4852_v32  ;;  %v4828_v39 = vld [vmem:[#allocation7 + $0x90] sm:$0xf0]  ;;  %v4834_v40 = vld [vmem:[#allocation7 + $0x88] sm:$0xf]  ;;  %v4827_v44 = vor.u32 %v6270_v36, %v4826_v35 }
  0x29   :  { %v6271_v41 = vld [vmem:[#allocation7 + $0x94] sm:$0xf0]  ;;  %v6269_v42 = vld [vmem:[#allocation7 + $0x8c] sm:$0xf]  ;;  %v4836_v43 = vld [vmem:[#allocation7 + $0x98] sm:$0xf0]  ;;  %v4831_v45 = vor.u32 %v6268_v37, %v4828_v39 }
  0x2a   :  { %377 = vmatpush.bf16.msra.mxu0 %v4843_v29  ;;  %v4835_v46 = vor.u32 %v6271_v41, %v4834_v40  ;;  %v4810_v47 = vld [vmem:[#allocation7 + $0x60] sm:$0xf]  ;;  %v6266_v48 = vld [vmem:[#allocation7 + $0x6c] sm:$0xf0]  ;;  %v6264_v49 = vld [vmem:[#allocation7 + $0x64] sm:$0xf]  ;;  %v4839_v50 = vor.u32 %v6269_v42, %v4836_v43 }
  0x2b   :  { %406 = vmatpush.bf16.msra.mxu1 %v4847_v33  ;;  %v4812_v51 = vld [vmem:[#allocation7 + $0x70] sm:$0xf0]  ;;  %v4818_v52 = vld [vmem:[#allocation7 + $0x68] sm:$0xf]  ;;  %v6267_v53 = vld [vmem:[#allocation7 + $0x74] sm:$0xf0]  ;;  %v4811_v56 = vor.u32 %v6266_v48, %v4810_v47 }
  0x2c   :  { %435 = vmatpush.bf16.msra.mxu2 %v4851_v34  ;;  %464 = vmatpush.bf16.msra.mxu3 %v4855_v38  ;;  %v6265_v54 = vld [vmem:[#allocation7 + $0x6c] sm:$0xf]  ;;  %v4820_v55 = vld [vmem:[#allocation7 + $0x78] sm:$0xf0]  ;;  %v4815_v57 = vor.u32 %v6264_v49, %v4812_v51  ;;  %v4819_v58 = vor.u32 %v6267_v53, %v4818_v52  ;;  %v4794_v59 = vld [vmem:[#allocation7 + $0x40] sm:$0xf] }
  0x2d   :  { %v6262_v60 = vld [vmem:[#allocation7 + $0x4c] sm:$0xf0]  ;;  %v6260_v61 = vld [vmem:[#allocation7 + $0x44] sm:$0xf]  ;;  %v4823_v62 = vor.u32 %v6265_v54, %v4820_v55  ;;  %v4796_v63 = vld [vmem:[#allocation7 + $0x50] sm:$0xf0] }
  0x2e   :  { %378 = vmatpush.bf16.msra.mxu0 %v4827_v44  ;;  %v4802_v0 = vld [vmem:[#allocation7 + $0x48] sm:$0xf]  ;;  %v6263_v1 = vld [vmem:[#allocation7 + $0x54] sm:$0xf0]  ;;  %v6261_v2 = vld [vmem:[#allocation7 + $0x4c] sm:$0xf]  ;;  %v4795_v4 = vor.u32 %v6262_v60, %v4794_v59  ;;  %v4799_v5 = vor.u32 %v6260_v61, %v4796_v63 }
  0x2f   :  { %407 = vmatpush.bf16.msra.mxu1 %v4831_v45  ;;  %v4804_v3 = vld [vmem:[#allocation7 + $0x58] sm:$0xf0]  ;;  %v4803_v6 = vor.u32 %v6263_v1, %v4802_v0  ;;  %v4778_v7 = vld [vmem:[#allocation7 + $0x20] sm:$0xf]  ;;  %v6258_v8 = vld [vmem:[#allocation7 + $0x2c] sm:$0xf0] }
  0x30   :  { %436 = vmatpush.bf16.msra.mxu2 %v4835_v46  ;;  %465 = vmatpush.bf16.msra.mxu3 %v4839_v50  ;;  %v6256_v9 = vld [vmem:[#allocation7 + $0x24] sm:$0xf]  ;;  %v4807_v10 = vor.u32 %v6261_v2, %v4804_v3  ;;  %v4780_v11 = vld [vmem:[#allocation7 + $0x30] sm:$0xf0]  ;;  %v4786_v12 = vld [vmem:[#allocation7 + $0x28] sm:$0xf]  ;;  %v4779_v16 = vor.u32 %v6258_v8, %v4778_v7 }
  0x31   :  { %v6259_v13 = vld [vmem:[#allocation7 + $0x34] sm:$0xf0]  ;;  %v6257_v14 = vld [vmem:[#allocation7 + $0x2c] sm:$0xf]  ;;  %v4788_v15 = vld [vmem:[#allocation7 + $0x38] sm:$0xf0]  ;;  %v4783_v18 = vor.u32 %v6256_v9, %v4780_v11 }
  0x32   :  { %379 = vmatpush.bf16.msra.mxu0 %v4811_v56  ;;  %v4762_v17 = vld [vmem:[#allocation7] sm:$0xf]  ;;  %v4787_v19 = vor.u32 %v6259_v13, %v4786_v12  ;;  %v6254_v20 = vld [vmem:[#allocation7 + $0xc] sm:$0xf0]  ;;  %v6252_v21 = vld [vmem:[#allocation7 + $0x4] sm:$0xf]  ;;  %v4791_v23 = vor.u32 %v6257_v14, %v4788_v15 }
  0x33   :  { %408 = vmatpush.bf16.msra.mxu1 %v4815_v57  ;;  %v4764_v22 = vld [vmem:[#allocation7 + $0x10] sm:$0xf0]  ;;  %v4770_v24 = vld [vmem:[#allocation7 + $0x8] sm:$0xf]  ;;  %v6255_v25 = vld [vmem:[#allocation7 + $0x14] sm:$0xf0]  ;;  %v4763_v30 = vor.u32 %v6254_v20, %v4762_v17 }
  0x34   :  { %437 = vmatpush.bf16.msra.mxu2 %v4819_v58  ;;  %466 = vmatpush.bf16.msra.mxu3 %v4823_v62  ;;  %v6253_v26 = vld [vmem:[#allocation7 + $0xc] sm:$0xf]  ;;  %v4772_v27 = vld [vmem:[#allocation7 + $0x18] sm:$0xf0]  ;;  %v5002_v28 = vld [vmem:[#allocation9 + $0xe0] sm:$0xf]  ;;  %v4767_v33 = vor.u32 %v6252_v21, %v4764_v22  ;;  %v4771_v34 = vor.u32 %v6255_v25, %v4770_v24 }
  0x35   :  { %v6314_v29 = vld [vmem:[#allocation9 + $0xec] sm:$0xf0]  ;;  %v6312_v31 = vld [vmem:[#allocation9 + $0xe4] sm:$0xf]  ;;  %v5004_v32 = vld [vmem:[#allocation9 + $0xf0] sm:$0xf0]  ;;  %v4775_v36 = vor.u32 %v6253_v26, %v4772_v27 }
  0x36   :  { %380 = vmatpush.bf16.msra.mxu0 %v4795_v4  ;;  %v6248_v35 = vld [vmem:[#allocation4] sm:$0xff]  ;;  %v5003_v37 = vor.u32 %v6314_v29, %v5002_v28  ;;  %v5010_v38 = vld [vmem:[#allocation9 + $0xe8] sm:$0xf]  ;;  %v6315_v39 = vld [vmem:[#allocation9 + $0xf4] sm:$0xf0]  ;;  %v5007_v41 = vor.u32 %v6312_v31, %v5004_v32  ;;  %s7096_s18 = smov [#allocation16]  }
  0x37   :  { %409 = vmatpush.bf16.msra.mxu1 %v4799_v5  ;;  %v4986_v40 = vld [vmem:[#allocation9 + $0xc0] sm:$0xf]  ;;  %v6310_v42 = vld [vmem:[#allocation9 + $0xcc] sm:$0xf0]  ;;  %v6313_v43 = vld [vmem:[#allocation9 + $0xec] sm:$0xf]  ;;  %v5011_v47 = vor.u32 %v6315_v39, %v5010_v38 }
  0x38   :  { %438 = vmatpush.bf16.msra.mxu2 %v4803_v6  ;;  %467 = vmatpush.bf16.msra.mxu3 %v4807_v10  ;;  %v5012_v44 = vld [vmem:[#allocation9 + $0xf8] sm:$0xf0]  ;;  %v6308_v45 = vld [vmem:[#allocation9 + $0xc4] sm:$0xf]  ;;  %v4988_v46 = vld [vmem:[#allocation9 + $0xd0] sm:$0xf0]  ;;  %v4987_v48 = vor.u32 %v6310_v42, %v4986_v40 }
  0x39   :  { %v4994_v49 = vld [vmem:[#allocation9 + $0xc8] sm:$0xf]  ;;  %v6311_v50 = vld [vmem:[#allocation9 + $0xd4] sm:$0xf0]  ;;  %v5015_v51 = vor.u32 %v6313_v43, %v5012_v44  ;;  %v4970_v52 = vld [vmem:[#allocation9 + $0xa0] sm:$0xf]  ;;  %v4991_v53 = vor.u32 %v6308_v45, %v4988_v46 }
  0x3a   :  { %381 = vmatpush.bf16.msra.mxu0 %v4779_v16  ;;  %v6306_v54 = vld [vmem:[#allocation9 + $0xac] sm:$0xf0]  ;;  %v6309_v55 = vld [vmem:[#allocation9 + $0xcc] sm:$0xf]  ;;  %v4996_v56 = vld [vmem:[#allocation9 + $0xd8] sm:$0xf0]  ;;  %v4995_v59 = vor.u32 %v6311_v50, %v4994_v49 }
  0x3b   :  { %410 = vmatpush.bf16.msra.mxu1 %v4783_v18  ;;  %v6304_v57 = vld [vmem:[#allocation9 + $0xa4] sm:$0xf]  ;;  %v4972_v58 = vld [vmem:[#allocation9 + $0xb0] sm:$0xf0]  ;;  %v4971_v60 = vor.u32 %v6306_v54, %v4970_v52  ;;  %v4978_v61 = vld [vmem:[#allocation9 + $0xa8] sm:$0xf]  ;;  %v4999_v63 = vor.u32 %v6309_v55, %v4996_v56 }
  0x3c   :  { %439 = vmatpush.bf16.msra.mxu2 %v4787_v19  ;;  %468 = vmatpush.bf16.msra.mxu3 %v4791_v23  ;;  %v6307_v62 = vld [vmem:[#allocation9 + $0xb4] sm:$0xf0]  ;;  %v4954_v0 = vld [vmem:[#allocation9 + $0x80] sm:$0xf]  ;;  %v4975_v1 = vor.u32 %v6304_v57, %v4972_v58  ;;  %v6302_v2 = vld [vmem:[#allocation9 + $0x8c] sm:$0xf0] }
  0x3d   :  { %v6305_v3 = vld [vmem:[#allocation9 + $0xac] sm:$0xf]  ;;  %v4980_v4 = vld [vmem:[#allocation9 + $0xb8] sm:$0xf0]  ;;  %v6300_v5 = vld [vmem:[#allocation9 + $0x84] sm:$0xf]  ;;  %v4979_v7 = vor.u32 %v6307_v62, %v4978_v61  ;;  %v4955_v8 = vor.u32 %v6302_v2, %v4954_v0 }
  0x3e   :  { %382 = vmatpush.bf16.msra.mxu0 %v4763_v30  ;;  %v4956_v6 = vld [vmem:[#allocation9 + $0x90] sm:$0xf0]  ;;  %v4962_v9 = vld [vmem:[#allocation9 + $0x88] sm:$0xf]  ;;  %v6303_v10 = vld [vmem:[#allocation9 + $0x94] sm:$0xf0]  ;;  %v4983_v11 = vor.u32 %v6305_v3, %v4980_v4 }
  0x3f   :  { %411 = vmatpush.bf16.msra.mxu1 %v4767_v33  ;;  %v4938_v12 = vld [vmem:[#allocation9 + $0x60] sm:$0xf]  ;;  %v4959_v13 = vor.u32 %v6300_v5, %v4956_v6  ;;  %v6298_v14 = vld [vmem:[#allocation9 + $0x6c] sm:$0xf0]  ;;  %v6301_v15 = vld [vmem:[#allocation9 + $0x8c] sm:$0xf]  ;;  %v4963_v20 = vor.u32 %v6303_v10, %v4962_v9 }
  0x40   :  { %440 = vmatpush.bf16.msra.mxu2 %v4771_v34  ;;  %469 = vmatpush.bf16.msra.mxu3 %v4775_v36  ;;  %v4964_v16 = vld [vmem:[#allocation9 + $0x98] sm:$0xf0]  ;;  %v6296_v17 = vld [vmem:[#allocation9 + $0x64] sm:$0xf]  ;;  %v4940_v18 = vld [vmem:[#allocation9 + $0x70] sm:$0xf0]  ;;  %v4939_v21 = vor.u32 %v6298_v14, %v4938_v12 }
  0x41   :  { %383 = vmatmul.bf16.vlgmr.msra.gmra.mxu0 %v6248_v35  ;;  %v6249_v19 = vld [vmem:[#allocation4 + $0x8] sm:$0xff]  ;;  %v6299_v23 = vld [vmem:[#allocation9 + $0x74] sm:$0xf0]  ;;  %v4967_v24 = vor.u32 %v6301_v15, %v4964_v16  ;;  %v4922_v25 = vld [vmem:[#allocation9 + $0x40] sm:$0xf]  ;;  %v4943_v26 = vor.u32 %v6296_v17, %v4940_v18  ;;  %v7095_v4 = vmov 0  }
  0x42   :  { %722 = vmatpush.bf16.msrb.mxu0 %v5003_v37  ;;  %412 = vmatmul.bf16.vlgmr.msra.gmra.mxu1 %v6248_v35  ;;  %v4946_v22 = vld [vmem:[#allocation9 + $0x68] sm:$0xf]  ;;  %v6294_v27 = vld [vmem:[#allocation9 + $0x4c] sm:$0xf0]  ;;  %v6297_v28 = vld [vmem:[#allocation9 + $0x6c] sm:$0xf] }
  0x43   :  { %735 = vmatpush.bf16.msrb.mxu1 %v5007_v41  ;;  %441 = vmatmul.bf16.vlgmr.msra.gmra.mxu2 %v6248_v35  ;;  %v4948_v29 = vld [vmem:[#allocation9 + $0x78] sm:$0xf0]  ;;  %v6292_v30 = vld [vmem:[#allocation9 + $0x44] sm:$0xf]  ;;  %v4924_v31 = vld [vmem:[#allocation9 + $0x50] sm:$0xf0]  ;;  %v4947_v32 = vor.u32 %v6299_v23, %v4946_v22  ;;  %v4923_v33 = vor.u32 %v6294_v27, %v4922_v25 }
  0x44   :  { %470 = vmatmul.bf16.vlgmr.msra.gmra.mxu3 %v6248_v35  ;;  %748 = vmatpush.bf16.msrb.mxu2 %v5011_v47  ;;  %v4930_v34 = vld [vmem:[#allocation9 + $0x48] sm:$0xf]  ;;  %v6295_v35 = vld [vmem:[#allocation9 + $0x54] sm:$0xf0]  ;;  %v4951_v36 = vor.u32 %v6297_v28, %v4948_v29  ;;  %v4927_v37 = vor.u32 %v6292_v30, %v4924_v31  ;;  %v4906_v39 = vld [vmem:[#allocation9 + $0x20] sm:$0xf] }
  0x45   :  { %761 = vmatpush.bf16.msrb.mxu3 %v5015_v51  ;;  %v4931_v38 = vor.u32 %v6295_v35, %v4930_v34  ;;  %v6290_v40 = vld [vmem:[#allocation9 + $0x2c] sm:$0xf0]  ;;  %v6288_v41 = vld [vmem:[#allocation9 + $0x24] sm:$0xf]  ;;  %v4908_v43 = vld [vmem:[#allocation9 + $0x30] sm:$0xf0] }
  0x46   :  { %723 = vmatpush.bf16.msrb.mxu0 %v4987_v48  ;;  %v4907_v42 = vor.u32 %v6290_v40, %v4906_v39  ;;  %v4914_v44 = vld [vmem:[#allocation9 + $0x28] sm:$0xf]  ;;  %v6291_v45 = vld [vmem:[#allocation9 + $0x34] sm:$0xf0]  ;;  %v4911_v46 = vor.u32 %v6288_v41, %v4908_v43  ;;  %v6293_v47 = vld [vmem:[#allocation9 + $0x4c] sm:$0xf] }
  0x47   :  { %736 = vmatpush.bf16.msrb.mxu1 %v4991_v53  ;;  %v4932_v48 = vld [vmem:[#allocation9 + $0x58] sm:$0xf0]  ;;  %v4890_v49 = vld [vmem:[#allocation9] sm:$0xf]  ;;  %v6286_v51 = vld [vmem:[#allocation9 + $0xc] sm:$0xf0]  ;;  %v4915_v54 = vor.u32 %v6291_v45, %v4914_v44 }
  0x48   :  { %749 = vmatpush.bf16.msrb.mxu2 %v4995_v59  ;;  %v4935_v50 = vor.u32 %v6293_v47, %v4932_v48  ;;  %v6284_v52 = vld [vmem:[#allocation9 + $0x4] sm:$0xf]  ;;  %v4892_v53 = vld [vmem:[#allocation9 + $0x10] sm:$0xf0]  ;;  %v6289_v55 = vld [vmem:[#allocation9 + $0x2c] sm:$0xf]  ;;  %v4891_v57 = vor.u32 %v6286_v51, %v4890_v49 }
  0x49   :  { %762 = vmatpush.bf16.msrb.mxu3 %v4999_v63  ;;  %v4916_v56 = vld [vmem:[#allocation9 + $0x38] sm:$0xf0]  ;;  %v4898_v59 = vld [vmem:[#allocation9 + $0x8] sm:$0xf]  ;;  %v4895_v61 = vor.u32 %v6284_v52, %v4892_v53  ;;  %v6285_v62 = vld [vmem:[#allocation9 + $0xc] sm:$0xf] }
  0x4a   :  { %724 = vmatpush.bf16.msrb.mxu0 %v4971_v60  ;;  %v4919_v58 = vor.u32 %v6289_v55, %v4916_v56  ;;  %v6287_v60 = vld [vmem:[#allocation9 + $0x14] sm:$0xf0]  ;;  %v4900_v63 = vld [vmem:[#allocation9 + $0x18] sm:$0xf0]  ;;  %v6250_v2 = vld [vmem:[#allocation4 + $0x10] sm:$0xff]  ;;  %s4722_s23 = sshll.u32 %s7096_s18, 4  ;;  %s4723_s23 = int_to_ptr.vmem [resolvable:$true] %s4722_s23 }
  0x4b   :  { %737 = vmatpush.bf16.msrb.mxu1 %v4975_v1  ;;  %v4899_v0 = vor.u32 %v6287_v60, %v4898_v59  ;;  %v4903_v1 = vor.u32 %v6285_v62, %v4900_v63  ;;  %v6251_v3 = vld [vmem:[#allocation4 + $0x18] sm:$0xff]  ;;  %v5133_v40 = vld [vmem:[#allocation9 + $0xe0] sm:$0xf]  ;;  %v6346_v41 = vld [vmem:[#allocation9 + $0xec] sm:$0xf0]  ;;  %s4724_s25 = sshll.u32 %s7966_s9, 4  ;;  %s4725_s25 = int_to_ptr.hbm [resolvable:$true] %s4724_s25 }
  0x4c   :  { %750 = vmatpush.bf16.msrb.mxu2 %v4979_v7  ;;  %v5134_v44 = vor.u32 %v6346_v41, %v5133_v40  ;;  %v5135_v45 = vld [vmem:[#allocation9 + $0xf0] sm:$0xf0]  ;;  %v6347_v47 = vld [vmem:[#allocation9 + $0xf4] sm:$0xf0]  ;;  %v6345_v52 = vld [vmem:[#allocation9 + $0xec] sm:$0xf] }
  0x4d   :  { %763 = vmatpush.bf16.msrb.mxu3 %v4983_v11  ;;  %v181_v11 = vld [vmem:[#allocation10] sm:$0xf]  ;;  %v5143_v53 = vld [vmem:[#allocation9 + $0xf8] sm:$0xf0]  ;;  %v6342_v59 = vld [vmem:[#allocation9 + $0xcc] sm:$0xf0] }
  0x4e   :  { %725 = vmatpush.bf16.msrb.mxu0 %v4955_v8  ;;  %v7196_v12 = vperm.slane %v181_v11, 0  ;;  %v7200_v14 = vperm.slane %v181_v11, 1  ;;  %v5146_v56 = vor.u32 %v6345_v52, %v5143_v53  ;;  %v6340_v60 = vld [vmem:[#allocation9 + $0xc4] sm:$0xf]  ;;  %v5119_v62 = vld [vmem:[#allocation9 + $0xd0] sm:$0xf0] }
  0x4f   :  { %738 = vmatpush.bf16.msrb.mxu1 %v4959_v13  ;;  %v5125_v63 = vld [vmem:[#allocation9 + $0xc8] sm:$0xf]  ;;  %v6339_v40 = vld [vmem:[#allocation9 + $0xb4] sm:$0xf0]  ;;  %v5085_v53 = vld [vmem:[#allocation9 + $0x80] sm:$0xf] }
  0x50   :  { %751 = vmatpush.bf16.msrb.mxu2 %v4963_v20  ;;  %v7210_v20 = vperm.slane %v181_v11, 2 }
  0x51   :  { %764 = vmatpush.bf16.msrb.mxu3 %v4967_v24  ;;  %388 = vmatmul.bf16.gmra.mxu0 %v6249_v19 }
  0x52   :  { %726 = vmatpush.bf16.msrb.mxu0 %v4939_v21  ;;  %417 = vmatmul.bf16.gmra.mxu1 %v6249_v19  ;;  %v7212_v21 = vperm.slane %v181_v11, 3  ;;  %v5127_v11 = vld [vmem:[#allocation9 + $0xd8] sm:$0xf0] }
  0x53   :  { %739 = vmatpush.bf16.msrb.mxu1 %v4943_v26  ;;  %446 = vmatmul.bf16.gmra.mxu2 %v6249_v19 }
  0x54   :  { %475 = vmatmul.bf16.gmra.mxu3 %v6249_v19  ;;  %752 = vmatpush.bf16.msrb.mxu2 %v4947_v32 }
  0x55   :  { %765 = vmatpush.bf16.msrb.mxu3 %v4951_v36 }
  0x56   :  { %727 = vmatpush.bf16.msrb.mxu0 %v4923_v33 }
  0x57   :  { %740 = vmatpush.bf16.msrb.mxu1 %v4927_v37 }
  0x58   :  { %753 = vmatpush.bf16.msrb.mxu2 %v4931_v38 }
  0x59   :  { %766 = vmatpush.bf16.msrb.mxu3 %v4935_v50 }
  0x5a   :  { %728 = vmatpush.bf16.msrb.mxu0 %v4907_v42  ;;  %v6344_v42 = vld [vmem:[#allocation9 + $0xe4] sm:$0xf] }
  0x5b   :  { %741 = vmatpush.bf16.msrb.mxu1 %v4911_v46  ;;  %v5141_v46 = vld [vmem:[#allocation9 + $0xe8] sm:$0xf]  ;;  %v5138_v50 = vor.u32 %v6344_v42, %v5135_v45 }
  0x5c   :  { %754 = vmatpush.bf16.msrb.mxu2 %v4915_v54  ;;  %v5142_v51 = vor.u32 %v6347_v47, %v5141_v46  ;;  %v6337_v47 = vld [vmem:[#allocation9 + $0xac] sm:$0xf] }
  0x5d   :  { %767 = vmatpush.bf16.msrb.mxu3 %v4919_v58  ;;  %v5117_v58 = vld [vmem:[#allocation9 + $0xc0] sm:$0xf] }
  0x5e   :  { %729 = vmatpush.bf16.msrb.mxu0 %v4891_v57 }
  0x5f   :  { %742 = vmatpush.bf16.msrb.mxu1 %v4895_v61  ;;  %v5118_v61 = vor.u32 %v6342_v59, %v5117_v58  ;;  %v5087_v59 = vld [vmem:[#allocation9 + $0x90] sm:$0xf0] }
  0x60   :  { %755 = vmatpush.bf16.msrb.mxu2 %v4899_v0  ;;  %v6343_v0 = vld [vmem:[#allocation9 + $0xd4] sm:$0xf0] }
  0x61   :  { %768 = vmatpush.bf16.msrb.mxu3 %v4903_v1  ;;  %393 = vmatmul.bf16.gmra.mxu0 %v6250_v2  ;;  %v5122_v1 = vor.u32 %v6340_v60, %v5119_v62  ;;  %v5093_v60 = vld [vmem:[#allocation9 + $0x88] sm:$0xf] }
  0x62   :  { %422 = vmatmul.bf16.gmra.mxu1 %v6250_v2  ;;  %1042 = vmatpush.bf16.msra.mxu0 %v5134_v44 }
  0x63   :  { %451 = vmatmul.bf16.gmra.mxu2 %v6250_v2  ;;  %1055 = vmatpush.bf16.msra.mxu1 %v5138_v50 }
  0x64   :  { %480 = vmatmul.bf16.gmra.mxu3 %v6250_v2  ;;  %1068 = vmatpush.bf16.msra.mxu2 %v5142_v51  ;;  %v5126_v2 = vor.u32 %v6343_v0, %v5125_v63  ;;  %v6333_v0 = vld [vmem:[#allocation9 + $0x8c] sm:$0xf] }
  0x65   :  { %1081 = vmatpush.bf16.msra.mxu3 %v5146_v56  ;;  %v6332_v56 = vld [vmem:[#allocation9 + $0x84] sm:$0xf] }
  0x66   :  { %1043 = vmatpush.bf16.msra.mxu0 %v5118_v61  ;;  %v6335_v61 = vld [vmem:[#allocation9 + $0x94] sm:$0xf0]  ;;  %v5090_v62 = vor.u32 %v6332_v56, %v5087_v59  ;;  %v5053_v56 = vld [vmem:[#allocation9 + $0x40] sm:$0xf]  ;;  %v6324_v59 = vld [vmem:[#allocation9 + $0x44] sm:$0xf] }
  0x67   :  { %1056 = vmatpush.bf16.msra.mxu1 %v5122_v1  ;;  %v5094_v63 = vor.u32 %v6335_v61, %v5093_v60  ;;  %v5095_v1 = vld [vmem:[#allocation9 + $0x98] sm:$0xf0]  ;;  %v5055_v61 = vld [vmem:[#allocation9 + $0x50] sm:$0xf0] }
  0x68   :  { %1069 = vmatpush.bf16.msra.mxu2 %v5126_v2  ;;  %v5098_v2 = vor.u32 %v6333_v0, %v5095_v1  ;;  %v5058_v0 = vor.u32 %v6324_v59, %v5055_v61  ;;  %v6327_v1 = vld [vmem:[#allocation9 + $0x54] sm:$0xf0]  ;;  %v6318_v59 = vld [vmem:[#allocation9 + $0xc] sm:$0xf0] }
  0x71   :  { %398 = vmatmul.bf16.gmra.mxu0 %v6251_v3 }
  0x72   :  { %427 = vmatmul.bf16.gmra.mxu1 %v6251_v3 }
  0x73   :  { %456 = vmatmul.bf16.gmra.mxu2 %v6251_v3 }
  0x74   :  { %485 = vmatmul.bf16.gmra.mxu3 %v6251_v3  ;;  %v6341_v3 = vld [vmem:[#allocation9 + $0xcc] sm:$0xf] }
  0x81   :  { %730 = vmatmul.bf16.vlgmr.msrb.gmra.mxu0 %v7095_v4 }
  0x82   :  { %743 = vmatmul.bf16.vlgmr.msrb.gmra.mxu1 %v7095_v4 }
  0x83   :  { %756 = vmatmul.bf16.vlgmr.msrb.gmra.mxu2 %v7095_v4 }
  0x84   :  { %769 = vmatmul.bf16.vlgmr.msrb.gmra.mxu3 %v7095_v4 }
  0xbe   :  { %v7184_v5 = vpop.f32.mrf.mxu0 }
  0xbf   :  { %v7186_v6 = vpop.f32.mrf.mxu1 }
  0xc6   :  { %v7188_v7 = vpop.f32.mrf.mxu2  ;;  %v7192_v9 = vpop.f32.mrf.mxu0 }
  0xc7   :  { %v7190_v8 = vpop.f32.mrf.mxu3  ;;  %v7194_v10 = vpop.f32.mrf.mxu1 }
  0xce   :  { %v7198_v13 = vpop.f32.mrf.mxu2  ;;  %v389_v16 = vpop.f32.mrf.mxu0 }
  0xcf   :  { %v7202_v15 = vpop.f32.mrf.mxu3  ;;  %v7205_v17 = vadd.f32 %v389_v16, %v7196_v12  ;;  %v418_v18 = vpop.f32.mrf.mxu1  ;;  %v5130_v16 = vor.u32 %v6341_v3, %v5127_v11  ;;  %v5069_v3 = vld [vmem:[#allocation9 + $0x60] sm:$0xf]  ;;  %v6330_v11 = vld [vmem:[#allocation9 + $0x6c] sm:$0xf0] }
  0xd0   :  { %v7208_v19 = vadd.f32 %v418_v18, %v7200_v14  ;;  %v5101_v18 = vld [vmem:[#allocation9 + $0xa0] sm:$0xf] }
  0xd1   :  { %1082 = vmatpush.bf16.msra.mxu3 %v5130_v16  ;;  %v6328_v16 = vld [vmem:[#allocation9 + $0x64] sm:$0xf] }
  0xd6   :  { %v447_v22 = vpop.f32.mrf.mxu2  ;;  %v7217_v25 = vpop.f32.mrf.mxu0 }
  0xd7   :  { %v7215_v23 = vadd.f32 %v447_v22, %v7210_v20  ;;  %v476_v24 = vpop.f32.mrf.mxu3  ;;  %v7222_v27 = vpop.f32.mrf.mxu1  ;;  %v6338_v22 = vld [vmem:[#allocation9 + $0xac] sm:$0xf0] }
  0xd8   :  { %v7220_v26 = vadd.f32 %v476_v24, %v7212_v21  ;;  %v6336_v24 = vld [vmem:[#allocation9 + $0xa4] sm:$0xf] }
  0xde   :  { %v7224_v28 = vpop.f32.mrf.mxu2  ;;  %v394_v30 = vpop.f32.mrf.mxu0 }
  0xdf   :  { %v7226_v29 = vpop.f32.mrf.mxu3  ;;  %v7229_v31 = vadd.f32 %v394_v30, %v7196_v12  ;;  %v423_v32 = vpop.f32.mrf.mxu1 }
  0xe0   :  { %v7232_v33 = vadd.f32 %v423_v32, %v7200_v14  ;;  %v5102_v32 = vor.u32 %v6338_v22, %v5101_v18  ;;  %v385_v18 = vadd.f32 %v7184_v5, %v7196_v12 }
  0xe2   :  { %1044 = vmatpush.bf16.msra.mxu0 %v5102_v32  ;;  %v5077_v32 = vld [vmem:[#allocation9 + $0x68] sm:$0xf] }
  0xe6   :  { %v452_v34 = vpop.f32.mrf.mxu2  ;;  %v7237_v37 = vpop.f32.mrf.mxu0 }
  0xe7   :  { %v7235_v35 = vadd.f32 %v452_v34, %v7210_v20  ;;  %v481_v36 = vpop.f32.mrf.mxu3  ;;  %v7242_v39 = vpop.f32.mrf.mxu1  ;;  %v5103_v34 = vld [vmem:[#allocation9 + $0xb0] sm:$0xf0] }
  0xe8   :  { %v7240_v38 = vadd.f32 %v481_v36, %v7212_v21  ;;  %v5109_v36 = vld [vmem:[#allocation9 + $0xa8] sm:$0xf]  ;;  %v5106_v45 = vor.u32 %v6336_v24, %v5103_v34  ;;  %v5070_v24 = vor.u32 %v6330_v11, %v5069_v3  ;;  %v6331_v34 = vld [vmem:[#allocation9 + $0x74] sm:$0xf0]  ;;  %v5063_v11 = vld [vmem:[#allocation9 + $0x58] sm:$0xf0] }
  0xe9   :  { %v5110_v46 = vor.u32 %v6339_v40, %v5109_v36  ;;  %v414_v36 = vadd.f32 %v7186_v6, %v7200_v14 }
  0xea   :  { %1057 = vmatpush.bf16.msra.mxu1 %v5106_v45 }
  0xeb   :  { %1070 = vmatpush.bf16.msra.mxu2 %v5110_v46  ;;  %v5078_v46 = vor.u32 %v6331_v34, %v5077_v32  ;;  %v6320_v34 = vld [vmem:[#allocation9 + $0x24] sm:$0xf] }
  0xee   :  { %v7244_v43 = vpop.f32.mrf.mxu2  ;;  %v399_v49 = vpop.f32.mrf.mxu0  ;;  %1058 = vmatpush.bf16.msra.mxu1 %v5090_v62  ;;  %v5061_v62 = vld [vmem:[#allocation9 + $0x48] sm:$0xf] }
  0xef   :  { %v7246_v48 = vpop.f32.mrf.mxu3  ;;  %v7249_v54 = vadd.f32 %v399_v49, %v7196_v12  ;;  %v428_v55 = vpop.f32.mrf.mxu1  ;;  %v5111_v49 = vld [vmem:[#allocation9 + $0xb8] sm:$0xf0]  ;;  %1071 = vmatpush.bf16.msra.mxu2 %v5094_v63  ;;  %v5062_v3 = vor.u32 %v6327_v1, %v5061_v62  ;;  %v5023_v62 = vld [vmem:[#allocation9 + $0x10] sm:$0xf0] }
  0xf0   :  { %v7252_v57 = vadd.f32 %v428_v55, %v7200_v14  ;;  %v5114_v52 = vor.u32 %v6337_v47, %v5111_v49  ;;  %v6334_v55 = vld [vmem:[#allocation9 + $0x8c] sm:$0xf0]  ;;  %v6329_v47 = vld [vmem:[#allocation9 + $0x6c] sm:$0xf]  ;;  %v5079_v49 = vld [vmem:[#allocation9 + $0x78] sm:$0xf0] }
  0xf1   :  { %v5086_v58 = vor.u32 %v6334_v55, %v5085_v53  ;;  %v5082_v5 = vor.u32 %v6329_v47, %v5079_v49  ;;  %v6323_v47 = vld [vmem:[#allocation9 + $0x34] sm:$0xf0]  ;;  %v6321_v49 = vld [vmem:[#allocation9 + $0x2c] sm:$0xf] }
  0xf2   :  { %1083 = vmatpush.bf16.msra.mxu3 %v5114_v52 }
  0xf3   :  { %1045 = vmatpush.bf16.msra.mxu0 %v5086_v58  ;;  %1072 = vmatpush.bf16.msra.mxu2 %v5078_v46  ;;  %v6326_v58 = vld [vmem:[#allocation9 + $0x4c] sm:$0xf0] }
  0xf4   :  { %v5054_v6 = vor.u32 %v6326_v58, %v5053_v56 }
  0xf6   :  { %v457_v30 = vpop.f32.mrf.mxu2  ;;  %v7257_v44 = vpop.f32.mrf.mxu0  ;;  %1084 = vmatpush.bf16.msra.mxu3 %v5098_v2  ;;  %v6325_v2 = vld [vmem:[#allocation9 + $0x4c] sm:$0xf] }
  0xf7   :  { %v7255_v41 = vadd.f32 %v457_v30, %v7210_v20  ;;  %v486_v42 = vpop.f32.mrf.mxu3  ;;  %v7262_v51 = vpop.f32.mrf.mxu1  ;;  %v5071_v30 = vld [vmem:[#allocation9 + $0x70] sm:$0xf0]  ;;  %1046 = vmatpush.bf16.msra.mxu0 %v5070_v24  ;;  %v443_v24 = vadd.f32 %v7188_v7, %v7210_v20  ;;  %1073 = vmatpush.bf16.msra.mxu2 %v5062_v3  ;;  %v5021_v7 = vld [vmem:[#allocation9] sm:$0xf]  ;;  %v6317_v3 = vld [vmem:[#allocation9 + $0xc] sm:$0xf] }
  0xf8   :  { %v7260_v50 = vadd.f32 %v486_v42, %v7212_v21  ;;  %v5074_v45 = vor.u32 %v6328_v16, %v5071_v30  ;;  %v5037_v16 = vld [vmem:[#allocation9 + $0x20] sm:$0xf]  ;;  %v5066_v30 = vor.u32 %v6325_v2, %v5063_v11  ;;  %v5022_v61 = vor.u32 %v6318_v59, %v5021_v7  ;;  %v5031_v11 = vld [vmem:[#allocation9 + $0x18] sm:$0xf0] }
  0xfa   :  { %1059 = vmatpush.bf16.msra.mxu1 %v5074_v45  ;;  %1085 = vmatpush.bf16.msra.mxu3 %v5082_v5 }
  0xfb   :  { %1047 = vmatpush.bf16.msra.mxu0 %v5054_v6 }
  0xfe   :  { %v7266_v22 = vpop.f32.mrf.mxu2  ;;  %v731_v42 = vpop.f32.mrf.mxu0  ;;  %1060 = vmatpush.bf16.msra.mxu1 %v5058_v0  ;;  %1086 = vmatpush.bf16.msra.mxu3 %v5066_v30  ;;  %v6319_v0 = vld [vmem:[#allocation9 + $0x14] sm:$0xf0] }
  0xff   :  { %v7270_v40 = vpop.f32.mrf.mxu3  ;;  %v774_v52 = vadd.f32 %v731_v42, %v385_v18  ;;  %v744_v53 = vpop.f32.mrf.mxu1  ;;  %v6322_v18 = vld [vmem:[#allocation9 + $0x2c] sm:$0xf0]  ;;  %v5045_v42 = vld [vmem:[#allocation9 + $0x28] sm:$0xf] }
 0x100   :  { %v775_v55 = vadd.f32 %v744_v53, %v414_v36  ;;  %v5038_v32 = vor.u32 %v6322_v18, %v5037_v16  ;;  %v5039_v36 = vld [vmem:[#allocation9 + $0x30] sm:$0xf0]  ;;  %v5046_v56 = vor.u32 %v6323_v47, %v5045_v42 }
 0x101   :  { %v5016_v60 = vmul.f32 -1.442695, %v774_v52  ;;  %v5042_v46 = vor.u32 %v6320_v34, %v5039_v36  ;;  %v5047_v52 = vld [vmem:[#allocation9 + $0x38] sm:$0xf0]  ;;  %v5034_v34 = vor.u32 %v6317_v3, %v5031_v11 }
 0x102   :  { %v5017_v63 = vmul.f32 -1.442695, %v775_v55  ;;  %v5050_v58 = vor.u32 %v6321_v49, %v5047_v52  ;;  %1048 = vmatpush.bf16.msra.mxu0 %v5038_v32  ;;  %1074 = vmatpush.bf16.msra.mxu2 %v5046_v56 }
 0x103   :  { %6626 = vpow2.f32 %v5016_v60  ;;  %v6316_v60 = vld [vmem:[#allocation9 + $0x4] sm:$0xf]  ;;  %1061 = vmatpush.bf16.msra.mxu1 %v5042_v46  ;;  %v472_v46 = vadd.f32 %v7190_v8, %v7212_v21 }
 0x104   :  { %6628 = vpow2.f32 %v5017_v63  ;;  %v5029_v63 = vld [vmem:[#allocation9 + $0x8] sm:$0xf]  ;;  %v5026_v2 = vor.u32 %v6316_v60, %v5023_v62  ;;  %1087 = vmatpush.bf16.msra.mxu3 %v5050_v58 }
 0x105   :  { %v5030_v18 = vor.u32 %v6319_v0, %v5029_v63 }
 0x106   :  { %v757_v45 = vpop.f32.mrf.mxu2  ;;  %v733_v55 = vpop.f32.mrf.mxu0  ;;  %1049 = vmatpush.bf16.msra.mxu0 %v5022_v61 }
 0x107   :  { %v776_v53 = vadd.f32 %v757_v45, %v443_v24  ;;  %v770_v5 = vpop.f32.mrf.mxu3  ;;  %v746_v6 = vpop.f32.mrf.mxu1  ;;  %1062 = vmatpush.bf16.msra.mxu1 %v5026_v2  ;;  %1075 = vmatpush.bf16.msra.mxu2 %v5030_v18 }
 0x108   :  { %1088 = vmatpush.bf16.msra.mxu3 %v5034_v34  ;;  %v777_v52 = vadd.f32 %v770_v5, %v472_v46 }
 0x109   :  { %v5018_v1 = vmul.f32 -1.442695, %v776_v53  ;;  %v6627_v16 = vpop.eup %6626 }
 0x10a   :  { %v6629_v24 = vpop.eup %6628  ;;  %v787_v30 = vadd.f32 1.0, %v6627_v16 }
 0x10b   :  { %6630 = vpow2.f32 %v5018_v1  ;;  %v788_v36 = vadd.f32 1.0, %v6629_v24 }
 0x10c   :  { %6632 = vrcp.f32 %v787_v30  ;;  %v801_v59 = vand.u32 2147483648, %v787_v30  ;;  %v799_v61 = vand.u32 2147483647, %v787_v30  ;;  %vm795_vm2 = vweird.f32 %v787_v30 }
 0x10d   :  { %6634 = vrcp.f32 %v788_v36  ;;  %v816_v60 = vand.u32 2147483648, %v788_v36  ;;  %v814_v63 = vand.u32 2147483647, %v788_v36  ;;  %vm810_vm3 = vweird.f32 %v788_v36 }
 0x10e   :  { %v759_v32 = vpop.f32.mrf.mxu2  ;;  %v802_v1 = vor.u32 1.1754944e-38, %v801_v59  ;;  %vm800_vm5 = vcmp.eq.f32.partialorder %v799_v61, 8.507059e+37  ;;  %v6376_v61 = vld [vmem:[#allocation9 + $0xe4] sm:$0xf] }
 0x10f   :  { %v772_v42 = vpop.f32.mrf.mxu3  ;;  %v817_v3 = vor.u32 1.1754944e-38, %v816_v60  ;;  %vm815_vm7 = vcmp.eq.f32.partialorder %v814_v63, 8.507059e+37  ;;  %v5264_v60 = vld [vmem:[#allocation9 + $0xe0] sm:$0xf]  ;;  %v5272_v63 = vld [vmem:[#allocation9 + $0xe8] sm:$0xf] }
 0x111   :  { %v6631_v45 = vpop.eup %6630 }
 0x112   :  { %v789_v47 = vadd.f32 1.0, %v6631_v45  ;;  %v6633_v49 = vpop.eup %6632 }
 0x113   :  { %v6635_v53 = vpop.eup %6634  ;;  %v791_v55 = vmul.f32 %v6633_v49, %v787_v30  ;;  %vm796_vm0 = vweird.f32 %v6633_v49 }
 0x114   :  { %6636 = vrcp.f32 %v789_v47  ;;  %v806_v56 = vmul.f32 %v6635_v53, %v788_v36  ;;  %vm811_vm1 = vweird.f32 %v6635_v53  ;;  %vm797_vm4 = vmor %vm795_vm2, %vm796_vm0  ;;  %v831_v36 = vand.u32 2147483648, %v789_v47 }
 0x115   :  { %v792_v58 = vsub.f32 1.0, %v791_v55  ;;  %6638 = vtanh.f32 %v777_v52  ;;  %vm812_vm6 = vmor %vm810_vm3, %vm811_vm1  ;;  %vm825_vm9 = vweird.f32 %v789_v47 }
 0x116   :  { %v807_v7 = vsub.f32 1.0, %v806_v56  ;;  %v832_v56 = vor.u32 1.1754944e-38, %v831_v36  ;;  %v5258_v36 = vld [vmem:[#allocation9 + $0xd8] sm:$0xf0] }
 0x117   :  { %v793_v6 = vmul.f32 %v6633_v49, %v792_v58 }
 0x118   :  { %v808_v62 = vmul.f32 %v6635_v53, %v807_v7 }
 0x119   :  { %v794_v8 = vadd.f32 %v6633_v49, %v793_v6  ;;  %v6378_v6 = vld [vmem:[#allocation9 + $0xec] sm:$0xf0] }
 0x11a   :  { %v6637_v0 = vpop.eup %6636  ;;  %v809_v2 = vadd.f32 %v6635_v53, %v808_v62  ;;  %v5265_v62 = vor.u32 %v6378_v6, %v5264_v60  ;;  %v5240_v60 = vld [vmem:[#allocation9 + $0xa8] sm:$0xf]  ;;  %v6371_v6 = vld [vmem:[#allocation9 + $0xb4] sm:$0xf0] }
 0x11b   :  { %v821_v5 = vmul.f32 %v6637_v0, %v789_v47  ;;  %v798_v11 = vsel %vm797_vm4, %v6633_v49, %v794_v8  ;;  %v6639_v16 = vpop.eup %6638  ;;  %vm826_vm8 = vweird.f32 %v6637_v0  ;;  %v829_v49 = vand.u32 2147483647, %v789_v47  ;;  %v5266_v47 = vld [vmem:[#allocation9 + $0xf0] sm:$0xf0] }
 0x11c   :  { %v803_v24 = vsel %vm800_vm5, %v802_v1, %v798_v11  ;;  %v813_v34 = vsel %vm812_vm6, %v6635_v53, %v809_v2  ;;  %vm827_vm10 = vmor %vm825_vm9, %vm826_vm8  ;;  %v5269_v8 = vor.u32 %v6376_v61, %v5266_v47  ;;  %v6377_v1 = vld [vmem:[#allocation9 + $0xec] sm:$0xf]  ;;  %v5274_v2 = vld [vmem:[#allocation9 + $0xf8] sm:$0xf0]  ;;  %1363 = vmatpush.bf16.msrb.mxu0 %v5265_v62  ;;  %v5241_v62 = vor.u32 %v6371_v6, %v5240_v60 }
 0x11d   :  { %v822_v18 = vsub.f32 1.0, %v821_v5  ;;  %v818_v32 = vsel %vm815_vm7, %v817_v3, %v813_v34  ;;  %v837_v42 = vmul.f32 %v6639_v16, %v803_v24  ;;  %vm830_vm11 = vcmp.eq.f32.partialorder %v829_v49, 8.507059e+37  ;;  %v5248_v11 = vld [vmem:[#allocation9 + $0xc0] sm:$0xf]  ;;  %v6374_v16 = vld [vmem:[#allocation9 + $0xcc] sm:$0xf0] }
 0x11e   :  { %v836_v46 = vmul.f32 0.0, %v818_v32  ;;  %v5277_v3 = vor.u32 %v6377_v1, %v5274_v2  ;;  %1376 = vmatpush.bf16.msrb.mxu1 %v5269_v8  ;;  %v5249_v24 = vor.u32 %v6374_v16, %v5248_v11  ;;  %v5250_v34 = vld [vmem:[#allocation9 + $0xd0] sm:$0xf0]  ;;  %v5256_v32 = vld [vmem:[#allocation9 + $0xc8] sm:$0xf] }
 0x11f   :  { %v823_v45 = vmul.f32 %v6637_v0, %v822_v18  ;;  %v6372_v18 = vld [vmem:[#allocation9 + $0xc4] sm:$0xf]  ;;  %v6369_v47 = vld [vmem:[#allocation9 + $0xac] sm:$0xf]  ;;  %v5216_v8 = vld [vmem:[#allocation9 + $0x80] sm:$0xf] }
 0x120   :  { %v7276_v52 = vadd.f32 %v837_v42, %v836_v46  ;;  %1402 = vmatpush.bf16.msrb.mxu3 %v5277_v3  ;;  %v6375_v42 = vld [vmem:[#allocation9 + $0xd4] sm:$0xf0]  ;;  %1364 = vmatpush.bf16.msrb.mxu0 %v5249_v24  ;;  %v6364_v1 = vld [vmem:[#allocation9 + $0x84] sm:$0xf]  ;;  %v5218_v3 = vld [vmem:[#allocation9 + $0x90] sm:$0xf0] }
 0x121   :  { %v824_v30 = vadd.f32 %v6637_v0, %v823_v45  ;;  %v5253_v45 = vor.u32 %v6372_v18, %v5250_v34  ;;  %v5257_v46 = vor.u32 %v6375_v42, %v5256_v32  ;;  %v5224_v11 = vld [vmem:[#allocation9 + $0x88] sm:$0xf]  ;;  %v6367_v16 = vld [vmem:[#allocation9 + $0x94] sm:$0xf0]  ;;  %v5221_v18 = vor.u32 %v6364_v1, %v5218_v3  ;;  %v6365_v34 = vld [vmem:[#allocation9 + $0x8c] sm:$0xf] }
 0x122   :  { %6640 = vtanh.f32 %v7276_v52  ;;  %v5225_v24 = vor.u32 %v6367_v16, %v5224_v11  ;;  %v5226_v32 = vld [vmem:[#allocation9 + $0x98] sm:$0xf0]  ;;  %v6361_v6 = vld [vmem:[#allocation9 + $0x6c] sm:$0xf]  ;;  %v6358_v1 = vld [vmem:[#allocation9 + $0x4c] sm:$0xf0] }
 0x123   :  { %v828_v55 = vsel %vm827_vm10, %v6637_v0, %v824_v30  ;;  %v6379_v0 = vld [vmem:[#allocation9 + $0xf4] sm:$0xf0]  ;;  %v6373_v30 = vld [vmem:[#allocation9 + $0xcc] sm:$0xf]  ;;  %1377 = vmatpush.bf16.msrb.mxu1 %v5253_v45  ;;  %v5229_v42 = vor.u32 %v6365_v34, %v5226_v32  ;;  %v5200_v45 = vld [vmem:[#allocation9 + $0x60] sm:$0xf] }
 0x124   :  { %v833_v53 = vsel %vm830_vm11, %v832_v56, %v828_v55  ;;  %v5273_v5 = vor.u32 %v6379_v0, %v5272_v63  ;;  %v5261_v49 = vor.u32 %v6373_v30, %v5258_v36  ;;  %v5232_v55 = vld [vmem:[#allocation9 + $0xa0] sm:$0xf]  ;;  %v6370_v56 = vld [vmem:[#allocation9 + $0xac] sm:$0xf0]  ;;  %v5242_v63 = vld [vmem:[#allocation9 + $0xb8] sm:$0xf0] }
 0x125   :  { %v5245_v0 = vor.u32 %v6369_v47, %v5242_v63  ;;  %v6360_v30 = vld [vmem:[#allocation9 + $0x64] sm:$0xf]  ;;  %v5186_v3 = vld [vmem:[#allocation9 + $0x50] sm:$0xf0]  ;;  %v5192_v11 = vld [vmem:[#allocation9 + $0x48] sm:$0xf] }
 0x126   :  { %1389 = vmatpush.bf16.msrb.mxu2 %v5273_v5  ;;  %1403 = vmatpush.bf16.msrb.mxu3 %v5261_v49  ;;  %v6366_v5 = vld [vmem:[#allocation9 + $0x8c] sm:$0xf0]  ;;  %v5202_v49 = vld [vmem:[#allocation9 + $0x70] sm:$0xf0]  ;;  %v6357_v32 = vld [vmem:[#allocation9 + $0x4c] sm:$0xf] }
 0x127   :  { %v5217_v2 = vor.u32 %v6366_v5, %v5216_v8  ;;  %v5184_v5 = vld [vmem:[#allocation9 + $0x40] sm:$0xf] }
 0x128   :  { %v6641_v58 = vpop.eup %6640 }
 0x129   :  { %v7279_v7 = vmul.f32 %v6641_v58, %v833_v53  ;;  %v6368_v58 = vld [vmem:[#allocation9 + $0xa4] sm:$0xf]  ;;  %v5233_v53 = vor.u32 %v6370_v56, %v5232_v55  ;;  %v5208_v55 = vld [vmem:[#allocation9 + $0x68] sm:$0xf]  ;;  %v6363_v56 = vld [vmem:[#allocation9 + $0x74] sm:$0xf0] }
 0x12a   :  { %1390 = vmatpush.bf16.msrb.mxu2 %v5257_v46  ;;  %1404 = vmatpush.bf16.msrb.mxu3 %v5245_v0  ;;  %v6362_v46 = vld [vmem:[#allocation9 + $0x6c] sm:$0xf0]  ;;  %v5209_v60 = vor.u32 %v6363_v56, %v5208_v55  ;;  %v5170_v55 = vld [vmem:[#allocation9 + $0x30] sm:$0xf0]  ;;  %v5176_v56 = vld [vmem:[#allocation9 + $0x28] sm:$0xf] }
 0x12b   :  { %v849_v59 = vpack.c.bf16 %v7279_v7, %v7279_v7  ;;  %1365 = vmatpush.bf16.msrb.mxu0 %v5233_v53  ;;  %v5201_v36 = vor.u32 %v6362_v46, %v5200_v45  ;;  %v416_v53 = vadd.f32 %v7194_v10, %v7200_v14  ;;  %v6359_v10 = vld [vmem:[#allocation9 + $0x54] sm:$0xf0]  ;;  %v5168_v45 = vld [vmem:[#allocation9 + $0x20] sm:$0xf]  ;;  %v6354_v46 = vld [vmem:[#allocation9 + $0x2c] sm:$0xf0] }
 0x12c   :  { %v5193_v34 = vor.u32 %v6359_v10, %v5192_v11  ;;  %v5154_v11 = vld [vmem:[#allocation9 + $0x10] sm:$0xf0]  ;;  %v6351_v10 = vld [vmem:[#allocation9 + $0x14] sm:$0xf0] }
 0x12d   :  { %1050 = vmatmul.bf16.vlgmr.msra.gmra.mxu0 %v849_v59  ;;  %1063 = vmatmul.bf16.vlgmr.msra.gmra.mxu1 %v849_v59 }
 0x12e   :  { %1076 = vmatmul.bf16.vlgmr.msra.gmra.mxu2 %v849_v59  ;;  %1089 = vmatmul.bf16.vlgmr.msra.gmra.mxu3 %v849_v59  ;;  %v5234_v59 = vld [vmem:[#allocation9 + $0xb0] sm:$0xf0] }
 0x12f   :  { %v5237_v61 = vor.u32 %v6368_v58, %v5234_v59  ;;  %1391 = vmatpush.bf16.msrb.mxu2 %v5241_v62  ;;  %1366 = vmatpush.bf16.msrb.mxu0 %v5217_v2  ;;  %v387_v58 = vadd.f32 %v7192_v9, %v7196_v12  ;;  %v5205_v59 = vor.u32 %v6360_v30, %v5202_v49  ;;  %v6356_v2 = vld [vmem:[#allocation9 + $0x44] sm:$0xf] }
 0x130   :  { %1405 = vmatpush.bf16.msrb.mxu3 %v5229_v42  ;;  %v5185_v9 = vor.u32 %v6358_v1, %v5184_v5  ;;  %v5194_v42 = vld [vmem:[#allocation9 + $0x58] sm:$0xf0]  ;;  %v6352_v49 = vld [vmem:[#allocation9 + $0x24] sm:$0xf] }
 0x131   :  { %1378 = vmatpush.bf16.msrb.mxu1 %v5237_v61  ;;  %v5210_v61 = vld [vmem:[#allocation9 + $0x78] sm:$0xf0]  ;;  %v5197_v30 = vor.u32 %v6357_v32, %v5194_v42  ;;  %v6348_v5 = vld [vmem:[#allocation9 + $0x4] sm:$0xf] }
 0x132   :  { %v5213_v63 = vor.u32 %v6361_v6, %v5210_v61  ;;  %v5178_v6 = vld [vmem:[#allocation9 + $0x38] sm:$0xf0] }
 0x133   :  { %1392 = vmatpush.bf16.msrb.mxu2 %v5225_v24  ;;  %1367 = vmatpush.bf16.msrb.mxu0 %v5201_v36  ;;  %v5189_v24 = vor.u32 %v6356_v2, %v5186_v3  ;;  %v5169_v36 = vor.u32 %v6354_v46, %v5168_v45 }
 0x134   :  { %1406 = vmatpush.bf16.msrb.mxu3 %v5213_v63 }
 0x135   :  { %1379 = vmatpush.bf16.msrb.mxu1 %v5221_v18 }
 0x137   :  { %1393 = vmatpush.bf16.msrb.mxu2 %v5209_v60  ;;  %1368 = vmatpush.bf16.msrb.mxu0 %v5185_v9  ;;  %v6353_v60 = vld [vmem:[#allocation9 + $0x2c] sm:$0xf] }
 0x138   :  { %1407 = vmatpush.bf16.msrb.mxu3 %v5197_v30  ;;  %v5181_v63 = vor.u32 %v6353_v60, %v5178_v6 }
 0x139   :  { %1380 = vmatpush.bf16.msrb.mxu1 %v5205_v59  ;;  %v6355_v59 = vld [vmem:[#allocation9 + $0x34] sm:$0xf0] }
 0x13b   :  { %1394 = vmatpush.bf16.msrb.mxu2 %v5193_v34  ;;  %1369 = vmatpush.bf16.msrb.mxu0 %v5169_v36  ;;  %v5162_v34 = vld [vmem:[#allocation9 + $0x18] sm:$0xf0] }
 0x13c   :  { %1408 = vmatpush.bf16.msrb.mxu3 %v5181_v63 }
 0x13d   :  { %1381 = vmatpush.bf16.msrb.mxu1 %v5189_v24  ;;  %v6349_v24 = vld [vmem:[#allocation9 + $0xc] sm:$0xf] }
 0x13e   :  { %v5165_v45 = vor.u32 %v6349_v24, %v5162_v34 }
 0x140   :  { %1409 = vmatpush.bf16.msrb.mxu3 %v5165_v45 }
 0x1aa   :  { %v1051_v62 = vpop.f32.mrf.mxu0  ;;  %v1064_v47 = vpop.f32.mrf.mxu1 }
 0x1ab   :  { %v1094_v0 = vadd.f32 %v1051_v62, %v387_v58  ;;  %v1095_v8 = vadd.f32 %v1064_v47, %v416_v53  ;;  %v445_v58 = vadd.f32 %v7198_v13, %v7210_v20  ;;  %v5173_v53 = vor.u32 %v6352_v49, %v5170_v55  ;;  %v5160_v13 = vld [vmem:[#allocation9 + $0x8] sm:$0xf] }
 0x1ac   :  { %v5177_v47 = vor.u32 %v6355_v59, %v5176_v56 }
 0x1ad   :  { %v5147_v16 = vmul.f32 -1.442695, %v1094_v0  ;;  %v5148_v18 = vmul.f32 -1.442695, %v1095_v8  ;;  %v5152_v0 = vld [vmem:[#allocation9] sm:$0xf]  ;;  %1382 = vmatpush.bf16.msrb.mxu1 %v5173_v53 }
 0x1ae   :  { %v6350_v8 = vld [vmem:[#allocation9 + $0xc] sm:$0xf0]  ;;  %1395 = vmatpush.bf16.msrb.mxu2 %v5177_v47 }
 0x1af   :  { %6642 = vpow2.f32 %v5147_v16  ;;  %v5153_v3 = vor.u32 %v6350_v8, %v5152_v0  ;;  %v5157_v16 = vor.u32 %v6348_v5, %v5154_v11 }
 0x1b0   :  { %6644 = vpow2.f32 %v5148_v18  ;;  %v5161_v18 = vor.u32 %v6351_v10, %v5160_v13 }
 0x1b1   :  { %v1077_v61 = vpop.f32.mrf.mxu2  ;;  %v1090_v62 = vpop.f32.mrf.mxu3  ;;  %1370 = vmatpush.bf16.msrb.mxu0 %v5153_v3  ;;  %1383 = vmatpush.bf16.msrb.mxu1 %v5157_v16 }
 0x1b2   :  { %v1096_v1 = vadd.f32 %v1077_v61, %v445_v58  ;;  %v1053_v2 = vpop.f32.mrf.mxu0  ;;  %v1066_v9 = vpop.f32.mrf.mxu1  ;;  %1396 = vmatpush.bf16.msrb.mxu2 %v5161_v18  ;;  %v474_v58 = vadd.f32 %v7202_v15, %v7212_v21 }
 0x1b4   :  { %v5149_v32 = vmul.f32 -1.442695, %v1096_v1  ;;  %v1097_v60 = vadd.f32 %v1090_v62, %v474_v58 }
 0x1b5   :  { %v6643_v42 = vpop.eup %6642 }
 0x1b6   :  { %v6645_v46 = vpop.eup %6644  ;;  %v1107_v30 = vadd.f32 1.0, %v6643_v42  ;;  %6646 = vpow2.f32 %v5149_v32 }
 0x1b7   :  { %v1108_v49 = vadd.f32 1.0, %v6645_v46 }
 0x1b8   :  { %6648 = vrcp.f32 %v1107_v30  ;;  %v1121_v8 = vand.u32 2147483648, %v1107_v30  ;;  %v1119_v2 = vand.u32 2147483647, %v1107_v30  ;;  %vm1115_vm14 = vweird.f32 %v1107_v30 }
 0x1b9   :  { %6650 = vrcp.f32 %v1108_v49  ;;  %v1079_v36 = vpop.f32.mrf.mxu2  ;;  %v1092_v55 = vpop.f32.mrf.mxu3  ;;  %v1136_v5 = vand.u32 2147483648, %v1108_v49  ;;  %v1134_v3 = vand.u32 2147483647, %v1108_v49  ;;  %vm1130_vm15 = vweird.f32 %v1108_v49 }
 0x1ba   :  { %v1122_v13 = vor.u32 1.1754944e-38, %v1121_v8  ;;  %vm1120_vm2 = vcmp.eq.f32.partialorder %v1119_v2, 8.507059e+37  ;;  %v6408_v8 = vld [vmem:[#allocation9 + $0xe4] sm:$0xf]  ;;  %v6411_v2 = vld [vmem:[#allocation9 + $0xf4] sm:$0xf0] }
 0x1bb   :  { %v1137_v16 = vor.u32 1.1754944e-38, %v1136_v5  ;;  %vm1135_vm3 = vcmp.eq.f32.partialorder %v1134_v3, 8.507059e+37 }
 0x1bc   :  { %v6647_v56 = vpop.eup %6646 }
 0x1bd   :  { %v1109_v53 = vadd.f32 1.0, %v6647_v56 }
 0x1be   :  { %v6649_v59 = vpop.eup %6648 }
 0x1bf   :  { %v6651_v6 = vpop.eup %6650  ;;  %v1111_v61 = vmul.f32 %v6649_v59, %v1107_v30  ;;  %6652 = vrcp.f32 %v1109_v53  ;;  %vm1116_vm12 = vweird.f32 %v6649_v59  ;;  %v1151_v56 = vand.u32 2147483648, %v1109_v53 }
 0x1c0   :  { %v1126_v47 = vmul.f32 %v6651_v6, %v1108_v49  ;;  %6654 = vtanh.f32 %v1097_v60  ;;  %vm1131_vm13 = vweird.f32 %v6651_v6  ;;  %vm1117_vm0 = vmor %vm1115_vm14, %vm1116_vm12  ;;  %vm1145_vm5 = vweird.f32 %v1109_v53 }
 0x1c1   :  { %v1112_v63 = vsub.f32 1.0, %v1111_v61  ;;  %vm1132_vm1 = vmor %vm1130_vm15, %vm1131_vm13  ;;  %v1149_v58 = vand.u32 2147483647, %v1109_v53  ;;  %v1152_v60 = vor.u32 1.1754944e-38, %v1151_v56  ;;  %v6402_v56 = vld [vmem:[#allocation9 + $0xac] sm:$0xf0] }
 0x1c2   :  { %v1127_v0 = vsub.f32 1.0, %v1126_v47 }
 0x1c3   :  { %v1113_v1 = vmul.f32 %v6649_v59, %v1112_v63  ;;  %vm1150_vm7 = vcmp.eq.f32.partialorder %v1149_v58, 8.507059e+37  ;;  %v5395_v63 = vld [vmem:[#allocation9 + $0xe0] sm:$0xf]  ;;  %v6400_v58 = vld [vmem:[#allocation9 + $0xa4] sm:$0xf] }
 0x1c4   :  { %v1128_v9 = vmul.f32 %v6651_v6, %v1127_v0  ;;  %v6410_v0 = vld [vmem:[#allocation9 + $0xec] sm:$0xf0] }
 0x1c5   :  { %v6653_v11 = vpop.eup %6652  ;;  %v1114_v15 = vadd.f32 %v6649_v59, %v1113_v1  ;;  %v5396_v5 = vor.u32 %v6410_v0, %v5395_v63  ;;  %v5403_v1 = vld [vmem:[#allocation9 + $0xe8] sm:$0xf]  ;;  %v6401_v0 = vld [vmem:[#allocation9 + $0xac] sm:$0xf] }
 0x1c6   :  { %v1141_v62 = vmul.f32 %v6653_v11, %v1109_v53  ;;  %v1129_v10 = vadd.f32 %v6651_v6, %v1128_v9  ;;  %v6655_v24 = vpop.eup %6654  ;;  %vm1146_vm4 = vweird.f32 %v6653_v11  ;;  %v5397_v53 = vld [vmem:[#allocation9 + $0xf0] sm:$0xf0]  ;;  %v5404_v3 = vor.u32 %v6411_v2, %v5403_v1  ;;  %v6398_v1 = vld [vmem:[#allocation9 + $0x8c] sm:$0xf0]  ;;  %v6396_v2 = vld [vmem:[#allocation9 + $0x84] sm:$0xf] }
 0x1c7   :  { %v1118_v18 = vsel %vm1117_vm0, %v6649_v59, %v1114_v15  ;;  %vm1147_vm6 = vmor %vm1145_vm5, %vm1146_vm4  ;;  %v5400_v9 = vor.u32 %v6408_v8, %v5397_v53  ;;  %v5405_v15 = vld [vmem:[#allocation9 + $0xf8] sm:$0xf0]  ;;  %1684 = vmatpush.bf16.msra.mxu0 %v5396_v5  ;;  %v5347_v53 = vld [vmem:[#allocation9 + $0x80] sm:$0xf] }
 0x1c8   :  { %v1142_v34 = vsub.f32 1.0, %v1141_v62  ;;  %v1123_v32 = vsel %vm1120_vm2, %v1122_v13, %v1118_v18  ;;  %v1133_v42 = vsel %vm1132_vm1, %v6651_v6, %v1129_v10  ;;  %1710 = vmatpush.bf16.msra.mxu2 %v5404_v3  ;;  %v5379_v13 = vld [vmem:[#allocation9 + $0xc0] sm:$0xf]  ;;  %v6406_v10 = vld [vmem:[#allocation9 + $0xcc] sm:$0xf0] }
 0x1c9   :  { %v1138_v45 = vsel %vm1135_vm3, %v1137_v16, %v1133_v42  ;;  %v1157_v46 = vmul.f32 %v6655_v24, %v1123_v32  ;;  %1697 = vmatpush.bf16.msra.mxu1 %v5400_v9  ;;  %v6404_v16 = vld [vmem:[#allocation9 + $0xc4] sm:$0xf]  ;;  %v5380_v18 = vor.u32 %v6406_v10, %v5379_v13  ;;  %v5381_v24 = vld [vmem:[#allocation9 + $0xd0] sm:$0xf0]  ;;  %v6407_v32 = vld [vmem:[#allocation9 + $0xd4] sm:$0xf0]  ;;  %v5348_v9 = vor.u32 %v6398_v1, %v5347_v53 }
 0x1ca   :  { %v1143_v36 = vmul.f32 %v6653_v11, %v1142_v34  ;;  %v1156_v55 = vmul.f32 %v1138_v45, %v7276_v52  ;;  %v5387_v34 = vld [vmem:[#allocation9 + $0xc8] sm:$0xf]  ;;  %v5384_v42 = vor.u32 %v6404_v16, %v5381_v24  ;;  %v5373_v8 = vld [vmem:[#allocation9 + $0xb8] sm:$0xf0]  ;;  %v5349_v3 = vld [vmem:[#allocation9 + $0x90] sm:$0xf0] }
 0x1cb   :  { %v5388_v45 = vor.u32 %v6407_v32, %v5387_v34  ;;  %1685 = vmatpush.bf16.msra.mxu0 %v5380_v18  ;;  %v5376_v5 = vor.u32 %v6401_v0, %v5373_v8  ;;  %v6397_v10 = vld [vmem:[#allocation9 + $0x8c] sm:$0xf]  ;;  %v5357_v16 = vld [vmem:[#allocation9 + $0x98] sm:$0xf0]  ;;  %v5331_v24 = vld [vmem:[#allocation9 + $0x60] sm:$0xf] }
 0x1cc   :  { %v7292_v30 = vadd.f32 %v1157_v46, %v1156_v55  ;;  %v1144_v49 = vadd.f32 %v6653_v11, %v1143_v36  ;;  %v6405_v46 = vld [vmem:[#allocation9 + $0xcc] sm:$0xf]  ;;  %v5389_v36 = vld [vmem:[#allocation9 + $0xd8] sm:$0xf0]  ;;  %v5360_v18 = vor.u32 %v6397_v10, %v5357_v16  ;;  %v6394_v34 = vld [vmem:[#allocation9 + $0x6c] sm:$0xf0] }
 0x1cd   :  { %v5392_v55 = vor.u32 %v6405_v46, %v5389_v36  ;;  %1698 = vmatpush.bf16.msra.mxu1 %v5384_v42  ;;  %1711 = vmatpush.bf16.msra.mxu2 %v5388_v45  ;;  %v6392_v32 = vld [vmem:[#allocation9 + $0x64] sm:$0xf]  ;;  %v5332_v42 = vor.u32 %v6394_v34, %v5331_v24  ;;  %v5333_v45 = vld [vmem:[#allocation9 + $0x70] sm:$0xf0]  ;;  %v5339_v46 = vld [vmem:[#allocation9 + $0x68] sm:$0xf] }
 0x1ce   :  { %6656 = vtanh.f32 %v7292_v30  ;;  %v1148_v59 = vsel %vm1147_vm6, %v6653_v11, %v1144_v49  ;;  %v6409_v11 = vld [vmem:[#allocation9 + $0xec] sm:$0xf]  ;;  %v5363_v49 = vld [vmem:[#allocation9 + $0xa0] sm:$0xf]  ;;  %v6395_v36 = vld [vmem:[#allocation9 + $0x74] sm:$0xf0] }
 0x1cf   :  { %v1153_v61 = vsel %vm1150_vm7, %v1152_v60, %v1148_v59  ;;  %v5408_v62 = vor.u32 %v6409_v11, %v5405_v15  ;;  %v5364_v59 = vor.u32 %v6402_v56, %v5363_v49  ;;  %v5365_v60 = vld [vmem:[#allocation9 + $0xb0] sm:$0xf0]  ;;  %v5355_v11 = vld [vmem:[#allocation9 + $0x88] sm:$0xf]  ;;  %v6399_v15 = vld [vmem:[#allocation9 + $0x94] sm:$0xf0]  ;;  %v5340_v49 = vor.u32 %v6395_v36, %v5339_v46 }
 0x1d0   :  { %v5356_v13 = vor.u32 %v6399_v15, %v5355_v11  ;;  %v6393_v56 = vld [vmem:[#allocation9 + $0x6c] sm:$0xf]  ;;  %v6390_v0 = vld [vmem:[#allocation9 + $0x4c] sm:$0xf0]  ;;  %v6388_v8 = vld [vmem:[#allocation9 + $0x44] sm:$0xf] }
 0x1d1   :  { %1723 = vmatpush.bf16.msra.mxu3 %v5408_v62  ;;  %1686 = vmatpush.bf16.msra.mxu0 %v5364_v59  ;;  %v5352_v62 = vor.u32 %v6396_v2, %v5349_v3  ;;  %v5317_v53 = vld [vmem:[#allocation9 + $0x50] sm:$0xf0]  ;;  %v5323_v1 = vld [vmem:[#allocation9 + $0x48] sm:$0xf]  ;;  %v6391_v2 = vld [vmem:[#allocation9 + $0x54] sm:$0xf0] }
 0x1d2   :  { %v5320_v11 = vor.u32 %v6388_v8, %v5317_v53  ;;  %v5324_v15 = vor.u32 %v6391_v2, %v5323_v1  ;;  %v6386_v10 = vld [vmem:[#allocation9 + $0x2c] sm:$0xf0]  ;;  %v5301_v24 = vld [vmem:[#allocation9 + $0x30] sm:$0xf0]  ;;  %v5307_v34 = vld [vmem:[#allocation9 + $0x28] sm:$0xf] }
 0x1d3   :  { %v5309_v46 = vld [vmem:[#allocation9 + $0x38] sm:$0xf0]  ;;  %v5291_v8 = vld [vmem:[#allocation9 + $0x8] sm:$0xf]  ;;  %v6381_v2 = vld [vmem:[#allocation9 + $0xc] sm:$0xf] }
 0x1d4   :  { %v6657_v6 = vpop.eup %6656 }
 0x1d5   :  { %v7295_v47 = vmul.f32 %v6657_v6, %v1153_v61  ;;  %1724 = vmatpush.bf16.msra.mxu3 %v5392_v55  ;;  %v5371_v6 = vld [vmem:[#allocation9 + $0xa8] sm:$0xf]  ;;  %v6403_v61 = vld [vmem:[#allocation9 + $0xb4] sm:$0xf0]  ;;  %1687 = vmatpush.bf16.msra.mxu0 %v5348_v9  ;;  %v5336_v55 = vor.u32 %v6392_v32, %v5333_v45  ;;  %v6385_v45 = vld [vmem:[#allocation9 + $0x2c] sm:$0xf] }
 0x1d6   :  { %v5372_v63 = vor.u32 %v6403_v61, %v5371_v6 }
 0x1d7   :  { %v1170_v52 = vpack.c.bf16 %v7295_v47, %v7295_v47 }
 0x1d8   :  { %1712 = vmatpush.bf16.msra.mxu2 %v5372_v63  ;;  %v5315_v63 = vld [vmem:[#allocation9 + $0x40] sm:$0xf] }
 0x1d9   :  { %1371 = vmatmul.bf16.vlgmr.msrb.gmra.mxu0 %v1170_v52  ;;  %1384 = vmatmul.bf16.vlgmr.msrb.gmra.mxu1 %v1170_v52 }
 0x1da   :  { %1397 = vmatmul.bf16.vlgmr.msrb.gmra.mxu2 %v1170_v52  ;;  %1410 = vmatmul.bf16.vlgmr.msrb.gmra.mxu3 %v1170_v52  ;;  %v5368_v52 = vor.u32 %v6400_v58, %v5365_v60  ;;  %v5341_v58 = vld [vmem:[#allocation9 + $0x78] sm:$0xf0] }
 0x1db   :  { %1725 = vmatpush.bf16.msra.mxu3 %v5376_v5  ;;  %1688 = vmatpush.bf16.msra.mxu0 %v5332_v42  ;;  %v5344_v6 = vor.u32 %v6393_v56, %v5341_v58  ;;  %v5316_v5 = vor.u32 %v6390_v0, %v5315_v63  ;;  %v6387_v42 = vld [vmem:[#allocation9 + $0x34] sm:$0xf0]  ;;  %v5312_v56 = vor.u32 %v6385_v45, %v5309_v46  ;;  %v5283_v58 = vld [vmem:[#allocation9] sm:$0xf]  ;;  %v5285_v0 = vld [vmem:[#allocation9 + $0x10] sm:$0xf0] }
 0x1dc   :  { %1699 = vmatpush.bf16.msra.mxu1 %v5368_v52  ;;  %1713 = vmatpush.bf16.msra.mxu2 %v5356_v13  ;;  %v5325_v13 = vld [vmem:[#allocation9 + $0x58] sm:$0xf0] }
 0x1df   :  { %1726 = vmatpush.bf16.msra.mxu3 %v5360_v18  ;;  %1689 = vmatpush.bf16.msra.mxu0 %v5316_v5  ;;  %v6384_v18 = vld [vmem:[#allocation9 + $0x24] sm:$0xf]  ;;  %v6383_v5 = vld [vmem:[#allocation9 + $0x14] sm:$0xf0] }
 0x1e0   :  { %1700 = vmatpush.bf16.msra.mxu1 %v5352_v62  ;;  %1714 = vmatpush.bf16.msra.mxu2 %v5340_v49  ;;  %v6389_v62 = vld [vmem:[#allocation9 + $0x4c] sm:$0xf]  ;;  %v5304_v32 = vor.u32 %v6384_v18, %v5301_v24  ;;  %v5308_v49 = vor.u32 %v6387_v42, %v5307_v34  ;;  %v5292_v1 = vor.u32 %v6383_v5, %v5291_v8 }
 0x1e3   :  { %1727 = vmatpush.bf16.msra.mxu3 %v5344_v6 }
 0x1e4   :  { %1701 = vmatpush.bf16.msra.mxu1 %v5336_v55  ;;  %1715 = vmatpush.bf16.msra.mxu2 %v5324_v15 }
 0x1e8   :  { %1702 = vmatpush.bf16.msra.mxu1 %v5320_v11  ;;  %1716 = vmatpush.bf16.msra.mxu2 %v5308_v49 }
 0x1ec   :  { %1703 = vmatpush.bf16.msra.mxu1 %v5304_v32  ;;  %1717 = vmatpush.bf16.msra.mxu2 %v5292_v1 }
 0x256   :  { %v1372_v59 = vpop.f32.mrf.mxu0  ;;  %v1385_v60 = vpop.f32.mrf.mxu1 }
 0x257   :  { %v1415_v61 = vadd.f32 %v1372_v59, %v7205_v17  ;;  %v1416_v52 = vadd.f32 %v1385_v60, %v7208_v19  ;;  %v5299_v17 = vld [vmem:[#allocation9 + $0x20] sm:$0xf]  ;;  %v5328_v19 = vor.u32 %v6389_v62, %v5325_v13  ;;  %v6382_v59 = vld [vmem:[#allocation9 + $0xc] sm:$0xf0]  ;;  %v6380_v60 = vld [vmem:[#allocation9 + $0x4] sm:$0xf] }
 0x258   :  { %v5300_v16 = vor.u32 %v6386_v10, %v5299_v17  ;;  %v5284_v63 = vor.u32 %v6382_v59, %v5283_v58  ;;  %v5288_v53 = vor.u32 %v6380_v60, %v5285_v0 }
 0x259   :  { %v5278_v9 = vmul.f32 -1.442695, %v1415_v61  ;;  %v5279_v3 = vmul.f32 -1.442695, %v1416_v52  ;;  %1728 = vmatpush.bf16.msra.mxu3 %v5328_v19 }
 0x25a   :  { %1690 = vmatpush.bf16.msra.mxu0 %v5300_v16  ;;  %1704 = vmatpush.bf16.msra.mxu1 %v5288_v53 }
 0x25b   :  { %6658 = vpow2.f32 %v5278_v9  ;;  %v5293_v9 = vld [vmem:[#allocation9 + $0x18] sm:$0xf0] }
 0x25c   :  { %6660 = vpow2.f32 %v5279_v3  ;;  %v5296_v15 = vor.u32 %v6381_v2, %v5293_v9 }
 0x25d   :  { %v1398_v36 = vpop.f32.mrf.mxu2  ;;  %v1411_v55 = vpop.f32.mrf.mxu3  ;;  %1729 = vmatpush.bf16.msra.mxu3 %v5312_v56 }
 0x25e   :  { %v1417_v6 = vadd.f32 %v1398_v36, %v7215_v23  ;;  %v1374_v61 = vpop.f32.mrf.mxu0  ;;  %v1387_v52 = vpop.f32.mrf.mxu1  ;;  %1691 = vmatpush.bf16.msra.mxu0 %v5284_v63  ;;  %v1418_v24 = vadd.f32 %v1411_v55, %v7220_v26 }
 0x260   :  { %v5280_v3 = vmul.f32 -1.442695, %v1417_v6 }
 0x261   :  { %v6659_v11 = vpop.eup %6658  ;;  %1730 = vmatpush.bf16.msra.mxu3 %v5296_v15 }
 0x262   :  { %v6661_v62 = vpop.eup %6660  ;;  %v1428_v13 = vadd.f32 1.0, %v6659_v11  ;;  %6662 = vpow2.f32 %v5280_v3 }
 0x263   :  { %v1429_v23 = vadd.f32 1.0, %v6661_v62 }
 0x264   :  { %6664 = vrcp.f32 %v1428_v13  ;;  %v1442_v36 = vand.u32 2147483648, %v1428_v13  ;;  %v1440_v58 = vand.u32 2147483647, %v1428_v13  ;;  %vm1436_vm10 = vweird.f32 %v1428_v13 }
 0x265   :  { %6666 = vrcp.f32 %v1429_v23  ;;  %v1400_v17 = vpop.f32.mrf.mxu2  ;;  %v1413_v10 = vpop.f32.mrf.mxu3  ;;  %v1457_v49 = vand.u32 2147483648, %v1429_v23  ;;  %v1455_v60 = vand.u32 2147483647, %v1429_v23  ;;  %vm1451_vm11 = vweird.f32 %v1429_v23 }
 0x266   :  { %v1443_v55 = vor.u32 1.1754944e-38, %v1442_v36  ;;  %vm1441_vm14 = vcmp.eq.f32.partialorder %v1440_v58, 8.507059e+37  ;;  %v6443_v36 = vld [vmem:[#allocation9 + $0xf4] sm:$0xf0]  ;;  %v6441_v58 = vld [vmem:[#allocation9 + $0xec] sm:$0xf] }
 0x267   :  { %v1458_v63 = vor.u32 1.1754944e-38, %v1457_v49  ;;  %vm1456_vm15 = vcmp.eq.f32.partialorder %v1455_v60, 8.507059e+37 }
 0x268   :  { %v6663_v19 = vpop.eup %6662 }
 0x269   :  { %v1430_v16 = vadd.f32 1.0, %v6663_v19 }
 0x26a   :  { %v6665_v18 = vpop.eup %6664 }
 0x26b   :  { %v6667_v34 = vpop.eup %6666  ;;  %v1432_v32 = vmul.f32 %v6665_v18, %v1428_v13  ;;  %6668 = vrcp.f32 %v1430_v16  ;;  %vm1437_vm8 = vweird.f32 %v6665_v18  ;;  %v1472_v13 = vand.u32 2147483648, %v1430_v16 }
 0x26c   :  { %v1447_v42 = vmul.f32 %v6667_v34, %v1429_v23  ;;  %6670 = vtanh.f32 %v1418_v24  ;;  %vm1452_vm9 = vweird.f32 %v6667_v34  ;;  %vm1438_vm12 = vmor %vm1436_vm10, %vm1437_vm8  ;;  %vm1466_vm1 = vweird.f32 %v1430_v16 }
 0x26d   :  { %v1433_v45 = vsub.f32 1.0, %v1432_v32  ;;  %vm1453_vm13 = vmor %vm1451_vm11, %vm1452_vm9  ;;  %v1470_v23 = vand.u32 2147483647, %v1430_v16  ;;  %v1473_v10 = vor.u32 1.1754944e-38, %v1472_v13  ;;  %v6442_v32 = vld [vmem:[#allocation9 + $0xec] sm:$0xf0] }
 0x26e   :  { %v1448_v46 = vsub.f32 1.0, %v1447_v42  ;;  %v6440_v42 = vld [vmem:[#allocation9 + $0xe4] sm:$0xf]  ;;  %v5496_v13 = vld [vmem:[#allocation9 + $0xb0] sm:$0xf0] }
 0x26f   :  { %v1434_v56 = vmul.f32 %v6665_v18, %v1433_v45  ;;  %vm1471_vm3 = vcmp.eq.f32.partialorder %v1470_v23, 8.507059e+37  ;;  %v5502_v23 = vld [vmem:[#allocation9 + $0xa8] sm:$0xf] }
 0x270   :  { %v1449_v59 = vmul.f32 %v6667_v34, %v1448_v46  ;;  %v5534_v46 = vld [vmem:[#allocation9 + $0xe8] sm:$0xf] }
 0x271   :  { %v6669_v6 = vpop.eup %6668  ;;  %v1435_v61 = vadd.f32 %v6665_v18, %v1434_v56  ;;  %v5535_v56 = vor.u32 %v6443_v36, %v5534_v46  ;;  %v5480_v46 = vld [vmem:[#allocation9 + $0x90] sm:$0xf0]  ;;  %v5486_v36 = vld [vmem:[#allocation9 + $0x88] sm:$0xf] }
 0x272   :  { %v1462_v26 = vmul.f32 %v6669_v6, %v1430_v16  ;;  %v1450_v52 = vadd.f32 %v6667_v34, %v1449_v59  ;;  %v6671_v8 = vpop.eup %6670  ;;  %vm1467_vm0 = vweird.f32 %v6669_v6  ;;  %v5528_v16 = vld [vmem:[#allocation9 + $0xf0] sm:$0xf0]  ;;  %v5536_v59 = vld [vmem:[#allocation9 + $0xf8] sm:$0xf0] }
 0x273   :  { %v1439_v0 = vsel %vm1438_vm12, %v6665_v18, %v1435_v61  ;;  %vm1468_vm2 = vmor %vm1466_vm1, %vm1467_vm0  ;;  %v5531_v49 = vor.u32 %v6440_v42, %v5528_v16  ;;  %v5539_v60 = vor.u32 %v6441_v58, %v5536_v59  ;;  %2031 = vmatpush.bf16.msrb.mxu2 %v5535_v56  ;;  %v6438_v61 = vld [vmem:[#allocation9 + $0xcc] sm:$0xf0]  ;;  %v6429_v59 = vld [vmem:[#allocation9 + $0x8c] sm:$0xf] }
 0x274   :  { %v1463_v5 = vsub.f32 1.0, %v1462_v26  ;;  %v1444_v53 = vsel %vm1441_vm14, %v1443_v55, %v1439_v0  ;;  %v1454_v1 = vsel %vm1453_vm13, %v6667_v34, %v1450_v52  ;;  %v5526_v34 = vld [vmem:[#allocation9 + $0xe0] sm:$0xf]  ;;  %v6436_v26 = vld [vmem:[#allocation9 + $0xc4] sm:$0xf] }
 0x275   :  { %v1459_v2 = vsel %vm1456_vm15, %v1458_v63, %v1454_v1  ;;  %v1478_v9 = vmul.f32 %v6671_v8, %v1444_v53  ;;  %v5527_v45 = vor.u32 %v6442_v32, %v5526_v34  ;;  %2018 = vmatpush.bf16.msrb.mxu1 %v5531_v49  ;;  %2044 = vmatpush.bf16.msrb.mxu3 %v5539_v60  ;;  %v5512_v52 = vld [vmem:[#allocation9 + $0xd0] sm:$0xf0]  ;;  %v5518_v63 = vld [vmem:[#allocation9 + $0xc8] sm:$0xf]  ;;  %v6439_v0 = vld [vmem:[#allocation9 + $0xd4] sm:$0xf0] }
 0x276   :  { %v1464_v3 = vmul.f32 %v6669_v6, %v1463_v5  ;;  %v1477_v11 = vmul.f32 %v1459_v2, %v7292_v30  ;;  %v5515_v8 = vor.u32 %v6436_v26, %v5512_v52  ;;  %v5519_v5 = vor.u32 %v6439_v0, %v5518_v63  ;;  %v6437_v53 = vld [vmem:[#allocation9 + $0xcc] sm:$0xf]  ;;  %v5520_v1 = vld [vmem:[#allocation9 + $0xd8] sm:$0xf0]  ;;  %v5478_v32 = vld [vmem:[#allocation9 + $0x80] sm:$0xf] }
 0x277   :  { %2005 = vmatpush.bf16.msrb.mxu0 %v5527_v45  ;;  %v5523_v2 = vor.u32 %v6437_v53, %v5520_v1  ;;  %v6430_v42 = vld [vmem:[#allocation9 + $0x8c] sm:$0xf0]  ;;  %v6428_v45 = vld [vmem:[#allocation9 + $0x84] sm:$0xf]  ;;  %v6431_v49 = vld [vmem:[#allocation9 + $0x94] sm:$0xf0]  ;;  %v421_v53 = vadd.f32 %v7222_v27, %v7200_v14 }
 0x278   :  { %v7304_v15 = vadd.f32 %v1478_v9, %v1477_v11  ;;  %v1465_v62 = vadd.f32 %v6669_v6, %v1464_v3  ;;  %2032 = vmatpush.bf16.msrb.mxu2 %v5519_v5  ;;  %v5494_v9 = vld [vmem:[#allocation9 + $0xa0] sm:$0xf]  ;;  %v6434_v3 = vld [vmem:[#allocation9 + $0xac] sm:$0xf0]  ;;  %v6432_v11 = vld [vmem:[#allocation9 + $0xa4] sm:$0xf]  ;;  %v5479_v16 = vor.u32 %v6430_v42, %v5478_v32  ;;  %v5483_v56 = vor.u32 %v6428_v45, %v5480_v46 }
 0x279   :  { %2019 = vmatpush.bf16.msrb.mxu1 %v5515_v8  ;;  %2045 = vmatpush.bf16.msrb.mxu3 %v5523_v2  ;;  %v5487_v58 = vor.u32 %v6431_v49, %v5486_v36  ;;  %v5488_v60 = vld [vmem:[#allocation9 + $0x98] sm:$0xf0]  ;;  %v6426_v26 = vld [vmem:[#allocation9 + $0x6c] sm:$0xf0]  ;;  %v5464_v63 = vld [vmem:[#allocation9 + $0x70] sm:$0xf0]  ;;  %v392_v5 = vadd.f32 %v7217_v25, %v7196_v12 }
 0x27a   :  { %6672 = vtanh.f32 %v7304_v15  ;;  %v1469_v17 = vsel %vm1468_vm2, %v6669_v6, %v1465_v62  ;;  %v5510_v6 = vld [vmem:[#allocation9 + $0xc0] sm:$0xf]  ;;  %v5495_v62 = vor.u32 %v6434_v3, %v5494_v9  ;;  %v5470_v0 = vld [vmem:[#allocation9 + $0x68] sm:$0xf]  ;;  %v6427_v8 = vld [vmem:[#allocation9 + $0x74] sm:$0xf0] }
 0x27b   :  { %v1474_v18 = vsel %vm1471_vm3, %v1473_v10, %v1469_v17  ;;  %v5511_v55 = vor.u32 %v6438_v61, %v5510_v6  ;;  %v6435_v17 = vld [vmem:[#allocation9 + $0xb4] sm:$0xf0]  ;;  %v5499_v10 = vor.u32 %v6432_v11, %v5496_v13  ;;  %v5491_v6 = vor.u32 %v6429_v59, %v5488_v60  ;;  %v5462_v61 = vld [vmem:[#allocation9 + $0x60] sm:$0xf]  ;;  %v6425_v9 = vld [vmem:[#allocation9 + $0x6c] sm:$0xf] }
 0x27c   :  { %v5463_v52 = vor.u32 %v6426_v26, %v5462_v61  ;;  %v5471_v2 = vor.u32 %v6427_v8, %v5470_v0  ;;  %v5472_v3 = vld [vmem:[#allocation9 + $0x78] sm:$0xf0]  ;;  %v6423_v27 = vld [vmem:[#allocation9 + $0x54] sm:$0xf0]  ;;  %v6421_v46 = vld [vmem:[#allocation9 + $0x4c] sm:$0xf]  ;;  %v450_v26 = vadd.f32 %v7224_v28, %v7210_v20 }
 0x27d   :  { %2006 = vmatpush.bf16.msrb.mxu0 %v5511_v55  ;;  %2020 = vmatpush.bf16.msrb.mxu1 %v5499_v10  ;;  %v6424_v55 = vld [vmem:[#allocation9 + $0x64] sm:$0xf]  ;;  %v5475_v13 = vor.u32 %v6425_v9, %v5472_v3  ;;  %v5446_v10 = vld [vmem:[#allocation9 + $0x40] sm:$0xf]  ;;  %v5456_v36 = vld [vmem:[#allocation9 + $0x58] sm:$0xf0] }
 0x27e   :  { %v5467_v1 = vor.u32 %v6424_v55, %v5464_v63  ;;  %v5430_v49 = vld [vmem:[#allocation9 + $0x20] sm:$0xf]  ;;  %v6416_v60 = vld [vmem:[#allocation9 + $0x24] sm:$0xf]  ;;  %v5438_v61 = vld [vmem:[#allocation9 + $0x28] sm:$0xf] }
 0x27f   :  { %v6417_v63 = vld [vmem:[#allocation9 + $0x2c] sm:$0xf]  ;;  %v5440_v0 = vld [vmem:[#allocation9 + $0x38] sm:$0xf0]  ;;  %v6414_v9 = vld [vmem:[#allocation9 + $0xc] sm:$0xf0] }
 0x280   :  { %v6673_v19 = vpop.eup %6672  ;;  %v6412_v3 = vld [vmem:[#allocation9 + $0x4] sm:$0xf]  ;;  %v5422_v28 = vld [vmem:[#allocation9 + $0x8] sm:$0xf] }
 0x281   :  { %v7307_v24 = vmul.f32 %v6673_v19, %v1474_v18  ;;  %v5503_v19 = vor.u32 %v6435_v17, %v5502_v23  ;;  %v6433_v18 = vld [vmem:[#allocation9 + $0xac] sm:$0xf]  ;;  %2007 = vmatpush.bf16.msrb.mxu0 %v5495_v62  ;;  %2021 = vmatpush.bf16.msrb.mxu1 %v5483_v56  ;;  %v6418_v56 = vld [vmem:[#allocation9 + $0x2c] sm:$0xf0] }
 0x282   :  { %v5431_v59 = vor.u32 %v6418_v56, %v5430_v49  ;;  %v479_v56 = vadd.f32 %v7226_v29, %v7212_v21 }
 0x283   :  { %v1491_v30 = vpack.c.bf16 %v7307_v24, %v7307_v24  ;;  %2033 = vmatpush.bf16.msrb.mxu2 %v5503_v19  ;;  %v6422_v19 = vld [vmem:[#allocation9 + $0x4c] sm:$0xf0] }
 0x284   :  { %v5447_v25 = vor.u32 %v6422_v19, %v5446_v10  ;;  %v6415_v10 = vld [vmem:[#allocation9 + $0x14] sm:$0xf0] }
 0x285   :  { %1692 = vmatmul.bf16.vlgmr.msra.gmra.mxu0 %v1491_v30  ;;  %1705 = vmatmul.bf16.vlgmr.msra.gmra.mxu1 %v1491_v30 }
 0x286   :  { %1718 = vmatmul.bf16.vlgmr.msra.gmra.mxu2 %v1491_v30  ;;  %1731 = vmatmul.bf16.vlgmr.msra.gmra.mxu3 %v1491_v30  ;;  %v5504_v30 = vld [vmem:[#allocation9 + $0xb8] sm:$0xf0] }
 0x287   :  { %v5507_v34 = vor.u32 %v6433_v18, %v5504_v30  ;;  %2008 = vmatpush.bf16.msrb.mxu0 %v5479_v16  ;;  %2034 = vmatpush.bf16.msrb.mxu2 %v5487_v58  ;;  %v6420_v18 = vld [vmem:[#allocation9 + $0x44] sm:$0xf]  ;;  %v5448_v30 = vld [vmem:[#allocation9 + $0x50] sm:$0xf0]  ;;  %v5459_v58 = vor.u32 %v6421_v46, %v5456_v36 }
 0x288   :  { %2022 = vmatpush.bf16.msrb.mxu1 %v5467_v1  ;;  %v5451_v45 = vor.u32 %v6420_v18, %v5448_v30  ;;  %v5443_v1 = vor.u32 %v6417_v63, %v5440_v0  ;;  %v5423_v18 = vor.u32 %v6415_v10, %v5422_v28  ;;  %v5424_v30 = vld [vmem:[#allocation9 + $0x18] sm:$0xf0] }
 0x289   :  { %2046 = vmatpush.bf16.msrb.mxu3 %v5507_v34  ;;  %v5454_v34 = vld [vmem:[#allocation9 + $0x48] sm:$0xf] }
 0x28a   :  { %v5455_v16 = vor.u32 %v6423_v27, %v5454_v34 }
 0x28b   :  { %2009 = vmatpush.bf16.msrb.mxu0 %v5463_v52  ;;  %2035 = vmatpush.bf16.msrb.mxu2 %v5471_v2  ;;  %v6419_v52 = vld [vmem:[#allocation9 + $0x34] sm:$0xf0]  ;;  %v5414_v2 = vld [vmem:[#allocation9] sm:$0xf] }
 0x28c   :  { %2023 = vmatpush.bf16.msrb.mxu1 %v5451_v45 }
 0x28d   :  { %2047 = vmatpush.bf16.msrb.mxu3 %v5491_v6  ;;  %v5432_v6 = vld [vmem:[#allocation9 + $0x30] sm:$0xf0] }
 0x28e   :  { %v5435_v55 = vor.u32 %v6416_v60, %v5432_v6 }
 0x28f   :  { %2010 = vmatpush.bf16.msrb.mxu0 %v5447_v25  ;;  %2036 = vmatpush.bf16.msrb.mxu2 %v5455_v16  ;;  %v6413_v25 = vld [vmem:[#allocation9 + $0xc] sm:$0xf] }
 0x290   :  { %2024 = vmatpush.bf16.msrb.mxu1 %v5435_v55 }
 0x291   :  { %2048 = vmatpush.bf16.msrb.mxu3 %v5475_v13 }
 0x293   :  { %2011 = vmatpush.bf16.msrb.mxu0 %v5431_v59 }
 0x295   :  { %2049 = vmatpush.bf16.msrb.mxu3 %v5459_v58 }
 0x299   :  { %2050 = vmatpush.bf16.msrb.mxu3 %v5443_v1 }
 0x302   :  { %v1693_v11 = vpop.f32.mrf.mxu0  ;;  %v1706_v62 = vpop.f32.mrf.mxu1 }
 0x303   :  { %v1736_v23 = vadd.f32 %v1693_v11, %v392_v5  ;;  %v1737_v17 = vadd.f32 %v1706_v62, %v421_v53  ;;  %v5439_v53 = vor.u32 %v6419_v52, %v5438_v61 }
 0x305   :  { %v5409_v32 = vmul.f32 -1.442695, %v1736_v23  ;;  %v5410_v42 = vmul.f32 -1.442695, %v1737_v17  ;;  %v5415_v23 = vor.u32 %v6414_v9, %v5414_v2  ;;  %v5416_v17 = vld [vmem:[#allocation9 + $0x10] sm:$0xf0]  ;;  %2037 = vmatpush.bf16.msrb.mxu2 %v5439_v53 }
 0x306   :  { %v5419_v19 = vor.u32 %v6412_v3, %v5416_v17 }
 0x307   :  { %6674 = vpow2.f32 %v5409_v32  ;;  %v5427_v32 = vor.u32 %v6413_v25, %v5424_v30  ;;  %2012 = vmatpush.bf16.msrb.mxu0 %v5415_v23 }
 0x308   :  { %6676 = vpow2.f32 %v5410_v42  ;;  %2025 = vmatpush.bf16.msrb.mxu1 %v5419_v19 }
 0x309   :  { %v1719_v8 = vpop.f32.mrf.mxu2  ;;  %v1732_v5 = vpop.f32.mrf.mxu3  ;;  %2038 = vmatpush.bf16.msrb.mxu2 %v5423_v18  ;;  %2051 = vmatpush.bf16.msrb.mxu3 %v5427_v32 }
 0x30a   :  { %v1738_v11 = vadd.f32 %v1719_v8, %v450_v26  ;;  %v1695_v62 = vpop.f32.mrf.mxu0  ;;  %v1708_v13 = vpop.f32.mrf.mxu1  ;;  %v1739_v60 = vadd.f32 %v1732_v5, %v479_v56  ;;  %v5657_v56 = vld [vmem:[#allocation9 + $0xe0] sm:$0xf] }
 0x30c   :  { %v5411_v34 = vmul.f32 -1.442695, %v1738_v11 }
 0x30d   :  { %v6675_v27 = vpop.eup %6674 }
 0x30e   :  { %v6677_v42 = vpop.eup %6676  ;;  %v1749_v45 = vadd.f32 1.0, %v6675_v27  ;;  %6678 = vpow2.f32 %v5411_v34 }
 0x30f   :  { %v1750_v16 = vadd.f32 1.0, %v6677_v42 }
 0x310   :  { %6680 = vrcp.f32 %v1749_v45  ;;  %v1763_v63 = vand.u32 2147483648, %v1749_v45  ;;  %v1761_v53 = vand.u32 2147483647, %v1749_v45  ;;  %vm1757_vm6 = vweird.f32 %v1749_v45 }
 0x311   :  { %6682 = vrcp.f32 %v1750_v16  ;;  %v1721_v46 = vpop.f32.mrf.mxu2  ;;  %v1734_v36 = vpop.f32.mrf.mxu3  ;;  %v1778_v0 = vand.u32 2147483648, %v1750_v16  ;;  %v1776_v2 = vand.u32 2147483647, %v1750_v16  ;;  %vm1772_vm7 = vweird.f32 %v1750_v16 }
 0x312   :  { %v1764_v3 = vor.u32 1.1754944e-38, %v1763_v63  ;;  %vm1762_vm10 = vcmp.eq.f32.partialorder %v1761_v53, 8.507059e+37  ;;  %v6473_v63 = vld [vmem:[#allocation9 + $0xec] sm:$0xf]  ;;  %v5641_v53 = vld [vmem:[#allocation9 + $0xc0] sm:$0xf] }
 0x313   :  { %v1779_v62 = vor.u32 1.1754944e-38, %v1778_v0  ;;  %vm1777_vm11 = vcmp.eq.f32.partialorder %v1776_v2, 8.507059e+37  ;;  %v5667_v0 = vld [vmem:[#allocation9 + $0xf8] sm:$0xf0]  ;;  %v6468_v2 = vld [vmem:[#allocation9 + $0xc4] sm:$0xf] }
 0x314   :  { %v6679_v49 = vpop.eup %6678 }
 0x315   :  { %v1751_v58 = vadd.f32 1.0, %v6679_v49 }
 0x316   :  { %v6681_v59 = vpop.eup %6680 }
 0x317   :  { %v6683_v6 = vpop.eup %6682  ;;  %v1753_v61 = vmul.f32 %v6681_v59, %v1749_v45  ;;  %6684 = vrcp.f32 %v1751_v58  ;;  %vm1758_vm4 = vweird.f32 %v6681_v59  ;;  %v1793_v32 = vand.u32 2147483648, %v1751_v58 }
 0x318   :  { %v1768_v26 = vmul.f32 %v6683_v6, %v1750_v16  ;;  %6686 = vtanh.f32 %v1739_v60  ;;  %vm1773_vm5 = vweird.f32 %v6683_v6  ;;  %vm1759_vm8 = vmor %vm1757_vm6, %vm1758_vm4  ;;  %vm1787_vm13 = vweird.f32 %v1751_v58  ;;  %v6472_v60 = vld [vmem:[#allocation9 + $0xe4] sm:$0xf] }
 0x319   :  { %v1754_v55 = vsub.f32 1.0, %v1753_v61  ;;  %vm1774_vm9 = vmor %vm1772_vm7, %vm1773_vm5  ;;  %v1791_v42 = vand.u32 2147483647, %v1751_v58  ;;  %v1794_v16 = vor.u32 1.1754944e-38, %v1793_v32  ;;  %v5665_v61 = vld [vmem:[#allocation9 + $0xe8] sm:$0xf] }
 0x31a   :  { %v1769_v52 = vsub.f32 1.0, %v1768_v26  ;;  %v6475_v26 = vld [vmem:[#allocation9 + $0xf4] sm:$0xf0] }
 0x31b   :  { %v1755_v8 = vmul.f32 %v6681_v59, %v1754_v55  ;;  %vm1792_vm15 = vcmp.eq.f32.partialorder %v1791_v42, 8.507059e+37 }
 0x31c   :  { %v1770_v1 = vmul.f32 %v6683_v6, %v1769_v52  ;;  %v5666_v52 = vor.u32 %v6475_v26, %v5665_v61 }
 0x31d   :  { %v6685_v9 = vpop.eup %6684  ;;  %v1756_v29 = vadd.f32 %v6681_v59, %v1755_v8  ;;  %v5670_v8 = vor.u32 %v6473_v63, %v5667_v0  ;;  %v5593_v0 = vld [vmem:[#allocation9 + $0x60] sm:$0xf] }
 0x31e   :  { %v1783_v5 = vmul.f32 %v6685_v9, %v1751_v58  ;;  %v1771_v11 = vadd.f32 %v6683_v6, %v1770_v1  ;;  %v6687_v23 = vpop.eup %6686  ;;  %vm1788_vm12 = vweird.f32 %v6685_v9  ;;  %v5659_v58 = vld [vmem:[#allocation9 + $0xf0] sm:$0xf0]  ;;  %2352 = vmatpush.bf16.msra.mxu2 %v5666_v52  ;;  %v6470_v1 = vld [vmem:[#allocation9 + $0xcc] sm:$0xf0]  ;;  %v5619_v52 = vld [vmem:[#allocation9 + $0x98] sm:$0xf0] }
 0x31f   :  { %v1760_v13 = vsel %vm1759_vm8, %v6681_v59, %v1756_v29  ;;  %vm1789_vm14 = vmor %vm1787_vm13, %vm1788_vm12  ;;  %v6474_v59 = vld [vmem:[#allocation9 + $0xec] sm:$0xf0]  ;;  %v5662_v55 = vor.u32 %v6472_v60, %v5659_v58  ;;  %2365 = vmatpush.bf16.msra.mxu3 %v5670_v8  ;;  %v5643_v29 = vld [vmem:[#allocation9 + $0xd0] sm:$0xf0] }
 0x320   :  { %v1784_v17 = vsub.f32 1.0, %v1783_v5  ;;  %v1765_v28 = vsel %vm1762_vm10, %v1764_v3, %v1760_v13  ;;  %v1775_v10 = vsel %vm1774_vm9, %v6683_v6, %v1771_v11  ;;  %v5658_v6 = vor.u32 %v6474_v59, %v5657_v56  ;;  %v5649_v5 = vld [vmem:[#allocation9 + $0xc8] sm:$0xf]  ;;  %v6471_v3 = vld [vmem:[#allocation9 + $0xd4] sm:$0xf0] }
 0x321   :  { %v1780_v19 = vsel %vm1777_vm11, %v1779_v62, %v1775_v10  ;;  %v1799_v18 = vmul.f32 %v6687_v23, %v1765_v28  ;;  %2339 = vmatpush.bf16.msra.mxu1 %v5662_v55  ;;  %v5646_v11 = vor.u32 %v6468_v2, %v5643_v29  ;;  %v5650_v62 = vor.u32 %v6471_v3, %v5649_v5  ;;  %v6469_v13 = vld [vmem:[#allocation9 + $0xcc] sm:$0xf]  ;;  %v5651_v23 = vld [vmem:[#allocation9 + $0xd8] sm:$0xf0]  ;;  %v5625_v28 = vld [vmem:[#allocation9 + $0xa0] sm:$0xf] }
 0x322   :  { %v1785_v25 = vmul.f32 %v6685_v9, %v1784_v17  ;;  %v1798_v30 = vmul.f32 %v1780_v19, %v7304_v15  ;;  %2326 = vmatpush.bf16.msra.mxu0 %v5658_v6  ;;  %v5654_v17 = vor.u32 %v6469_v13, %v5651_v23  ;;  %v6466_v10 = vld [vmem:[#allocation9 + $0xac] sm:$0xf0]  ;;  %v6464_v19 = vld [vmem:[#allocation9 + $0xa4] sm:$0xf]  ;;  %v5611_v60 = vld [vmem:[#allocation9 + $0x90] sm:$0xf0] }
 0x323   :  { %2353 = vmatpush.bf16.msra.mxu2 %v5650_v62  ;;  %v6460_v56 = vld [vmem:[#allocation9 + $0x84] sm:$0xf]  ;;  %v5617_v6 = vld [vmem:[#allocation9 + $0x88] sm:$0xf]  ;;  %v6463_v58 = vld [vmem:[#allocation9 + $0x94] sm:$0xf0] }
 0x324   :  { %v7320_v34 = vadd.f32 %v1799_v18, %v1798_v30  ;;  %v1786_v27 = vadd.f32 %v6685_v9, %v1785_v25  ;;  %2366 = vmatpush.bf16.msra.mxu3 %v5654_v17  ;;  %v5626_v18 = vor.u32 %v6466_v10, %v5625_v28  ;;  %v5627_v25 = vld [vmem:[#allocation9 + $0xb0] sm:$0xf0]  ;;  %v5633_v30 = vld [vmem:[#allocation9 + $0xa8] sm:$0xf]  ;;  %v5614_v61 = vor.u32 %v6460_v56, %v5611_v60  ;;  %v6461_v55 = vld [vmem:[#allocation9 + $0x8c] sm:$0xf] }
 0x325   :  { %2340 = vmatpush.bf16.msra.mxu1 %v5646_v11  ;;  %v5630_v32 = vor.u32 %v6464_v19, %v5627_v25  ;;  %v5618_v26 = vor.u32 %v6463_v58, %v5617_v6  ;;  %v5622_v63 = vor.u32 %v6461_v55, %v5619_v52  ;;  %v6458_v8 = vld [vmem:[#allocation9 + $0x6c] sm:$0xf0]  ;;  %v5595_v2 = vld [vmem:[#allocation9 + $0x70] sm:$0xf0]  ;;  %v6459_v29 = vld [vmem:[#allocation9 + $0x74] sm:$0xf0] }
 0x326   :  { %6688 = vtanh.f32 %v7320_v34  ;;  %v1790_v45 = vsel %vm1789_vm14, %v6685_v9, %v1786_v27  ;;  %v5642_v9 = vor.u32 %v6470_v1, %v5641_v53  ;;  %v6467_v27 = vld [vmem:[#allocation9 + $0xb4] sm:$0xf0]  ;;  %v6456_v53 = vld [vmem:[#allocation9 + $0x64] sm:$0xf]  ;;  %v5594_v1 = vor.u32 %v6458_v8, %v5593_v0  ;;  %v6457_v11 = vld [vmem:[#allocation9 + $0x6c] sm:$0xf] }
 0x327   :  { %v1795_v36 = vsel %vm1792_vm15, %v1794_v16, %v1790_v45  ;;  %v5634_v42 = vor.u32 %v6467_v27, %v5633_v30  ;;  %v6465_v45 = vld [vmem:[#allocation9 + $0xac] sm:$0xf]  ;;  %v5635_v16 = vld [vmem:[#allocation9 + $0xb8] sm:$0xf0]  ;;  %v5598_v5 = vor.u32 %v6456_v53, %v5595_v2  ;;  %v5577_v19 = vld [vmem:[#allocation9 + $0x40] sm:$0xf] }
 0x328   :  { %2327 = vmatpush.bf16.msra.mxu0 %v5642_v9  ;;  %v5601_v9 = vld [vmem:[#allocation9 + $0x68] sm:$0xf]  ;;  %v5603_v62 = vld [vmem:[#allocation9 + $0x78] sm:$0xf0]  ;;  %v6452_v25 = vld [vmem:[#allocation9 + $0x44] sm:$0xf] }
 0x329   :  { %2341 = vmatpush.bf16.msra.mxu1 %v5630_v32  ;;  %2354 = vmatpush.bf16.msra.mxu2 %v5634_v42  ;;  %v5602_v3 = vor.u32 %v6459_v29, %v5601_v9  ;;  %v5606_v17 = vor.u32 %v6457_v11, %v5603_v62  ;;  %v5579_v27 = vld [vmem:[#allocation9 + $0x50] sm:$0xf0]  ;;  %v5585_v32 = vld [vmem:[#allocation9 + $0x48] sm:$0xf]  ;;  %v6455_v42 = vld [vmem:[#allocation9 + $0x54] sm:$0xf0] }
 0x32a   :  { %v5587_v56 = vld [vmem:[#allocation9 + $0x58] sm:$0xf0]  ;;  %v6448_v6 = vld [vmem:[#allocation9 + $0x24] sm:$0xf]  ;;  %v5563_v58 = vld [vmem:[#allocation9 + $0x30] sm:$0xf0] }
 0x32b   :  { %v6451_v55 = vld [vmem:[#allocation9 + $0x34] sm:$0xf0]  ;;  %v6449_v52 = vld [vmem:[#allocation9 + $0x2c] sm:$0xf]  ;;  %v5545_v2 = vld [vmem:[#allocation9] sm:$0xf] }
 0x32c   :  { %v6689_v46 = vpop.eup %6688  ;;  %2328 = vmatpush.bf16.msra.mxu0 %v5626_v18  ;;  %v6454_v18 = vld [vmem:[#allocation9 + $0x4c] sm:$0xf0]  ;;  %v6444_v29 = vld [vmem:[#allocation9 + $0x4] sm:$0xf] }
 0x32d   :  { %v7323_v49 = vmul.f32 %v6689_v46, %v1795_v36  ;;  %v5638_v46 = vor.u32 %v6465_v45, %v5635_v16  ;;  %v5609_v36 = vld [vmem:[#allocation9 + $0x80] sm:$0xf]  ;;  %2342 = vmatpush.bf16.msra.mxu1 %v5614_v61  ;;  %2355 = vmatpush.bf16.msra.mxu2 %v5618_v26  ;;  %v5578_v30 = vor.u32 %v6454_v18, %v5577_v19  ;;  %v5569_v61 = vld [vmem:[#allocation9 + $0x28] sm:$0xf]  ;;  %v6446_v9 = vld [vmem:[#allocation9 + $0xc] sm:$0xf0] }
 0x32e   :  { %v5566_v26 = vor.u32 %v6448_v6, %v5563_v58  ;;  %v5570_v53 = vor.u32 %v6451_v55, %v5569_v61  ;;  %v5546_v62 = vor.u32 %v6446_v9, %v5545_v2  ;;  %v6445_v19 = vld [vmem:[#allocation9 + $0xc] sm:$0xf]  ;;  %v5555_v18 = vld [vmem:[#allocation9 + $0x18] sm:$0xf0] }
 0x32f   :  { %v1812_v15 = vpack.c.bf16 %v7323_v49, %v7323_v49  ;;  %2367 = vmatpush.bf16.msra.mxu3 %v5638_v46  ;;  %v5582_v46 = vor.u32 %v6452_v25, %v5579_v27  ;;  %v5558_v27 = vor.u32 %v6445_v19, %v5555_v18 }
 0x331   :  { %2013 = vmatmul.bf16.vlgmr.msrb.gmra.mxu0 %v1812_v15  ;;  %2026 = vmatmul.bf16.vlgmr.msrb.gmra.mxu1 %v1812_v15 }
 0x332   :  { %2039 = vmatmul.bf16.vlgmr.msrb.gmra.mxu2 %v1812_v15  ;;  %2052 = vmatmul.bf16.vlgmr.msrb.gmra.mxu3 %v1812_v15  ;;  %v6462_v15 = vld [vmem:[#allocation9 + $0x8c] sm:$0xf0] }
 0x333   :  { %v5610_v59 = vor.u32 %v6462_v15, %v5609_v36  ;;  %2368 = vmatpush.bf16.msra.mxu3 %v5622_v63  ;;  %2343 = vmatpush.bf16.msra.mxu1 %v5598_v5  ;;  %v5586_v36 = vor.u32 %v6455_v42, %v5585_v32  ;;  %v6453_v15 = vld [vmem:[#allocation9 + $0x4c] sm:$0xf]  ;;  %v5571_v63 = vld [vmem:[#allocation9 + $0x38] sm:$0xf0] }
 0x334   :  { %2356 = vmatpush.bf16.msra.mxu2 %v5602_v3 }
 0x335   :  { %2329 = vmatpush.bf16.msra.mxu0 %v5610_v59  ;;  %v6450_v59 = vld [vmem:[#allocation9 + $0x2c] sm:$0xf0] }
 0x337   :  { %2369 = vmatpush.bf16.msra.mxu3 %v5606_v17  ;;  %2344 = vmatpush.bf16.msra.mxu1 %v5582_v46  ;;  %v6447_v17 = vld [vmem:[#allocation9 + $0x14] sm:$0xf0] }
 0x338   :  { %2357 = vmatpush.bf16.msra.mxu2 %v5586_v36 }
 0x339   :  { %2330 = vmatpush.bf16.msra.mxu0 %v5594_v1  ;;  %v5574_v1 = vor.u32 %v6449_v52, %v5571_v63 }
 0x33b   :  { %2345 = vmatpush.bf16.msra.mxu1 %v5566_v26 }
 0x33c   :  { %2358 = vmatpush.bf16.msra.mxu2 %v5570_v53 }
 0x33d   :  { %2331 = vmatpush.bf16.msra.mxu0 %v5578_v30 }
 0x3ae   :  { %v2014_v13 = vpop.f32.mrf.mxu0  ;;  %v2027_v23 = vpop.f32.mrf.mxu1 }
 0x3af   :  { %v2057_v28 = vadd.f32 %v2014_v13, %v7229_v31  ;;  %v2058_v10 = vadd.f32 %v2027_v23, %v7232_v33  ;;  %v5561_v31 = vld [vmem:[#allocation9 + $0x20] sm:$0xf]  ;;  %v5590_v33 = vor.u32 %v6453_v15, %v5587_v56  ;;  %v5547_v13 = vld [vmem:[#allocation9 + $0x10] sm:$0xf0]  ;;  %v5553_v23 = vld [vmem:[#allocation9 + $0x8] sm:$0xf] }
 0x3b0   :  { %v5562_v60 = vor.u32 %v6450_v59, %v5561_v31 }
 0x3b1   :  { %v5540_v45 = vmul.f32 -1.442695, %v2057_v28  ;;  %v5541_v16 = vmul.f32 -1.442695, %v2058_v10  ;;  %2370 = vmatpush.bf16.msra.mxu3 %v5590_v33  ;;  %v5550_v28 = vor.u32 %v6444_v29, %v5547_v13  ;;  %v5554_v10 = vor.u32 %v6447_v17, %v5553_v23 }
 0x3b2   :  { %2332 = vmatpush.bf16.msra.mxu0 %v5562_v60 }
 0x3b3   :  { %6690 = vpow2.f32 %v5540_v45  ;;  %2346 = vmatpush.bf16.msra.mxu1 %v5550_v28  ;;  %2359 = vmatpush.bf16.msra.mxu2 %v5554_v10 }
 0x3b4   :  { %6692 = vpow2.f32 %v5541_v16 }
 0x3b5   :  { %v2040_v0 = vpop.f32.mrf.mxu2  ;;  %v2053_v8 = vpop.f32.mrf.mxu3  ;;  %2371 = vmatpush.bf16.msra.mxu3 %v5574_v1 }
 0x3b6   :  { %v2059_v5 = vadd.f32 %v2040_v0, %v7235_v35  ;;  %v2016_v3 = vpop.f32.mrf.mxu0  ;;  %v2029_v11 = vpop.f32.mrf.mxu1  ;;  %2333 = vmatpush.bf16.msra.mxu0 %v5546_v62  ;;  %v2060_v56 = vadd.f32 %v2053_v8, %v7240_v38 }
 0x3b8   :  { %v5542_v25 = vmul.f32 -1.442695, %v2059_v5 }
 0x3b9   :  { %v6691_v30 = vpop.eup %6690  ;;  %2372 = vmatpush.bf16.msra.mxu3 %v5558_v27 }
 0x3ba   :  { %v6693_v32 = vpop.eup %6692  ;;  %v2070_v42 = vadd.f32 1.0, %v6691_v30  ;;  %6694 = vpow2.f32 %v5542_v25 }
 0x3bb   :  { %v2071_v35 = vadd.f32 1.0, %v6693_v32 }
 0x3bc   :  { %6696 = vrcp.f32 %v2070_v42  ;;  %v2084_v58 = vand.u32 2147483648, %v2070_v42  ;;  %v2082_v55 = vand.u32 2147483647, %v2070_v42  ;;  %vm2078_vm2 = vweird.f32 %v2070_v42 }
 0x3bd   :  { %6698 = vrcp.f32 %v2071_v35  ;;  %v2042_v45 = vpop.f32.mrf.mxu2  ;;  %v2055_v16 = vpop.f32.mrf.mxu3  ;;  %v2099_v61 = vand.u32 2147483648, %v2071_v35  ;;  %v2097_v63 = vand.u32 2147483647, %v2071_v35  ;;  %vm2093_vm3 = vweird.f32 %v2071_v35 }
 0x3be   :  { %v2085_v8 = vor.u32 1.1754944e-38, %v2084_v58  ;;  %vm2083_vm6 = vcmp.eq.f32.partialorder %v2082_v55, 8.507059e+37  ;;  %v6506_v45 = vld [vmem:[#allocation9 + $0xec] sm:$0xf0]  ;;  %v6504_v16 = vld [vmem:[#allocation9 + $0xe4] sm:$0xf] }
 0x3bf   :  { %v2100_v2 = vor.u32 1.1754944e-38, %v2099_v61  ;;  %vm2098_vm7 = vcmp.eq.f32.partialorder %v2097_v63, 8.507059e+37  ;;  %v5772_v58 = vld [vmem:[#allocation9 + $0xc0] sm:$0xf]  ;;  %v6502_v61 = vld [vmem:[#allocation9 + $0xcc] sm:$0xf0] }
 0x3c0   :  { %v6695_v46 = vpop.eup %6694  ;;  %v5773_v55 = vor.u32 %v6502_v61, %v5772_v58  ;;  %v5780_v63 = vld [vmem:[#allocation9 + $0xc8] sm:$0xf]  ;;  %v6491_v61 = vld [vmem:[#allocation9 + $0x74] sm:$0xf0] }
 0x3c1   :  { %v2072_v36 = vadd.f32 1.0, %v6695_v46  ;;  %v5732_v58 = vld [vmem:[#allocation9 + $0x68] sm:$0xf] }
 0x3c2   :  { %v6697_v15 = vpop.eup %6696 }
 0x3c3   :  { %v6699_v31 = vpop.eup %6698  ;;  %v2074_v59 = vmul.f32 %v6697_v15, %v2070_v42  ;;  %6700 = vrcp.f32 %v2072_v36  ;;  %vm2079_vm0 = vweird.f32 %v6697_v15  ;;  %v2114_v19 = vand.u32 2147483648, %v2072_v36 }
 0x3c4   :  { %v2089_v33 = vmul.f32 %v6699_v31, %v2071_v35  ;;  %6702 = vtanh.f32 %v2060_v56  ;;  %vm2094_vm1 = vweird.f32 %v6699_v31  ;;  %vm2080_vm4 = vmor %vm2078_vm2, %vm2079_vm0  ;;  %vm2108_vm9 = vweird.f32 %v2072_v36  ;;  %v5788_v35 = vld [vmem:[#allocation9 + $0xe0] sm:$0xf]  ;;  %v6507_v56 = vld [vmem:[#allocation9 + $0xf4] sm:$0xf0] }
 0x3c5   :  { %v2075_v60 = vsub.f32 1.0, %v2074_v59  ;;  %vm2095_vm5 = vmor %vm2093_vm3, %vm2094_vm1  ;;  %v2112_v18 = vand.u32 2147483647, %v2072_v36  ;;  %v2115_v30 = vor.u32 1.1754944e-38, %v2114_v19  ;;  %v5789_v46 = vor.u32 %v6506_v45, %v5788_v35  ;;  %v5766_v19 = vld [vmem:[#allocation9 + $0xb8] sm:$0xf0] }
 0x3c6   :  { %v2090_v6 = vsub.f32 1.0, %v2089_v33  ;;  %v6505_v33 = vld [vmem:[#allocation9 + $0xec] sm:$0xf]  ;;  %v5748_v35 = vld [vmem:[#allocation9 + $0x88] sm:$0xf] }
 0x3c7   :  { %v2076_v26 = vmul.f32 %v6697_v15, %v2075_v60  ;;  %vm2113_vm11 = vcmp.eq.f32.partialorder %v2112_v18, 8.507059e+37  ;;  %v5798_v60 = vld [vmem:[#allocation9 + $0xf8] sm:$0xf0]  ;;  %2647 = vmatpush.bf16.msrb.mxu0 %v5789_v46  ;;  %v6495_v45 = vld [vmem:[#allocation9 + $0x94] sm:$0xf0] }
 0x3c8   :  { %v2091_v52 = vmul.f32 %v6699_v31, %v2090_v6  ;;  %v5801_v6 = vor.u32 %v6505_v33, %v5798_v60  ;;  %v5749_v46 = vor.u32 %v6495_v45, %v5748_v35  ;;  %v6488_v33 = vld [vmem:[#allocation9 + $0x64] sm:$0xf]  ;;  %v5694_v35 = vld [vmem:[#allocation9 + $0x30] sm:$0xf0]  ;;  %v5700_v45 = vld [vmem:[#allocation9 + $0x28] sm:$0xf] }
 0x3c9   :  { %v6701_v0 = vpop.eup %6700  ;;  %v2077_v53 = vadd.f32 %v6697_v15, %v2076_v26  ;;  %v6500_v26 = vld [vmem:[#allocation9 + $0xc4] sm:$0xf] }
 0x3ca   :  { %v2104_v38 = vmul.f32 %v6701_v0, %v2072_v36  ;;  %v2092_v1 = vadd.f32 %v6699_v31, %v2091_v52  ;;  %v6703_v29 = vpop.eup %6702  ;;  %vm2109_vm8 = vweird.f32 %v6701_v0  ;;  %v5790_v36 = vld [vmem:[#allocation9 + $0xf0] sm:$0xf0]  ;;  %2686 = vmatpush.bf16.msrb.mxu3 %v5801_v6 }
 0x3cb   :  { %v2081_v9 = vsel %vm2080_vm4, %v6697_v15, %v2077_v53  ;;  %vm2110_vm10 = vmor %vm2108_vm9, %vm2109_vm8  ;;  %v5796_v15 = vld [vmem:[#allocation9 + $0xe8] sm:$0xf]  ;;  %v5774_v52 = vld [vmem:[#allocation9 + $0xd0] sm:$0xf0]  ;;  %2648 = vmatpush.bf16.msrb.mxu0 %v5773_v55  ;;  %v426_v55 = vadd.f32 %v7242_v39, %v7200_v14 }
 0x3cc   :  { %v2105_v5 = vsub.f32 1.0, %v2104_v38  ;;  %v2086_v3 = vsel %vm2083_vm6, %v2085_v8, %v2081_v9  ;;  %v2096_v11 = vsel %vm2095_vm5, %v6699_v31, %v2092_v1  ;;  %v5793_v31 = vor.u32 %v6504_v16, %v5790_v36  ;;  %v6501_v8 = vld [vmem:[#allocation9 + $0xcc] sm:$0xf]  ;;  %v5782_v1 = vld [vmem:[#allocation9 + $0xd8] sm:$0xf0] }
 0x3cd   :  { %v2101_v62 = vsel %vm2098_vm7, %v2100_v2, %v2096_v11  ;;  %v2120_v13 = vmul.f32 %v6703_v29, %v2086_v3  ;;  %v5797_v59 = vor.u32 %v6507_v56, %v5796_v15  ;;  %v5777_v53 = vor.u32 %v6500_v26, %v5774_v52  ;;  %v5756_v9 = vld [vmem:[#allocation9 + $0xa0] sm:$0xf]  ;;  %v6498_v29 = vld [vmem:[#allocation9 + $0xac] sm:$0xf0]  ;;  %v5758_v11 = vld [vmem:[#allocation9 + $0xb0] sm:$0xf0] }
 0x3ce   :  { %v2106_v23 = vmul.f32 %v6701_v0, %v2105_v5  ;;  %v2119_v17 = vmul.f32 %v2101_v62, %v7320_v34  ;;  %2660 = vmatpush.bf16.msrb.mxu1 %v5793_v31  ;;  %v5785_v2 = vor.u32 %v6501_v8, %v5782_v1  ;;  %v6496_v5 = vld [vmem:[#allocation9 + $0xa4] sm:$0xf]  ;;  %v5757_v3 = vor.u32 %v6498_v29, %v5756_v9  ;;  %v5764_v62 = vld [vmem:[#allocation9 + $0xa8] sm:$0xf]  ;;  %v6493_v36 = vld [vmem:[#allocation9 + $0x8c] sm:$0xf] }
 0x3cf   :  { %2673 = vmatpush.bf16.msrb.mxu2 %v5797_v59  ;;  %v5750_v15 = vld [vmem:[#allocation9 + $0x98] sm:$0xf0]  ;;  %v5724_v31 = vld [vmem:[#allocation9 + $0x60] sm:$0xf]  ;;  %v6490_v59 = vld [vmem:[#allocation9 + $0x6c] sm:$0xf0]  ;;  %v397_v26 = vadd.f32 %v7237_v37, %v7196_v12 }
 0x3d0   :  { %v7332_v28 = vadd.f32 %v2120_v13, %v2119_v17  ;;  %v2107_v10 = vadd.f32 %v6701_v0, %v2106_v23  ;;  %2687 = vmatpush.bf16.msrb.mxu3 %v5785_v2  ;;  %v6499_v13 = vld [vmem:[#allocation9 + $0xb4] sm:$0xf0]  ;;  %v5761_v23 = vor.u32 %v6496_v5, %v5758_v11  ;;  %2649 = vmatpush.bf16.msrb.mxu0 %v5757_v3  ;;  %v5726_v6 = vld [vmem:[#allocation9 + $0x70] sm:$0xf0]  ;;  %v5708_v29 = vld [vmem:[#allocation9 + $0x40] sm:$0xf] }
 0x3d1   :  { %v5765_v17 = vor.u32 %v6499_v13, %v5764_v62  ;;  %v5753_v56 = vor.u32 %v6493_v36, %v5750_v15  ;;  %v5725_v60 = vor.u32 %v6490_v59, %v5724_v31  ;;  %v5729_v52 = vor.u32 %v6488_v33, %v5726_v6  ;;  %v6486_v5 = vld [vmem:[#allocation9 + $0x4c] sm:$0xf0]  ;;  %v6484_v3 = vld [vmem:[#allocation9 + $0x44] sm:$0xf]  ;;  %v5710_v11 = vld [vmem:[#allocation9 + $0x50] sm:$0xf0] }
 0x3d2   :  { %6704 = vtanh.f32 %v7332_v28  ;;  %v2111_v25 = vsel %vm2110_vm10, %v6701_v0, %v2107_v10  ;;  %v6503_v0 = vld [vmem:[#allocation9 + $0xd4] sm:$0xf0]  ;;  %2661 = vmatpush.bf16.msrb.mxu1 %v5777_v53  ;;  %v6497_v10 = vld [vmem:[#allocation9 + $0xac] sm:$0xf]  ;;  %v5734_v53 = vld [vmem:[#allocation9 + $0x78] sm:$0xf0]  ;;  %v5709_v37 = vor.u32 %v6486_v5, %v5708_v29 }
 0x3d3   :  { %v2116_v32 = vsel %vm2113_vm11, %v2115_v30, %v2111_v25  ;;  %v5781_v38 = vor.u32 %v6503_v0, %v5780_v63  ;;  %v5769_v18 = vor.u32 %v6497_v10, %v5766_v19  ;;  %v5740_v25 = vld [vmem:[#allocation9 + $0x80] sm:$0xf]  ;;  %v6494_v30 = vld [vmem:[#allocation9 + $0x8c] sm:$0xf0]  ;;  %v5733_v63 = vor.u32 %v6491_v61, %v5732_v58  ;;  %v6489_v0 = vld [vmem:[#allocation9 + $0x6c] sm:$0xf] }
 0x3d4   :  { %v5737_v1 = vor.u32 %v6489_v0, %v5734_v53  ;;  %v5716_v62 = vld [vmem:[#allocation9 + $0x48] sm:$0xf]  ;;  %v6487_v39 = vld [vmem:[#allocation9 + $0x54] sm:$0xf0]  ;;  %v6485_v19 = vld [vmem:[#allocation9 + $0x4c] sm:$0xf] }
 0x3d5   :  { %2674 = vmatpush.bf16.msrb.mxu2 %v5781_v38  ;;  %2688 = vmatpush.bf16.msrb.mxu3 %v5769_v18  ;;  %v5717_v10 = vor.u32 %v6487_v39, %v5716_v62  ;;  %v5718_v18 = vld [vmem:[#allocation9 + $0x58] sm:$0xf0]  ;;  %v6483_v36 = vld [vmem:[#allocation9 + $0x34] sm:$0xf0]  ;;  %v6481_v15 = vld [vmem:[#allocation9 + $0x2c] sm:$0xf] }
 0x3d6   :  { %2662 = vmatpush.bf16.msrb.mxu1 %v5761_v23  ;;  %v5701_v33 = vor.u32 %v6483_v36, %v5700_v45  ;;  %v5676_v6 = vld [vmem:[#allocation9] sm:$0xf]  ;;  %v6478_v58 = vld [vmem:[#allocation9 + $0xc] sm:$0xf0]  ;;  %v6476_v61 = vld [vmem:[#allocation9 + $0x4] sm:$0xf] }
 0x3d7   :  { %v5678_v0 = vld [vmem:[#allocation9 + $0x10] sm:$0xf0]  ;;  %v6479_v53 = vld [vmem:[#allocation9 + $0x14] sm:$0xf0] }
 0x3d8   :  { %v6705_v27 = vpop.eup %6704 }
 0x3d9   :  { %v7335_v42 = vmul.f32 %v6705_v27, %v2116_v32  ;;  %2675 = vmatpush.bf16.msrb.mxu2 %v5765_v17  ;;  %v6492_v27 = vld [vmem:[#allocation9 + $0x84] sm:$0xf]  ;;  %v5741_v32 = vor.u32 %v6494_v30, %v5740_v25  ;;  %2689 = vmatpush.bf16.msrb.mxu3 %v5753_v56  ;;  %v5713_v17 = vor.u32 %v6484_v3, %v5710_v11  ;;  %v5692_v25 = vld [vmem:[#allocation9 + $0x20] sm:$0xf]  ;;  %v6482_v30 = vld [vmem:[#allocation9 + $0x2c] sm:$0xf0] }
 0x3da   :  { %v5702_v56 = vld [vmem:[#allocation9 + $0x38] sm:$0xf0] }
 0x3db   :  { %v2133_v34 = vpack.c.bf16 %v7335_v42, %v7335_v42  ;;  %2650 = vmatpush.bf16.msrb.mxu0 %v5741_v32  ;;  %v5693_v32 = vor.u32 %v6482_v30, %v5692_v25 }
 0x3dd   :  { %2334 = vmatmul.bf16.vlgmr.msra.gmra.mxu0 %v2133_v34  ;;  %2347 = vmatmul.bf16.vlgmr.msra.gmra.mxu1 %v2133_v34 }
 0x3de   :  { %2360 = vmatmul.bf16.vlgmr.msra.gmra.mxu2 %v2133_v34  ;;  %2373 = vmatmul.bf16.vlgmr.msra.gmra.mxu3 %v2133_v34  ;;  %v5742_v34 = vld [vmem:[#allocation9 + $0x90] sm:$0xf0] }
 0x3df   :  { %v5745_v16 = vor.u32 %v6492_v27, %v5742_v34  ;;  %2676 = vmatpush.bf16.msrb.mxu2 %v5749_v46  ;;  %2651 = vmatpush.bf16.msrb.mxu0 %v5725_v60  ;;  %v5721_v27 = vor.u32 %v6485_v19, %v5718_v18  ;;  %v6480_v34 = vld [vmem:[#allocation9 + $0x24] sm:$0xf]  ;;  %v5705_v60 = vor.u32 %v6481_v15, %v5702_v56 }
 0x3e0   :  { %2690 = vmatpush.bf16.msrb.mxu3 %v5737_v1  ;;  %v5697_v46 = vor.u32 %v6480_v34, %v5694_v35  ;;  %v6477_v1 = vld [vmem:[#allocation9 + $0xc] sm:$0xf] }
 0x3e1   :  { %2663 = vmatpush.bf16.msrb.mxu1 %v5745_v16  ;;  %v455_v16 = vadd.f32 %v7244_v43, %v7210_v20  ;;  %v5684_v43 = vld [vmem:[#allocation9 + $0x8] sm:$0xf] }
 0x3e3   :  { %2677 = vmatpush.bf16.msrb.mxu2 %v5733_v63  ;;  %2652 = vmatpush.bf16.msrb.mxu0 %v5709_v37  ;;  %v5677_v63 = vor.u32 %v6478_v58, %v5676_v6 }
 0x3e4   :  { %2691 = vmatpush.bf16.msrb.mxu3 %v5721_v27 }
 0x3e5   :  { %2664 = vmatpush.bf16.msrb.mxu1 %v5729_v52 }
 0x3e7   :  { %2678 = vmatpush.bf16.msrb.mxu2 %v5717_v10  ;;  %2653 = vmatpush.bf16.msrb.mxu0 %v5693_v32 }
 0x3e8   :  { %2692 = vmatpush.bf16.msrb.mxu3 %v5705_v60 }
 0x3e9   :  { %2665 = vmatpush.bf16.msrb.mxu1 %v5713_v17 }
 0x3eb   :  { %2679 = vmatpush.bf16.msrb.mxu2 %v5701_v33  ;;  %2654 = vmatpush.bf16.msrb.mxu0 %v5677_v63 }
 0x3ed   :  { %2666 = vmatpush.bf16.msrb.mxu1 %v5697_v46 }
 0x45a   :  { %v2335_v38 = vpop.f32.mrf.mxu0  ;;  %v2348_v8 = vpop.f32.mrf.mxu1 }
 0x45b   :  { %v2378_v2 = vadd.f32 %v2335_v38, %v397_v26  ;;  %v2379_v9 = vadd.f32 %v2348_v8, %v426_v55  ;;  %v5681_v38 = vor.u32 %v6476_v61, %v5678_v0  ;;  %v5685_v8 = vor.u32 %v6479_v53, %v5684_v43 }
 0x45d   :  { %v5671_v13 = vmul.f32 -1.442695, %v2378_v2  ;;  %v5672_v23 = vmul.f32 -1.442695, %v2379_v9  ;;  %v5686_v2 = vld [vmem:[#allocation9 + $0x18] sm:$0xf0]  ;;  %2667 = vmatpush.bf16.msrb.mxu1 %v5681_v38  ;;  %2680 = vmatpush.bf16.msrb.mxu2 %v5685_v8 }
 0x45e   :  { %v5689_v5 = vor.u32 %v6477_v1, %v5686_v2 }
 0x45f   :  { %6706 = vpow2.f32 %v5671_v13 }
 0x460   :  { %6708 = vpow2.f32 %v5672_v23  ;;  %2693 = vmatpush.bf16.msrb.mxu3 %v5689_v5  ;;  %v484_v23 = vadd.f32 %v7246_v48, %v7212_v21 }
 0x461   :  { %v2361_v31 = vpop.f32.mrf.mxu2  ;;  %v2374_v59 = vpop.f32.mrf.mxu3 }
 0x462   :  { %v2380_v26 = vadd.f32 %v2361_v31, %v455_v16  ;;  %v2337_v55 = vpop.f32.mrf.mxu0  ;;  %v2350_v52 = vpop.f32.mrf.mxu1  ;;  %v2381_v19 = vadd.f32 %v2374_v59, %v484_v23  ;;  %v6539_v23 = vld [vmem:[#allocation9 + $0xf4] sm:$0xf0] }
 0x464   :  { %v5673_v9 = vmul.f32 -1.442695, %v2380_v26 }
 0x465   :  { %v6707_v29 = vpop.eup %6706 }
 0x466   :  { %v6709_v3 = vpop.eup %6708  ;;  %v2391_v37 = vadd.f32 1.0, %v6707_v29  ;;  %6710 = vpow2.f32 %v5673_v9 }
 0x467   :  { %v2392_v11 = vadd.f32 1.0, %v6709_v3  ;;  %v5919_v3 = vld [vmem:[#allocation9 + $0xe0] sm:$0xf] }
 0x468   :  { %6712 = vrcp.f32 %v2391_v37  ;;  %v2405_v34 = vand.u32 2147483648, %v2391_v37  ;;  %v2403_v16 = vand.u32 2147483647, %v2391_v37  ;;  %vm2399_vm14 = vweird.f32 %v2391_v37 }
 0x469   :  { %6714 = vrcp.f32 %v2392_v11  ;;  %v2363_v62 = vpop.f32.mrf.mxu2  ;;  %v2376_v39 = vpop.f32.mrf.mxu3  ;;  %v2420_v35 = vand.u32 2147483648, %v2392_v11  ;;  %v2418_v36 = vand.u32 2147483647, %v2392_v11  ;;  %vm2414_vm15 = vweird.f32 %v2392_v11 }
 0x46a   :  { %v2406_v31 = vor.u32 1.1754944e-38, %v2405_v34  ;;  %vm2404_vm2 = vcmp.eq.f32.partialorder %v2403_v16, 8.507059e+37  ;;  %v5921_v39 = vld [vmem:[#allocation9 + $0xf0] sm:$0xf0]  ;;  %v6535_v16 = vld [vmem:[#allocation9 + $0xd4] sm:$0xf0] }
 0x46b   :  { %v2421_v33 = vor.u32 1.1754944e-38, %v2420_v35  ;;  %vm2419_vm3 = vcmp.eq.f32.partialorder %v2418_v36, 8.507059e+37  ;;  %v5905_v35 = vld [vmem:[#allocation9 + $0xd0] sm:$0xf0] }
 0x46c   :  { %v6711_v13 = vpop.eup %6710 }
 0x46d   :  { %v2393_v17 = vadd.f32 1.0, %v6711_v13  ;;  %v5927_v13 = vld [vmem:[#allocation9 + $0xe8] sm:$0xf] }
 0x46e   :  { %v6713_v10 = vpop.eup %6712 }
 0x46f   :  { %v6715_v18 = vpop.eup %6714  ;;  %v2395_v25 = vmul.f32 %v6713_v10, %v2391_v37  ;;  %6716 = vrcp.f32 %v2393_v17  ;;  %vm2400_vm12 = vweird.f32 %v6713_v10  ;;  %v2435_v38 = vand.u32 2147483648, %v2393_v17  ;;  %v6538_v37 = vld [vmem:[#allocation9 + $0xec] sm:$0xf0] }
 0x470   :  { %v2410_v30 = vmul.f32 %v6715_v18, %v2392_v11  ;;  %6718 = vtanh.f32 %v2381_v19  ;;  %vm2415_vm13 = vweird.f32 %v6715_v18  ;;  %vm2401_vm0 = vmor %vm2399_vm14, %vm2400_vm12  ;;  %vm2429_vm5 = vweird.f32 %v2393_v17  ;;  %v6536_v11 = vld [vmem:[#allocation9 + $0xe4] sm:$0xf]  ;;  %v6537_v19 = vld [vmem:[#allocation9 + $0xec] sm:$0xf] }
 0x471   :  { %v2396_v27 = vsub.f32 1.0, %v2395_v25  ;;  %vm2416_vm1 = vmor %vm2414_vm15, %vm2415_vm13  ;;  %v2433_v8 = vand.u32 2147483647, %v2393_v17  ;;  %v2436_v2 = vor.u32 1.1754944e-38, %v2435_v38  ;;  %v5920_v62 = vor.u32 %v6538_v37, %v5919_v3  ;;  %v6526_v38 = vld [vmem:[#allocation9 + $0x8c] sm:$0xf0] }
 0x472   :  { %v2411_v32 = vsub.f32 1.0, %v2410_v30  ;;  %v5903_v30 = vld [vmem:[#allocation9 + $0xc0] sm:$0xf]  ;;  %v6525_v37 = vld [vmem:[#allocation9 + $0x8c] sm:$0xf] }
 0x473   :  { %v2397_v45 = vmul.f32 %v6713_v10, %v2396_v27  ;;  %vm2434_vm7 = vcmp.eq.f32.partialorder %v2433_v8, 8.507059e+37  ;;  %2968 = vmatpush.bf16.msra.mxu0 %v5920_v62  ;;  %v6534_v27 = vld [vmem:[#allocation9 + $0xcc] sm:$0xf0]  ;;  %v6524_v8 = vld [vmem:[#allocation9 + $0x84] sm:$0xf] }
 0x474   :  { %v2412_v46 = vmul.f32 %v6715_v18, %v2411_v32  ;;  %v6532_v32 = vld [vmem:[#allocation9 + $0xc4] sm:$0xf]  ;;  %v5904_v34 = vor.u32 %v6534_v27, %v5903_v30  ;;  %v6521_v27 = vld [vmem:[#allocation9 + $0x6c] sm:$0xf] }
 0x475   :  { %v6717_v15 = vpop.eup %6716  ;;  %v2398_v48 = vadd.f32 %v6713_v10, %v2397_v45  ;;  %v5911_v45 = vld [vmem:[#allocation9 + $0xc8] sm:$0xf] }
 0x476   :  { %v2425_v56 = vmul.f32 %v6717_v15, %v2393_v17  ;;  %v2413_v59 = vadd.f32 %v6715_v18, %v2412_v46  ;;  %v6719_v6 = vpop.eup %6718  ;;  %vm2430_vm4 = vweird.f32 %v6717_v15  ;;  %v5924_v17 = vor.u32 %v6536_v11, %v5921_v39  ;;  %v5881_v11 = vld [vmem:[#allocation9 + $0x98] sm:$0xf0]  ;;  %v5855_v39 = vld [vmem:[#allocation9 + $0x60] sm:$0xf] }
 0x477   :  { %v2402_v60 = vsel %vm2401_vm0, %v6713_v10, %v2398_v48  ;;  %vm2431_vm6 = vmor %vm2429_vm5, %vm2430_vm4  ;;  %v5928_v10 = vor.u32 %v6539_v23, %v5927_v13  ;;  %v5908_v46 = vor.u32 %v6532_v32, %v5905_v35  ;;  %v5912_v36 = vor.u32 %v6535_v16, %v5911_v45  ;;  %v5913_v48 = vld [vmem:[#allocation9 + $0xd8] sm:$0xf0]  ;;  %2969 = vmatpush.bf16.msra.mxu0 %v5904_v34  ;;  %v6522_v13 = vld [vmem:[#allocation9 + $0x6c] sm:$0xf0] }
 0x478   :  { %v2426_v58 = vsub.f32 1.0, %v2425_v56  ;;  %v2407_v61 = vsel %vm2404_vm2, %v2406_v31, %v2402_v60  ;;  %v2417_v26 = vsel %vm2416_vm1, %v6715_v18, %v2413_v59  ;;  %v5929_v18 = vld [vmem:[#allocation9 + $0xf8] sm:$0xf0]  ;;  %2981 = vmatpush.bf16.msra.mxu1 %v5924_v17  ;;  %v5887_v31 = vld [vmem:[#allocation9 + $0xa0] sm:$0xf]  ;;  %v5884_v62 = vor.u32 %v6525_v37, %v5881_v11 }
 0x479   :  { %v2422_v55 = vsel %vm2419_vm3, %v2421_v33, %v2417_v26  ;;  %v2441_v52 = vmul.f32 %v6719_v6, %v2407_v61  ;;  %v5932_v25 = vor.u32 %v6537_v19, %v5929_v18  ;;  %2994 = vmatpush.bf16.msra.mxu2 %v5928_v10  ;;  %v6530_v59 = vld [vmem:[#allocation9 + $0xac] sm:$0xf0]  ;;  %v6528_v33 = vld [vmem:[#allocation9 + $0xa4] sm:$0xf]  ;;  %v5889_v6 = vld [vmem:[#allocation9 + $0xb0] sm:$0xf0]  ;;  %v5856_v17 = vor.u32 %v6522_v13, %v5855_v39 }
 0x47a   :  { %v2427_v63 = vmul.f32 %v6717_v15, %v2426_v58  ;;  %v2440_v0 = vmul.f32 %v2422_v55, %v7332_v28  ;;  %v5888_v60 = vor.u32 %v6530_v59, %v5887_v31  ;;  %v5895_v58 = vld [vmem:[#allocation9 + $0xa8] sm:$0xf]  ;;  %v6531_v61 = vld [vmem:[#allocation9 + $0xb4] sm:$0xf0]  ;;  %v5892_v26 = vor.u32 %v6528_v33, %v5889_v6  ;;  %v6520_v23 = vld [vmem:[#allocation9 + $0x64] sm:$0xf] }
 0x47b   :  { %3007 = vmatpush.bf16.msra.mxu3 %v5932_v25  ;;  %v5896_v55 = vor.u32 %v6531_v61, %v5895_v58  ;;  %v5857_v10 = vld [vmem:[#allocation9 + $0x70] sm:$0xf0]  ;;  %v5863_v19 = vld [vmem:[#allocation9 + $0x68] sm:$0xf]  ;;  %v6523_v18 = vld [vmem:[#allocation9 + $0x74] sm:$0xf0] }
 0x47c   :  { %v7348_v43 = vadd.f32 %v2441_v52, %v2440_v0  ;;  %v2428_v53 = vadd.f32 %v6717_v15, %v2427_v63  ;;  %2982 = vmatpush.bf16.msra.mxu1 %v5908_v46  ;;  %v6529_v52 = vld [vmem:[#allocation9 + $0xac] sm:$0xf]  ;;  %v5897_v63 = vld [vmem:[#allocation9 + $0xb8] sm:$0xf0]  ;;  %2970 = vmatpush.bf16.msra.mxu0 %v5888_v60  ;;  %v5860_v25 = vor.u32 %v6520_v23, %v5857_v10  ;;  %v5839_v35 = vld [vmem:[#allocation9 + $0x40] sm:$0xf] }
 0x47d   :  { %2995 = vmatpush.bf16.msra.mxu2 %v5912_v36  ;;  %v5900_v0 = vor.u32 %v6529_v52, %v5897_v63  ;;  %v5864_v30 = vor.u32 %v6523_v18, %v5863_v19  ;;  %v5865_v32 = vld [vmem:[#allocation9 + $0x78] sm:$0xf0]  ;;  %v6518_v45 = vld [vmem:[#allocation9 + $0x4c] sm:$0xf0]  ;;  %v6516_v16 = vld [vmem:[#allocation9 + $0x44] sm:$0xf] }
 0x47e   :  { %6720 = vtanh.f32 %v7348_v43  ;;  %v2432_v1 = vsel %vm2431_vm6, %v6717_v15, %v2428_v53  ;;  %v6533_v15 = vld [vmem:[#allocation9 + $0xcc] sm:$0xf]  ;;  %v5871_v53 = vld [vmem:[#allocation9 + $0x80] sm:$0xf]  ;;  %v5868_v34 = vor.u32 %v6521_v27, %v5865_v32  ;;  %v5840_v46 = vor.u32 %v6518_v45, %v5839_v35  ;;  %v5841_v36 = vld [vmem:[#allocation9 + $0x50] sm:$0xf0] }
 0x47f   :  { %v2437_v29 = vsel %vm2434_vm7, %v2436_v2, %v2432_v1  ;;  %v5916_v56 = vor.u32 %v6533_v15, %v5913_v48  ;;  %v5872_v1 = vor.u32 %v6526_v38, %v5871_v53  ;;  %v5873_v2 = vld [vmem:[#allocation9 + $0x90] sm:$0xf0]  ;;  %v5847_v15 = vld [vmem:[#allocation9 + $0x48] sm:$0xf]  ;;  %v6519_v48 = vld [vmem:[#allocation9 + $0x54] sm:$0xf0] }
 0x480   :  { %2983 = vmatpush.bf16.msra.mxu1 %v5892_v26  ;;  %v5848_v31 = vor.u32 %v6519_v48, %v5847_v15  ;;  %v6517_v59 = vld [vmem:[#allocation9 + $0x4c] sm:$0xf]  ;;  %v5849_v33 = vld [vmem:[#allocation9 + $0x58] sm:$0xf0]  ;;  %v5823_v6 = vld [vmem:[#allocation9 + $0x20] sm:$0xf] }
 0x481   :  { %3008 = vmatpush.bf16.msra.mxu3 %v5916_v56  ;;  %2996 = vmatpush.bf16.msra.mxu2 %v5896_v55  ;;  %v5844_v56 = vor.u32 %v6516_v16, %v5841_v36  ;;  %v5852_v60 = vor.u32 %v6517_v59, %v5849_v33  ;;  %v6514_v58 = vld [vmem:[#allocation9 + $0x2c] sm:$0xf0]  ;;  %v6512_v61 = vld [vmem:[#allocation9 + $0x24] sm:$0xf]  ;;  %v5825_v55 = vld [vmem:[#allocation9 + $0x30] sm:$0xf0] }
 0x482   :  { %2971 = vmatpush.bf16.msra.mxu0 %v5872_v1  ;;  %v5824_v26 = vor.u32 %v6514_v58, %v5823_v6  ;;  %v5831_v52 = vld [vmem:[#allocation9 + $0x28] sm:$0xf]  ;;  %v6515_v63 = vld [vmem:[#allocation9 + $0x34] sm:$0xf0]  ;;  %v6513_v38 = vld [vmem:[#allocation9 + $0x2c] sm:$0xf] }
 0x483   :  { %v5832_v53 = vor.u32 %v6515_v63, %v5831_v52  ;;  %v5815_v37 = vld [vmem:[#allocation9 + $0x8] sm:$0xf]  ;;  %v6511_v11 = vld [vmem:[#allocation9 + $0x14] sm:$0xf0]  ;;  %v6509_v13 = vld [vmem:[#allocation9 + $0xc] sm:$0xf] }
 0x484   :  { %v6721_v9 = vpop.eup %6720  ;;  %v5816_v39 = vor.u32 %v6511_v11, %v5815_v37  ;;  %v5817_v23 = vld [vmem:[#allocation9 + $0x18] sm:$0xf0]  ;;  %v6570_v19 = vld [vmem:[#allocation12 + $0xec] sm:$0xf0]  ;;  %v6568_v18 = vld [vmem:[#allocation12 + $0xe4] sm:$0xf] }
 0x485   :  { %v7351_v5 = vmul.f32 %v6721_v9, %v2437_v29  ;;  %3009 = vmatpush.bf16.msra.mxu3 %v5900_v0  ;;  %v5879_v9 = vld [vmem:[#allocation9 + $0x88] sm:$0xf]  ;;  %v6527_v29 = vld [vmem:[#allocation9 + $0x94] sm:$0xf0]  ;;  %v5828_v0 = vor.u32 %v6512_v61, %v5825_v55  ;;  %v5820_v10 = vor.u32 %v6509_v13, %v5817_v23  ;;  %v6058_v35 = vld [vmem:[#allocation12 + $0xe8] sm:$0xf] }
 0x486   :  { %v5880_v3 = vor.u32 %v6527_v29, %v5879_v9  ;;  %2972 = vmatpush.bf16.msra.mxu0 %v5856_v17  ;;  %v6510_v9 = vld [vmem:[#allocation9 + $0xc] sm:$0xf0]  ;;  %v6508_v29 = vld [vmem:[#allocation9 + $0x4] sm:$0xf]  ;;  %v6571_v45 = vld [vmem:[#allocation12 + $0xf4] sm:$0xf0] }
 0x487   :  { %v2454_v28 = vpack.c.bf16 %v7351_v5, %v7351_v5  ;;  %v6050_v17 = vld [vmem:[#allocation12 + $0xe0] sm:$0xf]  ;;  %v6569_v16 = vld [vmem:[#allocation12 + $0xec] sm:$0xf]  ;;  %v6059_v15 = vor.u32 %v6571_v45, %v6058_v35  ;;  %v6060_v48 = vld [vmem:[#allocation12 + $0xf8] sm:$0xf0] }
 0x488   :  { %2997 = vmatpush.bf16.msra.mxu2 %v5880_v3  ;;  %v5809_v3 = vld [vmem:[#allocation9 + $0x10] sm:$0xf0]  ;;  %v6051_v32 = vor.u32 %v6570_v19, %v6050_v17  ;;  %v6063_v59 = vor.u32 %v6569_v16, %v6060_v48  ;;  %v6036_v6 = vld [vmem:[#allocation12 + $0xd0] sm:$0xf0]  ;;  %v6042_v58 = vld [vmem:[#allocation12 + $0xc8] sm:$0xf] }
 0x489   :  { %2655 = vmatmul.bf16.vlgmr.msrb.gmra.mxu0 %v2454_v28  ;;  %2668 = vmatmul.bf16.vlgmr.msrb.gmra.mxu1 %v2454_v28  ;;  %v6567_v52 = vld [vmem:[#allocation12 + $0xd4] sm:$0xf0]  ;;  %v6044_v63 = vld [vmem:[#allocation12 + $0xd8] sm:$0xf0]  ;;  %v6002_v13 = vld [vmem:[#allocation12 + $0x80] sm:$0xf] }
 0x48a   :  { %2681 = vmatmul.bf16.vlgmr.msrb.gmra.mxu2 %v2454_v28  ;;  %2694 = vmatmul.bf16.vlgmr.msrb.gmra.mxu3 %v2454_v28  ;;  %v5876_v28 = vor.u32 %v6524_v8, %v5873_v2  ;;  %v5833_v8 = vld [vmem:[#allocation9 + $0x38] sm:$0xf0]  ;;  %v5807_v2 = vld [vmem:[#allocation9] sm:$0xf]  ;;  %v6558_v23 = vld [vmem:[#allocation12 + $0x8c] sm:$0xf0] }
 0x48b   :  { %3010 = vmatpush.bf16.msra.mxu3 %v5884_v62  ;;  %2973 = vmatpush.bf16.msra.mxu0 %v5840_v46  ;;  %v5836_v1 = vor.u32 %v6513_v38, %v5833_v8  ;;  %v5812_v62 = vor.u32 %v6508_v29, %v5809_v3  ;;  %v6562_v38 = vld [vmem:[#allocation12 + $0xac] sm:$0xf0]  ;;  %v6560_v8 = vld [vmem:[#allocation12 + $0xa4] sm:$0xf]  ;;  %v6026_v29 = vld [vmem:[#allocation12 + $0xa8] sm:$0xf]  ;;  %v6003_v16 = vor.u32 %v6558_v23, %v6002_v13 }
 0x48c   :  { %2984 = vmatpush.bf16.msra.mxu1 %v5876_v28  ;;  %2998 = vmatpush.bf16.msra.mxu2 %v5864_v30  ;;  %v5808_v28 = vor.u32 %v6510_v9, %v5807_v2  ;;  %v6561_v3 = vld [vmem:[#allocation12 + $0xac] sm:$0xf]  ;;  %v6012_v35 = vld [vmem:[#allocation12 + $0x98] sm:$0xf0]  ;;  %v6551_v13 = vld [vmem:[#allocation12 + $0x54] sm:$0xf0] }
 0x48f   :  { %3011 = vmatpush.bf16.msra.mxu3 %v5868_v34  ;;  %2974 = vmatpush.bf16.msra.mxu0 %v5824_v26 }
 0x490   :  { %2985 = vmatpush.bf16.msra.mxu1 %v5860_v25  ;;  %2999 = vmatpush.bf16.msra.mxu2 %v5848_v31  ;;  %v6052_v25 = vld [vmem:[#allocation12 + $0xf0] sm:$0xf0]  ;;  %v6566_v31 = vld [vmem:[#allocation12 + $0xcc] sm:$0xf0] }
 0x491   :  { %v6055_v34 = vor.u32 %v6568_v18, %v6052_v25  ;;  %v6556_v25 = vld [vmem:[#allocation12 + $0x84] sm:$0xf] }
 0x493   :  { %3012 = vmatpush.bf16.msra.mxu3 %v5852_v60  ;;  %2975 = vmatpush.bf16.msra.mxu0 %v5808_v28  ;;  %v6564_v60 = vld [vmem:[#allocation12 + $0xc4] sm:$0xf]  ;;  %v6563_v28 = vld [vmem:[#allocation12 + $0xb4] sm:$0xf0] }
 0x494   :  { %2986 = vmatpush.bf16.msra.mxu1 %v5844_v56  ;;  %3000 = vmatpush.bf16.msra.mxu2 %v5832_v53  ;;  %v6034_v56 = vld [vmem:[#allocation12 + $0xc0] sm:$0xf]  ;;  %v6039_v55 = vor.u32 %v6564_v60, %v6036_v6  ;;  %v6554_v6 = vld [vmem:[#allocation12 + $0x6c] sm:$0xf0] }
 0x495   :  { %v6035_v33 = vor.u32 %v6566_v31, %v6034_v56 }
 0x497   :  { %3013 = vmatpush.bf16.msra.mxu3 %v5836_v1  ;;  %3303 = vmatpush.bf16.msrb.mxu0 %v6051_v32  ;;  %v6020_v1 = vld [vmem:[#allocation12 + $0xb0] sm:$0xf0]  ;;  %v6559_v32 = vld [vmem:[#allocation12 + $0x94] sm:$0xf0] }
 0x498   :  { %2987 = vmatpush.bf16.msra.mxu1 %v5828_v0  ;;  %3001 = vmatpush.bf16.msra.mxu2 %v5816_v39  ;;  %v6018_v0 = vld [vmem:[#allocation12 + $0xa0] sm:$0xf]  ;;  %v6023_v9 = vor.u32 %v6560_v8, %v6020_v1  ;;  %v6028_v39 = vld [vmem:[#allocation12 + $0xb8] sm:$0xf0] }
 0x499   :  { %v6019_v2 = vor.u32 %v6562_v38, %v6018_v0  ;;  %v6031_v18 = vor.u32 %v6561_v3, %v6028_v39  ;;  %v6553_v38 = vld [vmem:[#allocation12 + $0x6c] sm:$0xf]  ;;  %v5996_v8 = vld [vmem:[#allocation12 + $0x78] sm:$0xf0]  ;;  %v5970_v1 = vld [vmem:[#allocation12 + $0x40] sm:$0xf] }
 0x49a   :  { %v5978_v39 = vld [vmem:[#allocation12 + $0x48] sm:$0xf] }
 0x49b   :  { %3014 = vmatpush.bf16.msra.mxu3 %v5820_v10  ;;  %3304 = vmatpush.bf16.msrb.mxu0 %v6035_v33 }
 0x49c   :  { %2988 = vmatpush.bf16.msra.mxu1 %v5812_v62  ;;  %3361 = vmatpush.bf16.msrb.mxu2 %v6059_v15  ;;  %v6027_v62 = vor.u32 %v6563_v28, %v6026_v29  ;;  %v6550_v29 = vld [vmem:[#allocation12 + $0x4c] sm:$0xf0]  ;;  %v6548_v28 = vld [vmem:[#allocation12 + $0x44] sm:$0xf] }
 0x49f   :  { %3390 = vmatpush.bf16.msrb.mxu3 %v6063_v59  ;;  %3305 = vmatpush.bf16.msrb.mxu0 %v6019_v2  ;;  %v5986_v59 = vld [vmem:[#allocation12 + $0x60] sm:$0xf] }
 0x4a0   :  { %3332 = vmatpush.bf16.msrb.mxu1 %v6055_v34  ;;  %v6557_v34 = vld [vmem:[#allocation12 + $0x8c] sm:$0xf] }
 0x4a1   :  { %v6015_v56 = vor.u32 %v6557_v34, %v6012_v35  ;;  %v5979_v34 = vor.u32 %v6551_v13, %v5978_v39  ;;  %v6541_v39 = vld [vmem:[#allocation12 + $0xc] sm:$0xf]  ;;  %v5948_v13 = vld [vmem:[#allocation12 + $0x18] sm:$0xf0] }
 0x4a3   :  { %3306 = vmatpush.bf16.msrb.mxu0 %v6003_v16  ;;  %v5956_v16 = vld [vmem:[#allocation12 + $0x30] sm:$0xf0] }
 0x4a4   :  { %3333 = vmatpush.bf16.msrb.mxu1 %v6039_v55 }
 0x4a8   :  { %3334 = vmatpush.bf16.msrb.mxu1 %v6023_v9  ;;  %v5999_v9 = vor.u32 %v6553_v38, %v5996_v8  ;;  %v5940_v38 = vld [vmem:[#allocation12 + $0x10] sm:$0xf0]  ;;  %v5946_v8 = vld [vmem:[#allocation12 + $0x8] sm:$0xf] }
 0x506   :  { %v2656_v30 = vpop.f32.mrf.mxu0  ;;  %v2669_v27 = vpop.f32.mrf.mxu1 }
 0x507   :  { %v2699_v46 = vadd.f32 %v2656_v30, %v7249_v54  ;;  %v2700_v36 = vadd.f32 %v2669_v27, %v7252_v57  ;;  %v6043_v54 = vor.u32 %v6567_v52, %v6042_v58  ;;  %v6565_v57 = vld [vmem:[#allocation12 + $0xcc] sm:$0xf]  ;;  %v6004_v30 = vld [vmem:[#allocation12 + $0x90] sm:$0xf0]  ;;  %v6010_v27 = vld [vmem:[#allocation12 + $0x88] sm:$0xf]  ;;  %v5987_v58 = vor.u32 %v6554_v6, %v5986_v59 }
 0x508   :  { %v6047_v53 = vor.u32 %v6565_v57, %v6044_v63  ;;  %v6011_v15 = vor.u32 %v6559_v32, %v6010_v27  ;;  %v6555_v57 = vld [vmem:[#allocation12 + $0x74] sm:$0xf0]  ;;  %v6545_v6 = vld [vmem:[#allocation12 + $0x2c] sm:$0xf] }
 0x509   :  { %v5802_v61 = vmul.f32 -1.442695, %v2699_v46  ;;  %v5803_v26 = vmul.f32 -1.442695, %v2700_v36  ;;  %3362 = vmatpush.bf16.msrb.mxu2 %v6043_v54  ;;  %v6007_v46 = vor.u32 %v6556_v25, %v6004_v30  ;;  %v5994_v54 = vld [vmem:[#allocation12 + $0x68] sm:$0xf]  ;;  %3307 = vmatpush.bf16.msrb.mxu0 %v5987_v58 }
 0x50a   :  { %3391 = vmatpush.bf16.msrb.mxu3 %v6047_v53  ;;  %v5995_v53 = vor.u32 %v6555_v57, %v5994_v54  ;;  %v6546_v30 = vld [vmem:[#allocation12 + $0x2c] sm:$0xf0]  ;;  %v5964_v58 = vld [vmem:[#allocation12 + $0x38] sm:$0xf0]  ;;  %v6540_v57 = vld [vmem:[#allocation12 + $0x4] sm:$0xf] }
 0x50b   :  { %6722 = vpow2.f32 %v5802_v61  ;;  %3335 = vmatpush.bf16.msrb.mxu1 %v6007_v46  ;;  %v6552_v61 = vld [vmem:[#allocation12 + $0x64] sm:$0xf]  ;;  %v6542_v54 = vld [vmem:[#allocation12 + $0xc] sm:$0xf0] }
 0x50c   :  { %6724 = vpow2.f32 %v5803_v26  ;;  %v5988_v26 = vld [vmem:[#allocation12 + $0x70] sm:$0xf0] }
 0x50d   :  { %v2682_v37 = vpop.f32.mrf.mxu2  ;;  %v2695_v11 = vpop.f32.mrf.mxu3  ;;  %3363 = vmatpush.bf16.msrb.mxu2 %v6027_v62  ;;  %v5991_v52 = vor.u32 %v6552_v61, %v5988_v26  ;;  %v5972_v62 = vld [vmem:[#allocation12 + $0x50] sm:$0xf0] }
 0x50e   :  { %v2701_v17 = vadd.f32 %v2682_v37, %v7255_v41  ;;  %v2658_v10 = vpop.f32.mrf.mxu0  ;;  %v2671_v19 = vpop.f32.mrf.mxu1  ;;  %3392 = vmatpush.bf16.msrb.mxu3 %v6031_v18  ;;  %v2702_v0 = vadd.f32 %v2695_v11, %v7260_v50  ;;  %v5971_v37 = vor.u32 %v6550_v29, %v5970_v1  ;;  %v6549_v11 = vld [vmem:[#allocation12 + $0x4c] sm:$0xf]  ;;  %v5975_v32 = vor.u32 %v6548_v28, %v5972_v62  ;;  %v6543_v1 = vld [vmem:[#allocation12 + $0x14] sm:$0xf0] }
 0x50f   :  { %3336 = vmatpush.bf16.msrb.mxu1 %v5991_v52  ;;  %v5954_v10 = vld [vmem:[#allocation12 + $0x20] sm:$0xf] }
 0x510   :  { %v5804_v45 = vmul.f32 -1.442695, %v2701_v17  ;;  %v5980_v17 = vld [vmem:[#allocation12 + $0x58] sm:$0xf0]  ;;  %3308 = vmatpush.bf16.msrb.mxu0 %v5971_v37  ;;  %v5938_v52 = vld [vmem:[#allocation12] sm:$0xf] }
 0x511   :  { %v6723_v36 = vpop.eup %6722  ;;  %3364 = vmatpush.bf16.msrb.mxu2 %v6011_v15  ;;  %v5983_v35 = vor.u32 %v6549_v11, %v5980_v17  ;;  %v5947_v11 = vor.u32 %v6543_v1, %v5946_v8  ;;  %v6164_v8 = vld [vmem:[#allocation13 + $0xd0] sm:$0xf0]  ;;  %v6170_v1 = vld [vmem:[#allocation13 + $0xc8] sm:$0xf] }
 0x512   :  { %v6725_v48 = vpop.eup %6724  ;;  %v7358_v41 = vadd.f32 1.0, %v6723_v36  ;;  %6726 = vpow2.f32 %v5804_v45  ;;  %3393 = vmatpush.bf16.msrb.mxu3 %v6015_v56  ;;  %v6544_v45 = vld [vmem:[#allocation12 + $0x24] sm:$0xf]  ;;  %v5962_v56 = vld [vmem:[#allocation12 + $0x28] sm:$0xf] }
 0x513   :  { %v7360_v31 = vadd.f32 1.0, %v6725_v48  ;;  %v5955_v48 = vor.u32 %v6546_v30, %v5954_v10  ;;  %3337 = vmatpush.bf16.msrb.mxu1 %v5975_v32 }
 0x514   :  { %6728 = vrcp.f32 %v7358_v41  ;;  %v2724_v55 = vand.u32 2147483647, %v7358_v41  ;;  %v2726_v25 = vand.u32 2147483648, %v7358_v41  ;;  %vm2720_vm12 = vweird.f32 %v7358_v41 }
 0x515   :  { %6730 = vrcp.f32 %v7360_v31  ;;  %v2684_v33 = vpop.f32.mrf.mxu2  ;;  %v2697_v60 = vpop.f32.mrf.mxu3  ;;  %3365 = vmatpush.bf16.msrb.mxu2 %v5995_v53  ;;  %v2741_v18 = vand.u32 2147483648, %v7360_v31  ;;  %v2739_v15 = vand.u32 2147483647, %v7360_v31  ;;  %3309 = vmatpush.bf16.msrb.mxu0 %v5955_v48  ;;  %vm2735_vm11 = vweird.f32 %v7360_v31  ;;  %v6602_v48 = vld [vmem:[#allocation13 + $0xec] sm:$0xf0] }
 0x516   :  { %3394 = vmatpush.bf16.msrb.mxu3 %v5999_v9  ;;  %vm7379_vm8 = vcmp.eq.f32.partialorder %v2724_v55, 8.507059e+37  ;;  %v5959_v33 = vor.u32 %v6544_v45, %v5956_v16  ;;  %v6547_v60 = vld [vmem:[#allocation12 + $0x34] sm:$0xf0]  ;;  %v5967_v55 = vor.u32 %v6545_v6, %v5964_v58  ;;  %v5939_v53 = vor.u32 %v6542_v54, %v5938_v52 }
 0x517   :  { %v5963_v26 = vor.u32 %v6547_v60, %v5962_v56  ;;  %v2742_v29 = vor.u32 1.1754944e-38, %v2741_v18  ;;  %v2727_v37 = vor.u32 1.1754944e-38, %v2726_v25  ;;  %vm2740_vm15 = vcmp.eq.f32.partialorder %v2739_v15, 8.507059e+37  ;;  %v6600_v56 = vld [vmem:[#allocation13 + $0xe4] sm:$0xf] }
 0x518   :  { %v6727_v63 = vpop.eup %6726  ;;  %3338 = vmatpush.bf16.msrb.mxu1 %v5959_v33  ;;  %v5951_v18 = vor.u32 %v6541_v39, %v5948_v13  ;;  %v3097_v15 = vpack.c.bf16 %v7295_v47, %v7279_v7  ;;  %v6180_v33 = vld [vmem:[#allocation13 + $0xf0] sm:$0xf0]  ;;  %v3098_v6 = vpack.c.bf16 %v7323_v49, %v7307_v24  ;;  %v3099_v7 = vpack.c.bf16 %v7351_v5, %v7335_v42  ;;  %v6186_v47 = vld [vmem:[#allocation13 + $0xe8] sm:$0xf]  ;;  %v6603_v58 = vld [vmem:[#allocation13 + $0xf4] sm:$0xf0] }
 0x519   :  { %v7366_v2 = vadd.f32 1.0, %v6727_v63  ;;  %3366 = vmatpush.bf16.msrb.mxu2 %v5979_v34  ;;  %3310 = vmatpush.bf16.msrb.mxu0 %v5939_v53  ;;  %v7418_v60 = vor.u32 %v6600_v56, %v6180_v33  ;;  %v402_v49 = vadd.f32 %v7257_v44, %v7196_v12  ;;  %v431_v42 = vadd.f32 %v7262_v51, %v7200_v14  ;;  %v6596_v53 = vld [vmem:[#allocation13 + $0xc4] sm:$0xf]  ;;  %v6597_v14 = vld [vmem:[#allocation13 + $0xcc] sm:$0xf] }
 0x51a   :  { %v7368_v3 = vpop.eup %6728  ;;  %3395 = vmatpush.bf16.msrb.mxu3 %v5983_v35  ;;  %v7438_v12 = vor.u32 %v6596_v53, %v6164_v8  ;;  %v6146_v51 = vld [vmem:[#allocation13 + $0xa0] sm:$0xf]  ;;  %v6148_v13 = vld [vmem:[#allocation13 + $0xb0] sm:$0xf0]  ;;  %v6586_v56 = vld [vmem:[#allocation13 + $0x6c] sm:$0xf0] }
 0x51b   :  { %v7370_v23 = vpop.eup %6730  ;;  %v2716_v50 = vmul.f32 %v7368_v3, %v7358_v41  ;;  %6732 = vrcp.f32 %v7366_v2  ;;  %vm2721_vm9 = vweird.f32 %v7368_v3  ;;  %v2756_v34 = vand.u32 2147483648, %v7366_v2  ;;  %v6584_v33 = vld [vmem:[#allocation13 + $0x64] sm:$0xf]  ;;  %v6098_v53 = vld [vmem:[#allocation13 + $0x40] sm:$0xf] }
 0x51c   :  { %v2731_v19 = vmul.f32 %v7370_v23, %v7360_v31  ;;  %6734 = vtanh.f32 %v2702_v0  ;;  %vm2736_vm10 = vweird.f32 %v7370_v23  ;;  %vm2722_vm13 = vmor %vm2720_vm12, %vm2721_vm9  ;;  %vm2750_vm1 = vweird.f32 %v7366_v2  ;;  %v6582_v8 = vld [vmem:[#allocation13 + $0x4c] sm:$0xf0] }
 0x51d   :  { %v2717_v27 = vsub.f32 1.0, %v2716_v50  ;;  %vm2737_vm14 = vmor %vm2735_vm11, %vm2736_vm10  ;;  %3367 = vmatpush.bf16.msrb.mxu2 %v5963_v26  ;;  %v5943_v50 = vor.u32 %v6540_v57, %v5940_v38  ;;  %v2757_v45 = vor.u32 1.1754944e-38, %v2756_v34  ;;  %v6601_v26 = vld [vmem:[#allocation13 + $0xec] sm:$0xf]  ;;  %v6132_v34 = vld [vmem:[#allocation13 + $0x90] sm:$0xf0] }
 0x51e   :  { %v2732_v46 = vsub.f32 1.0, %v2731_v19  ;;  %3396 = vmatpush.bf16.msrb.mxu3 %v5967_v55  ;;  %v6188_v55 = vld [vmem:[#allocation13 + $0xf8] sm:$0xf0] }
 0x51f   :  { %v2718_v59 = vmul.f32 %v7368_v3, %v2717_v27  ;;  %3339 = vmatpush.bf16.msrb.mxu1 %v5943_v50  ;;  %v7429_v24 = vor.u32 %v6601_v26, %v6188_v55  ;;  %v6595_v50 = vld [vmem:[#allocation13 + $0xb4] sm:$0xf0] }
 0x520   :  { %v2733_v61 = vmul.f32 %v7370_v23, %v2732_v46  ;;  %v6587_v55 = vld [vmem:[#allocation13 + $0x74] sm:$0xf0] }
 0x521   :  { %v6733_v63 = vpop.eup %6732  ;;  %v2719_v0 = vadd.f32 %v7368_v3, %v2718_v59  ;;  %3368 = vmatpush.bf16.msrb.mxu2 %v5947_v11  ;;  %v460_v11 = vadd.f32 %v7266_v22, %v7210_v20  ;;  %v6591_v22 = vld [vmem:[#allocation13 + $0x94] sm:$0xf0] }
 0x522   :  { %v6735_v9 = vpop.eup %6734  ;;  %v2746_v28 = vmul.f32 %v6733_v63, %v7366_v2  ;;  %v2734_v62 = vadd.f32 %v7370_v23, %v2733_v61  ;;  %3397 = vmatpush.bf16.msrb.mxu3 %v5951_v18  ;;  %vm2751_vm0 = vweird.f32 %v6733_v63  ;;  %v7426_v61 = vor.u32 %v6603_v58, %v6186_v47  ;;  %v6130_v18 = vld [vmem:[#allocation13 + $0x80] sm:$0xf]  ;;  %v6116_v47 = vld [vmem:[#allocation13 + $0x70] sm:$0xf0]  ;;  %v6122_v58 = vld [vmem:[#allocation13 + $0x68] sm:$0xf] }
 0x523   :  { %v2723_v41 = vsel %vm2722_vm13, %v7368_v3, %v2719_v0  ;;  %vm2752_vm2 = vmor %vm2750_vm1, %vm2751_vm0  ;;  %v6598_v0 = vld [vmem:[#allocation13 + $0xcc] sm:$0xf0] }
 0x524   :  { %v2747_v17 = vsub.f32 1.0, %v2746_v28  ;;  %v2728_v10 = vsel %vm7379_vm8, %v2727_v37, %v2723_v41  ;;  %v2738_v19 = vsel %vm2737_vm14, %v7370_v23, %v2734_v62  ;;  %v2754_v23 = vand.u32 2147483647, %v7366_v2  ;;  %v6178_v2 = vld [vmem:[#allocation13 + $0xe0] sm:$0xf] }
 0x525   :  { %v2743_v25 = vsel %vm2740_vm15, %v2742_v29, %v2738_v19  ;;  %v2762_v30 = vmul.f32 %v6735_v9, %v2728_v10  ;;  %v7416_v59 = vor.u32 %v6602_v48, %v6178_v2  ;;  %v6599_v9 = vld [vmem:[#allocation13 + $0xd4] sm:$0xf0]  ;;  %v6594_v37 = vld [vmem:[#allocation13 + $0xac] sm:$0xf0]  ;;  %v6592_v62 = vld [vmem:[#allocation13 + $0xa4] sm:$0xf] }
 0x526   :  { %v2748_v31 = vmul.f32 %v6733_v63, %v2747_v17  ;;  %v2761_v27 = vmul.f32 %v2743_v25, %v7348_v43  ;;  %vm2755_vm3 = vcmp.eq.f32.partialorder %v2754_v23, 8.507059e+37  ;;  %v7440_v44 = vor.u32 %v6599_v9, %v6170_v1  ;;  %v6154_v41 = vld [vmem:[#allocation13 + $0xa8] sm:$0xf]  ;;  %v6172_v19 = vld [vmem:[#allocation13 + $0xd8] sm:$0xf0] }
 0x527   :  { %v7445_v39 = vor.u32 %v6594_v37, %v6146_v51  ;;  %v7449_v17 = vor.u32 %v6592_v62, %v6148_v13  ;;  %v7451_v10 = vor.u32 %v6595_v50, %v6154_v41  ;;  %v6590_v25 = vld [vmem:[#allocation13 + $0x8c] sm:$0xf0]  ;;  %v6138_v23 = vld [vmem:[#allocation13 + $0x88] sm:$0xf]  ;;  %v6114_v48 = vld [vmem:[#allocation13 + $0x60] sm:$0xf]  ;;  %v7488_v62 = vor.u32 %v6582_v8, %v6098_v53 }
 0x528   :  { %v7404_v3 = vadd.f32 %v2762_v30, %v2761_v27  ;;  %v2749_v32 = vadd.f32 %v6733_v63, %v2748_v31  ;;  %v7455_v27 = vor.u32 %v6597_v14, %v6172_v19  ;;  %v7458_v20 = vor.u32 %v6590_v25, %v6130_v18  ;;  %v6580_v9 = vld [vmem:[#allocation13 + $0x44] sm:$0xf]  ;;  %v6583_v37 = vld [vmem:[#allocation13 + $0x54] sm:$0xf0]  ;;  %v6585_v13 = vld [vmem:[#allocation13 + $0x6c] sm:$0xf] }
 0x529   :  { %v7464_v2 = vor.u32 %v6591_v22, %v6138_v23  ;;  %v6124_v41 = vld [vmem:[#allocation13 + $0x78] sm:$0xf0]  ;;  %v6082_v19 = vld [vmem:[#allocation13 + $0x20] sm:$0xf]  ;;  %v6578_v18 = vld [vmem:[#allocation13 + $0x2c] sm:$0xf0] }
 0x52a   :  { %6736 = vtanh.f32 %v7404_v3  ;;  %v2753_v35 = vsel %vm2752_vm2, %v6733_v63, %v2749_v32  ;;  %v6162_v63 = vld [vmem:[#allocation13 + $0xc0] sm:$0xf]  ;;  %v6588_v32 = vld [vmem:[#allocation13 + $0x84] sm:$0xf]  ;;  %v6084_v23 = vld [vmem:[#allocation13 + $0x30] sm:$0xf0] }
 0x52b   :  { %v2758_v16 = vsel %vm2755_vm3, %v2757_v45, %v2753_v35  ;;  %v7436_v38 = vor.u32 %v6598_v0, %v6162_v63  ;;  %v7478_v63 = vor.u32 %v6584_v33, %v6116_v47  ;;  %v7480_v0 = vor.u32 %v6587_v55, %v6122_v58  ;;  %v6066_v8 = vld [vmem:[#allocation13] sm:$0xf] }
 0x530   :  { %v6737_v43 = vpop.eup %6736 }
 0x531   :  { %v7410_v46 = vmul.f32 %v6737_v43, %v2758_v16  ;;  %v6593_v16 = vld [vmem:[#allocation13 + $0xac] sm:$0xf] }
 0x533   :  { %v2775_v36 = vpack.c.bf16 %v7410_v46, %v7410_v46 }
 0x535   :  { %2976 = vmatmul.bf16.vlgmr.msra.gmra.mxu0 %v2775_v36  ;;  %2989 = vmatmul.bf16.vlgmr.msra.gmra.mxu1 %v2775_v36 }
 0x536   :  { %3002 = vmatmul.bf16.vlgmr.msra.gmra.mxu2 %v2775_v36  ;;  %3015 = vmatmul.bf16.vlgmr.msra.gmra.mxu3 %v2775_v36  ;;  %v6156_v36 = vld [vmem:[#allocation13 + $0xb8] sm:$0xf0] }
 0x537   :  { %3647 = vmatpush.bf16.msra.mxu0 %v7416_v59  ;;  %3660 = vmatpush.bf16.msra.mxu1 %v7418_v60 }
 0x538   :  { %3673 = vmatpush.bf16.msra.mxu2 %v7426_v61  ;;  %3686 = vmatpush.bf16.msra.mxu3 %v7429_v24 }
 0x53b   :  { %3648 = vmatpush.bf16.msra.mxu0 %v7436_v38  ;;  %3661 = vmatpush.bf16.msra.mxu1 %v7438_v12 }
 0x53c   :  { %3674 = vmatpush.bf16.msra.mxu2 %v7440_v44  ;;  %3687 = vmatpush.bf16.msra.mxu3 %v7455_v27 }
 0x53f   :  { %3649 = vmatpush.bf16.msra.mxu0 %v7445_v39  ;;  %3662 = vmatpush.bf16.msra.mxu1 %v7449_v17 }
 0x540   :  { %3675 = vmatpush.bf16.msra.mxu2 %v7451_v10 }
 0x543   :  { %3650 = vmatpush.bf16.msra.mxu0 %v7458_v20 }
 0x544   :  { %3676 = vmatpush.bf16.msra.mxu2 %v7464_v2 }
 0x545   :  { %3311 = vmatmul.bf16.vlgmr.msrb.gmra.mxu0 %v3097_v15  ;;  %3340 = vmatmul.bf16.vlgmr.msrb.gmra.mxu1 %v3097_v15 }
 0x546   :  { %3369 = vmatmul.bf16.vlgmr.msrb.gmra.mxu2 %v3097_v15  ;;  %3398 = vmatmul.bf16.vlgmr.msrb.gmra.mxu3 %v3097_v15  ;;  %v7462_v15 = vor.u32 %v6588_v32, %v6132_v34  ;;  %v7499_v32 = vor.u32 %v6585_v13, %v6124_v41  ;;  %v6576_v34 = vld [vmem:[#allocation13 + $0x24] sm:$0xf] }
 0x547   :  { %v7516_v33 = vor.u32 %v6576_v34, %v6084_v23 }
 0x548   :  { %3663 = vmatpush.bf16.msra.mxu1 %v7462_v15  ;;  %3677 = vmatpush.bf16.msra.mxu2 %v7480_v0 }
 0x54c   :  { %3664 = vmatpush.bf16.msra.mxu1 %v7478_v63 }
 0x555   :  { %3316 = vmatmul.bf16.gmra.mxu0 %v3098_v6  ;;  %3345 = vmatmul.bf16.gmra.mxu1 %v3098_v6 }
 0x556   :  { %3374 = vmatmul.bf16.gmra.mxu2 %v3098_v6  ;;  %3403 = vmatmul.bf16.gmra.mxu3 %v3098_v6 }
 0x565   :  { %3321 = vmatmul.bf16.gmra.mxu0 %v3099_v7  ;;  %3350 = vmatmul.bf16.gmra.mxu1 %v3099_v7 }
 0x566   :  { %3379 = vmatmul.bf16.gmra.mxu2 %v3099_v7  ;;  %3408 = vmatmul.bf16.gmra.mxu3 %v3099_v7  ;;  %v7467_v7 = vor.u32 %v6593_v16, %v6156_v36  ;;  %v7507_v36 = vor.u32 %v6578_v18, %v6082_v19  ;;  %v6074_v18 = vld [vmem:[#allocation13 + $0x8] sm:$0xf] }
 0x568   :  { %3688 = vmatpush.bf16.msra.mxu3 %v7467_v7 }
 0x5b2   :  { %v2977_v5 = vpop.f32.mrf.mxu0  ;;  %v2990_v52 = vpop.f32.mrf.mxu1 }
 0x5b3   :  { %v3020_v54 = vadd.f32 %v2977_v5, %v402_v49  ;;  %v3021_v57 = vadd.f32 %v2990_v52, %v431_v42  ;;  %v6589_v49 = vld [vmem:[#allocation13 + $0x8c] sm:$0xf]  ;;  %v6140_v42 = vld [vmem:[#allocation13 + $0x98] sm:$0xf0] }
 0x5b4   :  { %v7484_v1 = vor.u32 %v6589_v49, %v6140_v42  ;;  %v6577_v49 = vld [vmem:[#allocation13 + $0x2c] sm:$0xf]  ;;  %v6092_v42 = vld [vmem:[#allocation13 + $0x38] sm:$0xf0] }
 0x5b5   :  { %v5933_v29 = vmul.f32 -1.442695, %v3020_v54  ;;  %v5934_v28 = vmul.f32 -1.442695, %v3021_v57  ;;  %v7472_v54 = vor.u32 %v6586_v56, %v6114_v48  ;;  %v6581_v48 = vld [vmem:[#allocation13 + $0x4c] sm:$0xf]  ;;  %v7541_v19 = vor.u32 %v6577_v49, %v6092_v42 }
 0x5b6   :  { %3689 = vmatpush.bf16.msra.mxu3 %v7484_v1 }
 0x5b7   :  { %6738 = vpow2.f32 %v5933_v29  ;;  %v6100_v29 = vld [vmem:[#allocation13 + $0x50] sm:$0xf0]  ;;  %3651 = vmatpush.bf16.msra.mxu0 %v7472_v54 }
 0x5b8   :  { %6740 = vpow2.f32 %v5934_v28  ;;  %v6106_v28 = vld [vmem:[#allocation13 + $0x48] sm:$0xf]  ;;  %v7492_v50 = vor.u32 %v6580_v9, %v6100_v29  ;;  %v6574_v9 = vld [vmem:[#allocation13 + $0xc] sm:$0xf0] }
 0x5b9   :  { %v3003_v30 = vpop.f32.mrf.mxu2  ;;  %v7453_v31 = vpop.f32.mrf.mxu3  ;;  %v7537_v13 = vor.u32 %v6574_v9, %v6066_v8 }
 0x5ba   :  { %v3022_v35 = vadd.f32 %v3003_v30, %v460_v11  ;;  %v2979_v45 = vpop.f32.mrf.mxu0  ;;  %v2992_v43 = vpop.f32.mrf.mxu1  ;;  %v7494_v11 = vor.u32 %v6583_v37, %v6106_v28  ;;  %v489_v30 = vadd.f32 %v7270_v40, %v7212_v21  ;;  %v6108_v21 = vld [vmem:[#allocation13 + $0x58] sm:$0xf0]  ;;  %3665 = vmatpush.bf16.msra.mxu1 %v7492_v50  ;;  %3690 = vmatpush.bf16.msra.mxu3 %v7499_v32 }
 0x5bb   :  { %v6579_v43 = vld [vmem:[#allocation13 + $0x34] sm:$0xf0]  ;;  %3652 = vmatpush.bf16.msra.mxu0 %v7488_v62  ;;  %v7525_v55 = vor.u32 %v6581_v48, %v6108_v21 }
 0x5bc   :  { %v5935_v6 = vmul.f32 -1.442695, %v3022_v35  ;;  %v6090_v35 = vld [vmem:[#allocation13 + $0x28] sm:$0xf]  ;;  %v3023_v16 = vadd.f32 %v7453_v31, %v489_v30  ;;  %3678 = vmatpush.bf16.msra.mxu2 %v7494_v11 }
 0x5bd   :  { %v6739_v26 = vpop.eup %6738  ;;  %v7518_v31 = vor.u32 %v6579_v43, %v6090_v35  ;;  %v6573_v35 = vld [vmem:[#allocation13 + $0xc] sm:$0xf]  ;;  %v6076_v43 = vld [vmem:[#allocation13 + $0x18] sm:$0xf0] }
 0x5be   :  { %v6741_v5 = vpop.eup %6740  ;;  %v7469_v52 = vadd.f32 1.0, %v6739_v26  ;;  %6742 = vpow2.f32 %v5935_v6  ;;  %3666 = vmatpush.bf16.msra.mxu1 %v7516_v33  ;;  %3691 = vmatpush.bf16.msra.mxu3 %v7525_v55  ;;  %v7560_v49 = vor.u32 %v6573_v35, %v6076_v43 }
 0x5bf   :  { %v7474_v57 = vadd.f32 1.0, %v6741_v5  ;;  %3653 = vmatpush.bf16.msra.mxu0 %v7507_v36 }
 0x5c0   :  { %6744 = vrcp.f32 %v7469_v52  ;;  %v3045_v47 = vand.u32 2147483647, %v7469_v52  ;;  %v3047_v26 = vand.u32 2147483648, %v7469_v52  ;;  %3679 = vmatpush.bf16.msra.mxu2 %v7518_v31  ;;  %vm3041_vm6 = vweird.f32 %v7469_v52 }
 0x5c1   :  { %6746 = vrcp.f32 %v7474_v57  ;;  %v3005_v14 = vpop.f32.mrf.mxu2  ;;  %v3018_v51 = vpop.f32.mrf.mxu3  ;;  %v3062_v53 = vand.u32 2147483648, %v7474_v57  ;;  %v3060_v28 = vand.u32 2147483647, %v7474_v57  ;;  %vm3056_vm7 = vweird.f32 %v7474_v57 }
 0x5c2   :  { %v6572_v14 = vld [vmem:[#allocation13 + $0x4] sm:$0xf]  ;;  %v6068_v51 = vld [vmem:[#allocation13 + $0x10] sm:$0xf0]  ;;  %v3048_v48 = vor.u32 1.1754944e-38, %v3047_v26  ;;  %vm3046_vm10 = vcmp.eq.f32.partialorder %v3045_v47, 8.507059e+37  ;;  %3692 = vmatpush.bf16.msra.mxu3 %v7541_v19 }
 0x5c3   :  { %v7539_v41 = vor.u32 %v6572_v14, %v6068_v51  ;;  %3654 = vmatpush.bf16.msra.mxu0 %v7537_v13  ;;  %vm3061_vm11 = vcmp.eq.f32.partialorder %v3060_v28, 8.507059e+37 }
 0x5c4   :  { %v6743_v25 = vpop.eup %6742 }
 0x5c5   :  { %v7501_v45 = vadd.f32 1.0, %v6743_v25  ;;  %v6575_v25 = vld [vmem:[#allocation13 + $0x14] sm:$0xf0]  ;;  %3667 = vmatpush.bf16.msra.mxu1 %v7539_v41 }
 0x5c6   :  { %v7503_v22 = vpop.eup %6744  ;;  %v7545_v23 = vor.u32 %v6575_v25, %v6074_v18  ;;  %3693 = vmatpush.bf16.msra.mxu3 %v7560_v49 }
 0x5c7   :  { %v7509_v40 = vpop.eup %6746  ;;  %v3037_v56 = vmul.f32 %v7503_v22, %v7469_v52  ;;  %6748 = vrcp.f32 %v7501_v45  ;;  %vm3042_vm5 = vweird.f32 %v7503_v22  ;;  %v3063_v52 = vor.u32 1.1754944e-38, %v3062_v53  ;;  %3771 = vmatpush.bf16.msrb.mxu0 %v7416_v59 }
 0x5c8   :  { %v3052_v6 = vmul.f32 %v7509_v40, %v7474_v57  ;;  %6750 = vtanh.f32 %v3023_v16  ;;  %vm3057_vm4 = vweird.f32 %v7509_v40  ;;  %vm3043_vm8 = vmor %vm3041_vm6, %vm3042_vm5  ;;  %3680 = vmatpush.bf16.msra.mxu2 %v7545_v23  ;;  %v3077_v8 = vand.u32 2147483648, %v7501_v45 }
 0x5c9   :  { %v3038_v58 = vsub.f32 1.0, %v3037_v56  ;;  %vm3058_vm9 = vmor %vm3056_vm7, %vm3057_vm4  ;;  %3784 = vmatpush.bf16.msrb.mxu1 %v7418_v60  ;;  %vm3071_vm13 = vweird.f32 %v7501_v45  ;;  %v3399_v18 = vpop.f32.mrf.mxu3 }
 0x5ca   :  { %v3053_v5 = vsub.f32 1.0, %v3052_v6  ;;  %3810 = vmatpush.bf16.msrb.mxu3 %v7429_v24 }
 0x5cb   :  { %v3039_v29 = vmul.f32 %v7503_v22, %v3038_v58  ;;  %3772 = vmatpush.bf16.msrb.mxu0 %v7436_v38 }
 0x5cc   :  { %v3054_v37 = vmul.f32 %v7509_v40, %v3053_v5  ;;  %3797 = vmatpush.bf16.msrb.mxu2 %v7426_v61 }
 0x5cd   :  { %v6749_v30 = vpop.eup %6748  ;;  %v3040_v34 = vadd.f32 %v7503_v22, %v3039_v29  ;;  %3785 = vmatpush.bf16.msrb.mxu1 %v7438_v12  ;;  %v3078_v29 = vor.u32 1.1754944e-38, %v3077_v8 }
 0x5ce   :  { %v3067_v16 = vmul.f32 %v6749_v30, %v7501_v45  ;;  %v3055_v21 = vadd.f32 %v7509_v40, %v3054_v37  ;;  %v6751_v57 = vpop.eup %6750  ;;  %vm3072_vm12 = vweird.f32 %v6749_v30  ;;  %3811 = vmatpush.bf16.msrb.mxu3 %v7455_v27  ;;  %v3370_v37 = vpop.f32.mrf.mxu2 }
 0x5cf   :  { %v3044_v56 = vsel %vm3043_vm8, %v7503_v22, %v3040_v34  ;;  %vm3073_vm14 = vmor %vm3071_vm13, %vm3072_vm12  ;;  %3773 = vmatpush.bf16.msrb.mxu0 %v7445_v39 }
 0x5d0   :  { %v3068_v6 = vsub.f32 1.0, %v3067_v16  ;;  %v3049_v58 = vsel %vm3046_vm10, %v3048_v48, %v3044_v56  ;;  %v3059_v26 = vsel %vm3058_vm9, %v7509_v40, %v3055_v21  ;;  %3798 = vmatpush.bf16.msrb.mxu2 %v7440_v44 }
 0x5d1   :  { %v3064_v42 = vsel %vm3061_vm11, %v3063_v52, %v3059_v26  ;;  %v3083_v5 = vmul.f32 %v6751_v57, %v3049_v58  ;;  %3786 = vmatpush.bf16.msrb.mxu1 %v7449_v17  ;;  %v7642_v35 = vpop.f32.mrf.mxu3 }
 0x5d2   :  { %v3069_v22 = vmul.f32 %v6749_v30, %v3068_v6  ;;  %v3082_v47 = vmul.f32 %v3064_v42, %v7404_v3  ;;  %v3075_v3 = vand.u32 2147483647, %v7501_v45  ;;  %3812 = vmatpush.bf16.msrb.mxu3 %v7467_v7  ;;  %7971 = vst [vmem:[#allocation22_spill] sm:$0xff] %v7642_v35 }
 0x5d3   :  { %3774 = vmatpush.bf16.msrb.mxu0 %v7458_v20 }
 0x5d4   :  { %v3084_v53 = vadd.f32 %v3083_v5, %v3082_v47  ;;  %v3070_v40 = vadd.f32 %v6749_v30, %v3069_v22  ;;  %3799 = vmatpush.bf16.msrb.mxu2 %v7451_v10  ;;  %vm3076_vm15 = vcmp.eq.f32.partialorder %v3075_v3, 8.507059e+37 }
 0x5d5   :  { %3787 = vmatpush.bf16.msrb.mxu1 %v7462_v15 }
 0x5d6   :  { %6752 = vtanh.f32 %v3084_v53  ;;  %v3074_v9 = vsel %vm3073_vm14, %v6749_v30, %v3070_v40  ;;  %3813 = vmatpush.bf16.msrb.mxu3 %v7484_v1  ;;  %v7640_v34 = vpop.f32.mrf.mxu2 }
 0x5d7   :  { %v3079_v14 = vsel %vm3076_vm15, %v3078_v29, %v3074_v9  ;;  %3775 = vmatpush.bf16.msrb.mxu0 %v7472_v54 }
 0x5d8   :  { %3800 = vmatpush.bf16.msrb.mxu2 %v7464_v2 }
 0x5d9   :  { %3788 = vmatpush.bf16.msrb.mxu1 %v7478_v63  ;;  %v7650_v21 = vpop.f32.mrf.mxu3 }
 0x5da   :  { %3814 = vmatpush.bf16.msrb.mxu3 %v7499_v32  ;;  %7975 = vst [vmem:[#allocation26_spill] sm:$0xff] %v7650_v21 }
 0x5db   :  { %3776 = vmatpush.bf16.msrb.mxu0 %v7488_v62 }
 0x5dc   :  { %v6753_v28 = vpop.eup %6752  ;;  %3801 = vmatpush.bf16.msrb.mxu2 %v7480_v0 }
 0x5dd   :  { %v3086_v51 = vmul.f32 %v6753_v28, %v3079_v14  ;;  %3789 = vmatpush.bf16.msrb.mxu1 %v7492_v50  ;;  %v3133_v28 = vld [vmem:[%s7963_s6] sm:$0xf] }
 0x5de   :  { %3815 = vmatpush.bf16.msrb.mxu3 %v7525_v55  ;;  %v7648_v48 = vpop.f32.mrf.mxu2 }
 0x5df   :  { %v3100_v45 = vpack.c.bf16 %v3086_v51, %v7410_v46  ;;  %3777 = vmatpush.bf16.msrb.mxu0 %v7507_v36  ;;  %v3341_v46 = vpop.f32.mrf.mxu1  ;;  %7974 = vst [vmem:[#allocation25_spill] sm:$0xff] %v7648_v48 }
 0x5e0   :  { %3802 = vmatpush.bf16.msrb.mxu2 %v7494_v11 }
 0x5e1   :  { %3326 = vmatmul.bf16.gmra.mxu0 %v3100_v45  ;;  %3355 = vmatmul.bf16.gmra.mxu1 %v3100_v45  ;;  %v7658_v6 = vpop.f32.mrf.mxu3 }
 0x5e2   :  { %3384 = vmatmul.bf16.gmra.mxu2 %v3100_v45  ;;  %3413 = vmatmul.bf16.gmra.mxu3 %v3100_v45  ;;  %7979 = vst [vmem:[#allocation30_spill] sm:$0xff] %v7658_v6  ;;  %v7691_v45 = vperm.slane %v3133_v28, 0 }
 0x5e3   :  { %3790 = vmatpush.bf16.msrb.mxu1 %v7516_v33  ;;  %3778 = vmatpush.bf16.msrb.mxu0 %v7537_v13 }
 0x5e4   :  { %3803 = vmatpush.bf16.msrb.mxu2 %v7518_v31  ;;  %3816 = vmatpush.bf16.msrb.mxu3 %v7541_v19 }
 0x5e6   :  { %v7656_v57 = vpop.f32.mrf.mxu2 }
 0x5e7   :  { %3791 = vmatpush.bf16.msrb.mxu1 %v7539_v41  ;;  %v7638_v30 = vpop.f32.mrf.mxu1  ;;  %7978 = vst [vmem:[#allocation29_spill] sm:$0xff] %v7656_v57 }
 0x5e8   :  { %3804 = vmatpush.bf16.msrb.mxu2 %v7545_v23  ;;  %3817 = vmatpush.bf16.msrb.mxu3 %v7560_v49 }
 0x5e9   :  { %v7666_v5 = vpop.f32.mrf.mxu3 }
 0x5ea   :  { %7983 = vst [vmem:[#allocation34_spill] sm:$0xff] %v7666_v5 }
 0x5ee   :  { %v7664_v42 = vpop.f32.mrf.mxu2 }
 0x5ef   :  { %v7646_v16 = vpop.f32.mrf.mxu1  ;;  %7982 = vst [vmem:[#allocation33_spill] sm:$0xff] %v7664_v42  ;;  %v7701_v42 = vperm.slane %v3133_v28, 2 }
 0x5f0   :  { %7973 = vst [vmem:[#allocation24_spill] sm:$0xff] %v7646_v16 }
 0x5f1   :  { %3655 = vmatmul.bf16.vlgmr.msra.gmra.mxu0 %v7095_v4  ;;  %3668 = vmatmul.bf16.vlgmr.msra.gmra.mxu1 %v7095_v4  ;;  %v7674_v40 = vpop.f32.mrf.mxu3 }
 0x5f2   :  { %3681 = vmatmul.bf16.vlgmr.msra.gmra.mxu2 %v7095_v4  ;;  %3694 = vmatmul.bf16.vlgmr.msra.gmra.mxu3 %v7095_v4  ;;  %v3312_v4 = vpop.f32.mrf.mxu0  ;;  %7987 = vst [vmem:[#allocation38_spill] sm:$0xff] %v7674_v40 }
 0x5f3   :  { %3895 = vmatpush.bf16.msra.mxu0 %v7416_v59  ;;  %3908 = vmatpush.bf16.msra.mxu1 %v7418_v60 }
 0x5f4   :  { %3921 = vmatpush.bf16.msra.mxu2 %v7426_v61  ;;  %3934 = vmatpush.bf16.msra.mxu3 %v7429_v24 }
 0x5f6   :  { %v7672_v53 = vpop.f32.mrf.mxu2 }
 0x5f7   :  { %3896 = vmatpush.bf16.msra.mxu0 %v7436_v38  ;;  %3909 = vmatpush.bf16.msra.mxu1 %v7438_v12  ;;  %v7654_v56 = vpop.f32.mrf.mxu1  ;;  %7986 = vst [vmem:[#allocation37_spill] sm:$0xff] %v7672_v53  ;;  %v7693_v53 = vperm.slane %v3133_v28, 1 }
 0x5f8   :  { %3922 = vmatpush.bf16.msra.mxu2 %v7440_v44  ;;  %3935 = vmatpush.bf16.msra.mxu3 %v7455_v27  ;;  %7977 = vst [vmem:[#allocation28_spill] sm:$0xff] %v7654_v56 }
 0x5fa   :  { %v7636_v25 = vpop.f32.mrf.mxu0 }
 0x5fb   :  { %3897 = vmatpush.bf16.msra.mxu0 %v7445_v39  ;;  %3910 = vmatpush.bf16.msra.mxu1 %v7449_v17 }
 0x5fc   :  { %3923 = vmatpush.bf16.msra.mxu2 %v7451_v10  ;;  %3936 = vmatpush.bf16.msra.mxu3 %v7467_v7 }
 0x5ff   :  { %3898 = vmatpush.bf16.msra.mxu0 %v7458_v20  ;;  %3911 = vmatpush.bf16.msra.mxu1 %v7462_v15  ;;  %v7662_v26 = vpop.f32.mrf.mxu1 }
 0x600   :  { %3924 = vmatpush.bf16.msra.mxu2 %v7464_v2  ;;  %3937 = vmatpush.bf16.msra.mxu3 %v7484_v1  ;;  %7981 = vst [vmem:[#allocation32_spill] sm:$0xff] %v7662_v26  ;;  %v3371_v26 = vadd.f32 %v3370_v37, %v7701_v42 }
 0x602   :  { %v7644_v43 = vpop.f32.mrf.mxu0 }
 0x603   :  { %3899 = vmatpush.bf16.msra.mxu0 %v7472_v54  ;;  %3912 = vmatpush.bf16.msra.mxu1 %v7478_v63  ;;  %7972 = vst [vmem:[#allocation23_spill] sm:$0xff] %v7644_v43 }
 0x604   :  { %3925 = vmatpush.bf16.msra.mxu2 %v7480_v0  ;;  %3938 = vmatpush.bf16.msra.mxu3 %v7499_v32 }
 0x607   :  { %3900 = vmatpush.bf16.msra.mxu0 %v7488_v62  ;;  %3913 = vmatpush.bf16.msra.mxu1 %v7492_v50  ;;  %v7670_v47 = vpop.f32.mrf.mxu1 }
 0x608   :  { %3926 = vmatpush.bf16.msra.mxu2 %v7494_v11  ;;  %3939 = vmatpush.bf16.msra.mxu3 %v7525_v55  ;;  %7985 = vst [vmem:[#allocation36_spill] sm:$0xff] %v7670_v47 }
 0x60a   :  { %v7652_v52 = vpop.f32.mrf.mxu0 }
 0x60b   :  { %3901 = vmatpush.bf16.msra.mxu0 %v7507_v36  ;;  %3914 = vmatpush.bf16.msra.mxu1 %v7516_v33  ;;  %7976 = vst [vmem:[#allocation27_spill] sm:$0xff] %v7652_v52 }
 0x60c   :  { %3927 = vmatpush.bf16.msra.mxu2 %v7518_v31  ;;  %3940 = vmatpush.bf16.msra.mxu3 %v7541_v19 }
 0x60f   :  { %3902 = vmatpush.bf16.msra.mxu0 %v7537_v13  ;;  %3915 = vmatpush.bf16.msra.mxu1 %v7539_v41 }
 0x610   :  { %3928 = vmatpush.bf16.msra.mxu2 %v7545_v23  ;;  %3941 = vmatpush.bf16.msra.mxu3 %v7560_v49 }
 0x612   :  { %v7660_v58 = vpop.f32.mrf.mxu0 }
 0x613   :  { %7980 = vst [vmem:[#allocation31_spill] sm:$0xff] %v7660_v58 }
 0x61a   :  { %v7668_v22 = vpop.f32.mrf.mxu0 }
 0x61b   :  { %7984 = vst [vmem:[#allocation35_spill] sm:$0xff] %v7668_v22 }
 0x65e   :  { %v7676_v8 = vpop.f32.mrf.mxu0  ;;  %v7678_v3 = vpop.f32.mrf.mxu1 }
 0x65f   :  { %7988 = vst [vmem:[#allocation39_spill] sm:$0xff] %v7676_v8  ;;  %v3313_v8 = vadd.f32 %v3312_v4, %v7691_v45 }
 0x660   :  { %7989 = vst [vmem:[#allocation40_spill] sm:$0xff] %v7678_v3  ;;  %v3342_v3 = vadd.f32 %v3341_v46, %v7693_v53 }
 0x665   :  { %v7680_v9 = vpop.f32.mrf.mxu2  ;;  %v7682_v29 = vpop.f32.mrf.mxu3 }
 0x666   :  { %7990 = vst [vmem:[#allocation41_spill] sm:$0xff] %v7680_v9  ;;  %v7687_v14 = vpop.f32.mrf.mxu0  ;;  %v7689_v51 = vpop.f32.mrf.mxu1 }
 0x667   :  { %7991 = vst [vmem:[#allocation42_spill] sm:$0xff] %v7682_v29 }
 0x668   :  { %7992 = vst [vmem:[#allocation43_spill] sm:$0xff] %v7687_v14 }
 0x669   :  { %7993 = vst [vmem:[#allocation44_spill] sm:$0xff] %v7689_v51 }
 0x66d   :  { %v7697_v40 = vpop.f32.mrf.mxu2  ;;  %v7699_v9 = vpop.f32.mrf.mxu3 }
 0x66e   :  { %7994 = vst [vmem:[#allocation45_spill] sm:$0xff] %v7697_v40  ;;  %v3656_v29 = vpop.f32.mrf.mxu0  ;;  %v3669_v47 = vpop.f32.mrf.mxu1 }
 0x66f   :  { %7995 = vst [vmem:[#allocation46_spill] sm:$0xff] %v7699_v9  ;;  %v3699_v22 = vadd.f32 %v3656_v29, %v3313_v8  ;;  %v3700_v5 = vadd.f32 %v3669_v47, %v3342_v3  ;;  %v7704_v47 = vperm.slane %v3133_v28, 3 }
 0x671   :  { %v6192_v14 = vmul.f32 -1.442695, %v3699_v22  ;;  %v6193_v51 = vmul.f32 -1.442695, %v3700_v5  ;;  %7996 = vst [vmem:[#allocation47_spill] sm:$0xff] %v7704_v47  ;;  %v3400_v37 = vadd.f32 %v3399_v18, %v7704_v47 }
 0x673   :  { %6754 = vpow2.f32 %v6192_v14 }
 0x674   :  { %6756 = vpow2.f32 %v6193_v51 }
 0x675   :  { %v3682_v58 = vpop.f32.mrf.mxu2  ;;  %v3695_v4 = vpop.f32.mrf.mxu3 }
 0x676   :  { %v3701_v6 = vadd.f32 %v3682_v58, %v3371_v26  ;;  %v3658_v46 = vpop.f32.mrf.mxu0  ;;  %v3671_v57 = vpop.f32.mrf.mxu1  ;;  %v3702_v58 = vadd.f32 %v3695_v4, %v3400_v37 }
 0x678   :  { %v6194_v40 = vmul.f32 -1.442695, %v3701_v6 }
 0x679   :  { %v6755_v56 = vpop.eup %6754 }
 0x67a   :  { %v6757_v9 = vpop.eup %6756  ;;  %v3712_v52 = vadd.f32 1.0, %v6755_v56  ;;  %6758 = vpow2.f32 %v6194_v40 }
 0x67b   :  { %v3713_v8 = vadd.f32 1.0, %v6757_v9 }
 0x67c   :  { %6760 = vrcp.f32 %v3712_v52  ;;  %v3726_v40 = vand.u32 2147483648, %v3712_v52  ;;  %v3724_v46 = vand.u32 2147483647, %v3712_v52  ;;  %vm3720_vm2 = vweird.f32 %v3712_v52 }
 0x67d   :  { %6762 = vrcp.f32 %v3713_v8  ;;  %v3684_v5 = vpop.f32.mrf.mxu2  ;;  %v3697_v22 = vpop.f32.mrf.mxu3  ;;  %v3741_v9 = vand.u32 2147483648, %v3713_v8  ;;  %vm3735_vm3 = vweird.f32 %v3713_v8 }
 0x67e   :  { %v3739_v22 = vand.u32 2147483647, %v3713_v8  ;;  %vm3725_vm5 = vcmp.eq.f32.partialorder %v3724_v46, 8.507059e+37 }
 0x67f   :  { %v3742_v48 = vor.u32 1.1754944e-38, %v3741_v9 }
 0x680   :  { %v6759_v3 = vpop.eup %6758  ;;  %vm3740_vm7 = vcmp.eq.f32.partialorder %v3739_v22, 8.507059e+37 }
 0x681   :  { %v3714_v29 = vadd.f32 1.0, %v6759_v3  ;;  %v3727_v3 = vor.u32 1.1754944e-38, %v3726_v40 }
 0x682   :  { %v6761_v14 = vpop.eup %6760 }
 0x683   :  { %v6763_v26 = vpop.eup %6762  ;;  %v3716_v57 = vmul.f32 %v6761_v14, %v3712_v52  ;;  %6764 = vrcp.f32 %v3714_v29  ;;  %vm3721_vm0 = vweird.f32 %v6761_v14  ;;  %vm3750_vm9 = vweird.f32 %v3714_v29 }
 0x684   :  { %v3731_v6 = vmul.f32 %v6763_v26, %v3713_v8  ;;  %6766 = vtanh.f32 %v3702_v58  ;;  %vm3736_vm1 = vweird.f32 %v6763_v26  ;;  %vm3722_vm4 = vmor %vm3720_vm2, %vm3721_vm0  ;;  %v3756_v8 = vand.u32 2147483648, %v3714_v29 }
 0x685   :  { %v3717_v51 = vsub.f32 1.0, %v3716_v57  ;;  %vm3737_vm6 = vmor %vm3735_vm3, %vm3736_vm1 }
 0x686   :  { %v3732_v56 = vsub.f32 1.0, %v3731_v6  ;;  %v3757_v9 = vor.u32 1.1754944e-38, %v3756_v8 }
 0x687   :  { %v3718_v28 = vmul.f32 %v6761_v14, %v3717_v51 }
 0x688   :  { %v3733_v5 = vmul.f32 %v6763_v26, %v3732_v56 }
 0x689   :  { %v6765_v21 = vpop.eup %6764  ;;  %v3719_v18 = vadd.f32 %v6761_v14, %v3718_v28 }
 0x68a   :  { %v3746_v4 = vmul.f32 %v6765_v21, %v3714_v29  ;;  %v3734_v37 = vadd.f32 %v6763_v26, %v3733_v5  ;;  %v6767_v58 = vpop.eup %6766  ;;  %vm3751_vm8 = vweird.f32 %v6765_v21 }
 0x68b   :  { %v3723_v57 = vsel %vm3722_vm4, %v6761_v14, %v3719_v18  ;;  %v3754_v14 = vand.u32 2147483647, %v3714_v29  ;;  %vm3752_vm10 = vmor %vm3750_vm9, %vm3751_vm8 }
 0x68c   :  { %v3747_v6 = vsub.f32 1.0, %v3746_v4  ;;  %v3728_v51 = vsel %vm3725_vm5, %v3727_v3, %v3723_v57  ;;  %v3738_v16 = vsel %vm3737_vm6, %v6763_v26, %v3734_v37  ;;  %v3373_v4 = vadd.f32 %v7640_v34, %v7701_v42 }
 0x68d   :  { %v3743_v56 = vsel %vm3740_vm7, %v3742_v48, %v3738_v16  ;;  %v3762_v43 = vmul.f32 %v6767_v58, %v3728_v51  ;;  %vm3755_vm11 = vcmp.eq.f32.partialorder %v3754_v14, 8.507059e+37 }
 0x68e   :  { %v3748_v35 = vmul.f32 %v6765_v21, %v3747_v6  ;;  %v3761_v47 = vmul.f32 0.0, %v3743_v56 }
 0x690   :  { %v7707_v28 = vadd.f32 %v3762_v43, %v3761_v47  ;;  %v3749_v52 = vadd.f32 %v6765_v21, %v3748_v35  ;;  %v3315_v35 = vadd.f32 %v7636_v25, %v7691_v45  ;;  %v3344_v43 = vadd.f32 %v7638_v30, %v7693_v53 }
 0x692   :  { %6768 = vtanh.f32 %v7707_v28  ;;  %v3753_v40 = vsel %vm3752_vm10, %v6765_v21, %v3749_v52 }
 0x693   :  { %v3758_v26 = vsel %vm3755_vm11, %v3757_v9, %v3753_v40  ;;  %v7997_v9 = vld [vmem:[#allocation47_spill] sm:$0xff] }
 0x698   :  { %v6769_v46 = vpop.eup %6768 }
 0x699   :  { %v3765_v5 = vmul.f32 %v6769_v46, %v3758_v26  ;;  %v7998_v46 = vld [vmem:[#allocation22_spill] sm:$0xff] }
 0x69a   :  { %v3402_v34 = vadd.f32 %v7998_v46, %v7997_v9 }
 0x69b   :  { %v3770_v16 = vpack.c.bf16 %v3765_v5, %v3765_v5 }
 0x69d   :  { %3779 = vmatmul.bf16.vlgmr.msrb.gmra.mxu0 %v3770_v16  ;;  %3792 = vmatmul.bf16.vlgmr.msrb.gmra.mxu1 %v3770_v16 }
 0x69e   :  { %3805 = vmatmul.bf16.vlgmr.msrb.gmra.mxu2 %v3770_v16  ;;  %3818 = vmatmul.bf16.vlgmr.msrb.gmra.mxu3 %v3770_v16 }
 0x69f   :  { %4019 = vmatpush.bf16.msrb.mxu0 %v7416_v59  ;;  %4032 = vmatpush.bf16.msrb.mxu1 %v7418_v60 }
 0x6a0   :  { %4045 = vmatpush.bf16.msrb.mxu2 %v7426_v61  ;;  %4058 = vmatpush.bf16.msrb.mxu3 %v7429_v24 }
 0x6a3   :  { %4020 = vmatpush.bf16.msrb.mxu0 %v7436_v38  ;;  %4033 = vmatpush.bf16.msrb.mxu1 %v7438_v12 }
 0x6a4   :  { %4046 = vmatpush.bf16.msrb.mxu2 %v7440_v44  ;;  %4059 = vmatpush.bf16.msrb.mxu3 %v7455_v27 }
 0x6a7   :  { %4021 = vmatpush.bf16.msrb.mxu0 %v7445_v39  ;;  %4034 = vmatpush.bf16.msrb.mxu1 %v7449_v17 }
 0x6a8   :  { %4047 = vmatpush.bf16.msrb.mxu2 %v7451_v10  ;;  %4060 = vmatpush.bf16.msrb.mxu3 %v7467_v7 }
 0x6ab   :  { %4022 = vmatpush.bf16.msrb.mxu0 %v7458_v20  ;;  %4035 = vmatpush.bf16.msrb.mxu1 %v7462_v15 }
 0x6ac   :  { %4048 = vmatpush.bf16.msrb.mxu2 %v7464_v2  ;;  %4061 = vmatpush.bf16.msrb.mxu3 %v7484_v1 }
 0x6af   :  { %4023 = vmatpush.bf16.msrb.mxu0 %v7472_v54  ;;  %4036 = vmatpush.bf16.msrb.mxu1 %v7478_v63 }
 0x6b0   :  { %4049 = vmatpush.bf16.msrb.mxu2 %v7480_v0  ;;  %4062 = vmatpush.bf16.msrb.mxu3 %v7499_v32 }
 0x6b3   :  { %4024 = vmatpush.bf16.msrb.mxu0 %v7488_v62  ;;  %4037 = vmatpush.bf16.msrb.mxu1 %v7492_v50 }
 0x6b4   :  { %4050 = vmatpush.bf16.msrb.mxu2 %v7494_v11  ;;  %4063 = vmatpush.bf16.msrb.mxu3 %v7525_v55 }
 0x6b7   :  { %4025 = vmatpush.bf16.msrb.mxu0 %v7507_v36  ;;  %4038 = vmatpush.bf16.msrb.mxu1 %v7516_v33 }
 0x6b8   :  { %4051 = vmatpush.bf16.msrb.mxu2 %v7518_v31  ;;  %4064 = vmatpush.bf16.msrb.mxu3 %v7541_v19 }
 0x6bb   :  { %4026 = vmatpush.bf16.msrb.mxu0 %v7537_v13  ;;  %4039 = vmatpush.bf16.msrb.mxu1 %v7539_v41 }
 0x6bc   :  { %4052 = vmatpush.bf16.msrb.mxu2 %v7545_v23  ;;  %4065 = vmatpush.bf16.msrb.mxu3 %v7560_v49 }
 0x71a   :  { %v3780_v48 = vpop.f32.mrf.mxu0  ;;  %v3793_v21 = vpop.f32.mrf.mxu1 }
 0x71b   :  { %v3823_v47 = vadd.f32 %v3780_v48, %v3315_v35  ;;  %v3824_v29 = vadd.f32 %v3793_v21, %v3344_v43 }
 0x71d   :  { %v6195_v22 = vmul.f32 -1.442695, %v3823_v47  ;;  %v6196_v18 = vmul.f32 -1.442695, %v3824_v29 }
 0x71f   :  { %6770 = vpow2.f32 %v6195_v22 }
 0x720   :  { %6772 = vpow2.f32 %v6196_v18 }
 0x721   :  { %v3806_v3 = vpop.f32.mrf.mxu2  ;;  %v3819_v37 = vpop.f32.mrf.mxu3 }
 0x722   :  { %v3825_v57 = vadd.f32 %v3806_v3, %v3373_v4  ;;  %v3782_v58 = vpop.f32.mrf.mxu0  ;;  %v3795_v6 = vpop.f32.mrf.mxu1  ;;  %v3826_v16 = vadd.f32 %v3819_v37, %v3402_v34 }
 0x724   :  { %v6197_v25 = vmul.f32 -1.442695, %v3825_v57 }
 0x725   :  { %v6771_v51 = vpop.eup %6770 }
 0x726   :  { %v6773_v56 = vpop.eup %6772  ;;  %v3836_v30 = vadd.f32 1.0, %v6771_v51  ;;  %6774 = vpow2.f32 %v6197_v25 }
 0x727   :  { %v3837_v52 = vadd.f32 1.0, %v6773_v56 }
 0x728   :  { %6776 = vrcp.f32 %v3836_v30  ;;  %v3850_v29 = vand.u32 2147483648, %v3836_v30  ;;  %v3848_v4 = vand.u32 2147483647, %v3836_v30  ;;  %vm3844_vm14 = vweird.f32 %v3836_v30 }
 0x729   :  { %6778 = vrcp.f32 %v3837_v52  ;;  %v3808_v8 = vpop.f32.mrf.mxu2  ;;  %v3821_v14 = vpop.f32.mrf.mxu3  ;;  %v3865_v22 = vand.u32 2147483648, %v3837_v52  ;;  %v3863_v57 = vand.u32 2147483647, %v3837_v52  ;;  %vm3859_vm15 = vweird.f32 %v3837_v52 }
 0x72a   :  { %v3851_v25 = vor.u32 1.1754944e-38, %v3850_v29  ;;  %vm3849_vm2 = vcmp.eq.f32.partialorder %v3848_v4, 8.507059e+37 }
 0x72b   :  { %v3866_v56 = vor.u32 1.1754944e-38, %v3865_v22  ;;  %vm3864_vm3 = vcmp.eq.f32.partialorder %v3863_v57, 8.507059e+37  ;;  %v8000_v57 = vld [vmem:[#allocation24_spill] sm:$0xff] }
 0x72c   :  { %v6775_v40 = vpop.eup %6774 }
 0x72d   :  { %v3838_v26 = vadd.f32 1.0, %v6775_v40 }
 0x72e   :  { %v6777_v5 = vpop.eup %6776 }
 0x72f   :  { %v6779_v35 = vpop.eup %6778  ;;  %v3840_v43 = vmul.f32 %v6777_v5, %v3836_v30  ;;  %6780 = vrcp.f32 %v3838_v26  ;;  %vm3845_vm12 = vweird.f32 %v6777_v5  ;;  %vm3874_vm5 = vweird.f32 %v3838_v26 }
 0x730   :  { %v3855_v48 = vmul.f32 %v6779_v35, %v3837_v52  ;;  %6782 = vtanh.f32 %v3826_v16  ;;  %vm3860_vm13 = vweird.f32 %v6779_v35  ;;  %vm3846_vm0 = vmor %vm3844_vm14, %vm3845_vm12 }
 0x731   :  { %v3841_v21 = vsub.f32 1.0, %v3840_v43  ;;  %vm3861_vm1 = vmor %vm3859_vm15, %vm3860_vm13 }
 0x732   :  { %v3856_v47 = vsub.f32 1.0, %v3855_v48 }
 0x733   :  { %v3842_v18 = vmul.f32 %v6777_v5, %v3841_v21 }
 0x734   :  { %v3857_v3 = vmul.f32 %v6779_v35, %v3856_v47  ;;  %v3880_v47 = vand.u32 2147483648, %v3838_v26 }
 0x735   :  { %v6781_v58 = vpop.eup %6780  ;;  %v3843_v6 = vadd.f32 %v6777_v5, %v3842_v18 }
 0x736   :  { %v3870_v37 = vmul.f32 %v6781_v58, %v3838_v26  ;;  %v3858_v51 = vadd.f32 %v6779_v35, %v3857_v3  ;;  %v6783_v14 = vpop.eup %6782  ;;  %vm3875_vm4 = vweird.f32 %v6781_v58  ;;  %v3881_v22 = vor.u32 1.1754944e-38, %v3880_v47 }
 0x737   :  { %v3847_v8 = vsel %vm3846_vm0, %v6777_v5, %v3843_v6  ;;  %v3878_v5 = vand.u32 2147483647, %v3838_v26  ;;  %vm3876_vm6 = vmor %vm3874_vm5, %vm3875_vm4 }
 0x738   :  { %v3871_v40 = vsub.f32 1.0, %v3870_v37  ;;  %v3852_v46 = vsel %vm3849_vm2, %v3851_v25, %v3847_v8  ;;  %v3862_v34 = vsel %vm3861_vm1, %v6779_v35, %v3858_v51 }
 0x739   :  { %v3867_v16 = vsel %vm3864_vm3, %v3866_v56, %v3862_v34  ;;  %v3886_v43 = vmul.f32 %v6783_v14, %v3852_v46  ;;  %vm3879_vm7 = vcmp.eq.f32.partialorder %v3878_v5, 8.507059e+37  ;;  %v8001_v14 = vld [vmem:[#allocation25_spill] sm:$0xff] }
 0x73a   :  { %v3872_v48 = vmul.f32 %v6781_v58, %v3871_v40  ;;  %v3885_v21 = vmul.f32 %v3867_v16, %v7707_v28  ;;  %v7999_v28 = vld [vmem:[#allocation23_spill] sm:$0xff]  ;;  %v3376_v40 = vadd.f32 %v8001_v14, %v7701_v42 }
 0x73b   :  { %v3318_v26 = vadd.f32 %v7999_v28, %v7691_v45 }
 0x73c   :  { %v7751_v30 = vadd.f32 %v3886_v43, %v3885_v21  ;;  %v3873_v52 = vadd.f32 %v6781_v58, %v3872_v48 }
 0x73e   :  { %6784 = vtanh.f32 %v7751_v30  ;;  %v3877_v29 = vsel %vm3876_vm6, %v6781_v58, %v3873_v52  ;;  %v3347_v58 = vadd.f32 %v8000_v57, %v7693_v53 }
 0x73f   :  { %v3882_v18 = vsel %vm3879_vm7, %v3881_v22, %v3877_v29 }
 0x744   :  { %v6785_v35 = vpop.eup %6784 }
 0x745   :  { %v3889_v4 = vmul.f32 %v6785_v35, %v3882_v18 }
 0x747   :  { %v3894_v3 = vpack.c.bf16 %v3889_v4, %v3889_v4  ;;  %v8002_v4 = vld [vmem:[#allocation26_spill] sm:$0xff] }
 0x749   :  { %3903 = vmatmul.bf16.vlgmr.msra.gmra.mxu0 %v3894_v3  ;;  %3916 = vmatmul.bf16.vlgmr.msra.gmra.mxu1 %v3894_v3 }
 0x74a   :  { %3929 = vmatmul.bf16.vlgmr.msra.gmra.mxu2 %v3894_v3  ;;  %3942 = vmatmul.bf16.vlgmr.msra.gmra.mxu3 %v3894_v3  ;;  %v3405_v3 = vadd.f32 %v8002_v4, %v7997_v9 }
 0x74b   :  { %4143 = vmatpush.bf16.msra.mxu0 %v7416_v59  ;;  %4156 = vmatpush.bf16.msra.mxu1 %v7418_v60 }
 0x74c   :  { %4169 = vmatpush.bf16.msra.mxu2 %v7426_v61  ;;  %4182 = vmatpush.bf16.msra.mxu3 %v7429_v24 }
 0x74f   :  { %4144 = vmatpush.bf16.msra.mxu0 %v7436_v38  ;;  %4157 = vmatpush.bf16.msra.mxu1 %v7438_v12 }
 0x750   :  { %4170 = vmatpush.bf16.msra.mxu2 %v7440_v44  ;;  %4183 = vmatpush.bf16.msra.mxu3 %v7455_v27 }
 0x753   :  { %4145 = vmatpush.bf16.msra.mxu0 %v7445_v39  ;;  %4158 = vmatpush.bf16.msra.mxu1 %v7449_v17 }
 0x754   :  { %4171 = vmatpush.bf16.msra.mxu2 %v7451_v10  ;;  %4184 = vmatpush.bf16.msra.mxu3 %v7467_v7 }
 0x757   :  { %4146 = vmatpush.bf16.msra.mxu0 %v7458_v20  ;;  %4159 = vmatpush.bf16.msra.mxu1 %v7462_v15 }
 0x758   :  { %4172 = vmatpush.bf16.msra.mxu2 %v7464_v2  ;;  %4185 = vmatpush.bf16.msra.mxu3 %v7484_v1 }
 0x75b   :  { %4147 = vmatpush.bf16.msra.mxu0 %v7472_v54  ;;  %4160 = vmatpush.bf16.msra.mxu1 %v7478_v63 }
 0x75c   :  { %4173 = vmatpush.bf16.msra.mxu2 %v7480_v0  ;;  %4186 = vmatpush.bf16.msra.mxu3 %v7499_v32 }
 0x75f   :  { %4148 = vmatpush.bf16.msra.mxu0 %v7488_v62  ;;  %4161 = vmatpush.bf16.msra.mxu1 %v7492_v50 }
 0x760   :  { %4174 = vmatpush.bf16.msra.mxu2 %v7494_v11  ;;  %4187 = vmatpush.bf16.msra.mxu3 %v7525_v55 }
 0x763   :  { %4149 = vmatpush.bf16.msra.mxu0 %v7507_v36  ;;  %4162 = vmatpush.bf16.msra.mxu1 %v7516_v33 }
 0x764   :  { %4175 = vmatpush.bf16.msra.mxu2 %v7518_v31  ;;  %4188 = vmatpush.bf16.msra.mxu3 %v7541_v19 }
 0x767   :  { %4150 = vmatpush.bf16.msra.mxu0 %v7537_v13  ;;  %4163 = vmatpush.bf16.msra.mxu1 %v7539_v41 }
 0x768   :  { %4176 = vmatpush.bf16.msra.mxu2 %v7545_v23  ;;  %4189 = vmatpush.bf16.msra.mxu3 %v7560_v49 }
 0x7c6   :  { %v3904_v6 = vpop.f32.mrf.mxu0  ;;  %v3917_v37 = vpop.f32.mrf.mxu1 }
 0x7c7   :  { %v3947_v25 = vadd.f32 %v3904_v6, %v3318_v26  ;;  %v3948_v51 = vadd.f32 %v3917_v37, %v3347_v58 }
 0x7c9   :  { %v6198_v56 = vmul.f32 -1.442695, %v3947_v25  ;;  %v6199_v8 = vmul.f32 -1.442695, %v3948_v51 }
 0x7cb   :  { %6786 = vpow2.f32 %v6198_v56 }
 0x7cc   :  { %6788 = vpow2.f32 %v6199_v8 }
 0x7cd   :  { %v3930_v46 = vpop.f32.mrf.mxu2  ;;  %v3943_v34 = vpop.f32.mrf.mxu3 }
 0x7ce   :  { %v3949_v16 = vadd.f32 %v3930_v46, %v3376_v40  ;;  %v3906_v43 = vpop.f32.mrf.mxu0  ;;  %v3919_v48 = vpop.f32.mrf.mxu1  ;;  %v3950_v57 = vadd.f32 %v3943_v34, %v3405_v3 }
 0x7d0   :  { %v6200_v21 = vmul.f32 -1.442695, %v3949_v16 }
 0x7d1   :  { %v6787_v52 = vpop.eup %6786 }
 0x7d2   :  { %v6789_v47 = vpop.eup %6788  ;;  %v3960_v5 = vadd.f32 1.0, %v6787_v52  ;;  %6790 = vpow2.f32 %v6200_v21 }
 0x7d3   :  { %v3961_v29 = vadd.f32 1.0, %v6789_v47 }
 0x7d4   :  { %6792 = vrcp.f32 %v3960_v5  ;;  %v3974_v56 = vand.u32 2147483648, %v3960_v5  ;;  %v3972_v40 = vand.u32 2147483647, %v3960_v5  ;;  %vm3968_vm10 = vweird.f32 %v3960_v5 }
 0x7d5   :  { %6794 = vrcp.f32 %v3961_v29  ;;  %v3932_v22 = vpop.f32.mrf.mxu2  ;;  %v3945_v35 = vpop.f32.mrf.mxu3  ;;  %v3989_v8 = vand.u32 2147483648, %v3961_v29  ;;  %v3987_v16 = vand.u32 2147483647, %v3961_v29  ;;  %vm3983_vm11 = vweird.f32 %v3961_v29 }
 0x7d6   :  { %v3975_v21 = vor.u32 1.1754944e-38, %v3974_v56  ;;  %vm3973_vm14 = vcmp.eq.f32.partialorder %v3972_v40, 8.507059e+37 }
 0x7d7   :  { %v3990_v47 = vor.u32 1.1754944e-38, %v3989_v8  ;;  %vm3988_vm15 = vcmp.eq.f32.partialorder %v3987_v16, 8.507059e+37  ;;  %v8004_v16 = vld [vmem:[#allocation28_spill] sm:$0xff] }
 0x7d8   :  { %v6791_v18 = vpop.eup %6790 }
 0x7d9   :  { %v3962_v28 = vadd.f32 1.0, %v6791_v18 }
 0x7da   :  { %v6793_v26 = vpop.eup %6792 }
 0x7db   :  { %v6795_v58 = vpop.eup %6794  ;;  %v3964_v6 = vmul.f32 %v6793_v26, %v3960_v5  ;;  %6796 = vrcp.f32 %v3962_v28  ;;  %vm3969_vm8 = vweird.f32 %v6793_v26  ;;  %vm3998_vm1 = vweird.f32 %v3962_v28 }
 0x7dc   :  { %v3979_v37 = vmul.f32 %v6795_v58, %v3961_v29  ;;  %6798 = vtanh.f32 %v3950_v57  ;;  %vm3984_vm9 = vweird.f32 %v6795_v58  ;;  %vm3970_vm12 = vmor %vm3968_vm10, %vm3969_vm8 }
 0x7dd   :  { %v3965_v25 = vsub.f32 1.0, %v3964_v6  ;;  %vm3985_vm13 = vmor %vm3983_vm11, %vm3984_vm9 }
 0x7de   :  { %v3980_v51 = vsub.f32 1.0, %v3979_v37 }
 0x7df   :  { %v3966_v14 = vmul.f32 %v6793_v26, %v3965_v25 }
 0x7e0   :  { %v3981_v46 = vmul.f32 %v6795_v58, %v3980_v51  ;;  %v4004_v51 = vand.u32 2147483648, %v3962_v28 }
 0x7e1   :  { %v6797_v43 = vpop.eup %6796  ;;  %v3967_v48 = vadd.f32 %v6793_v26, %v3966_v14 }
 0x7e2   :  { %v3994_v34 = vmul.f32 %v6797_v43, %v3962_v28  ;;  %v3982_v52 = vadd.f32 %v6795_v58, %v3981_v46  ;;  %v6799_v35 = vpop.eup %6798  ;;  %vm3999_vm0 = vweird.f32 %v6797_v43  ;;  %v4005_v8 = vor.u32 1.1754944e-38, %v4004_v51 }
 0x7e3   :  { %v3971_v22 = vsel %vm3970_vm12, %v6793_v26, %v3967_v48  ;;  %v4002_v26 = vand.u32 2147483647, %v3962_v28  ;;  %vm4000_vm2 = vmor %vm3998_vm1, %vm3999_vm0 }
 0x7e4   :  { %v3995_v18 = vsub.f32 1.0, %v3994_v34  ;;  %v3976_v4 = vsel %vm3973_vm14, %v3975_v21, %v3971_v22  ;;  %v3986_v3 = vsel %vm3985_vm13, %v6795_v58, %v3982_v52 }
 0x7e5   :  { %v3991_v57 = vsel %vm3988_vm15, %v3990_v47, %v3986_v3  ;;  %v4010_v6 = vmul.f32 %v6799_v35, %v3976_v4  ;;  %vm4003_vm3 = vcmp.eq.f32.partialorder %v4002_v26, 8.507059e+37  ;;  %v8005_v35 = vld [vmem:[#allocation29_spill] sm:$0xff] }
 0x7e6   :  { %v3996_v37 = vmul.f32 %v6797_v43, %v3995_v18  ;;  %v4009_v25 = vmul.f32 %v3991_v57, %v7751_v30  ;;  %v8003_v30 = vld [vmem:[#allocation27_spill] sm:$0xff]  ;;  %v3378_v18 = vadd.f32 %v8005_v35, %v7701_v42 }
 0x7e7   :  { %v3320_v28 = vadd.f32 %v8003_v30, %v7691_v45 }
 0x7e8   :  { %v7795_v5 = vadd.f32 %v4010_v6, %v4009_v25  ;;  %v3997_v29 = vadd.f32 %v6797_v43, %v3996_v37 }
 0x7ea   :  { %6800 = vtanh.f32 %v7795_v5  ;;  %v4001_v56 = vsel %vm4000_vm2, %v6797_v43, %v3997_v29  ;;  %v3349_v43 = vadd.f32 %v8004_v16, %v7693_v53 }
 0x7eb   :  { %v4006_v14 = vsel %vm4003_vm3, %v4005_v8, %v4001_v56 }
 0x7f0   :  { %v6801_v58 = vpop.eup %6800 }
 0x7f1   :  { %v4013_v40 = vmul.f32 %v6801_v58, %v4006_v14 }
 0x7f3   :  { %v4018_v46 = vpack.c.bf16 %v4013_v40, %v4013_v40  ;;  %v8006_v40 = vld [vmem:[#allocation30_spill] sm:$0xff] }
 0x7f5   :  { %4027 = vmatmul.bf16.vlgmr.msrb.gmra.mxu0 %v4018_v46  ;;  %4040 = vmatmul.bf16.vlgmr.msrb.gmra.mxu1 %v4018_v46 }
 0x7f6   :  { %4053 = vmatmul.bf16.vlgmr.msrb.gmra.mxu2 %v4018_v46  ;;  %4066 = vmatmul.bf16.vlgmr.msrb.gmra.mxu3 %v4018_v46  ;;  %v3407_v46 = vadd.f32 %v8006_v40, %v7997_v9 }
 0x7f7   :  { %4267 = vmatpush.bf16.msrb.mxu0 %v7416_v59  ;;  %4280 = vmatpush.bf16.msrb.mxu1 %v7418_v60 }
 0x7f8   :  { %4293 = vmatpush.bf16.msrb.mxu2 %v7426_v61  ;;  %4306 = vmatpush.bf16.msrb.mxu3 %v7429_v24 }
 0x7fb   :  { %4268 = vmatpush.bf16.msrb.mxu0 %v7436_v38  ;;  %4281 = vmatpush.bf16.msrb.mxu1 %v7438_v12 }
 0x7fc   :  { %4294 = vmatpush.bf16.msrb.mxu2 %v7440_v44  ;;  %4307 = vmatpush.bf16.msrb.mxu3 %v7455_v27 }
 0x7ff   :  { %4269 = vmatpush.bf16.msrb.mxu0 %v7445_v39  ;;  %4282 = vmatpush.bf16.msrb.mxu1 %v7449_v17 }
 0x800   :  { %4295 = vmatpush.bf16.msrb.mxu2 %v7451_v10  ;;  %4308 = vmatpush.bf16.msrb.mxu3 %v7467_v7 }
 0x803   :  { %4270 = vmatpush.bf16.msrb.mxu0 %v7458_v20  ;;  %4283 = vmatpush.bf16.msrb.mxu1 %v7462_v15 }
 0x804   :  { %4296 = vmatpush.bf16.msrb.mxu2 %v7464_v2  ;;  %4309 = vmatpush.bf16.msrb.mxu3 %v7484_v1 }
 0x807   :  { %4271 = vmatpush.bf16.msrb.mxu0 %v7472_v54  ;;  %4284 = vmatpush.bf16.msrb.mxu1 %v7478_v63 }
 0x808   :  { %4297 = vmatpush.bf16.msrb.mxu2 %v7480_v0  ;;  %4310 = vmatpush.bf16.msrb.mxu3 %v7499_v32 }
 0x80b   :  { %4272 = vmatpush.bf16.msrb.mxu0 %v7488_v62  ;;  %4285 = vmatpush.bf16.msrb.mxu1 %v7492_v50 }
 0x80c   :  { %4298 = vmatpush.bf16.msrb.mxu2 %v7494_v11  ;;  %4311 = vmatpush.bf16.msrb.mxu3 %v7525_v55 }
 0x80f   :  { %4273 = vmatpush.bf16.msrb.mxu0 %v7507_v36  ;;  %4286 = vmatpush.bf16.msrb.mxu1 %v7516_v33 }
 0x810   :  { %4299 = vmatpush.bf16.msrb.mxu2 %v7518_v31  ;;  %4312 = vmatpush.bf16.msrb.mxu3 %v7541_v19 }
 0x813   :  { %4274 = vmatpush.bf16.msrb.mxu0 %v7537_v13  ;;  %4287 = vmatpush.bf16.msrb.mxu1 %v7539_v41 }
 0x814   :  { %4300 = vmatpush.bf16.msrb.mxu2 %v7545_v23  ;;  %4313 = vmatpush.bf16.msrb.mxu3 %v7560_v49 }
 0x872   :  { %v4028_v48 = vpop.f32.mrf.mxu0  ;;  %v4041_v34 = vpop.f32.mrf.mxu1 }
 0x873   :  { %v4071_v21 = vadd.f32 %v4028_v48, %v3320_v28  ;;  %v4072_v52 = vadd.f32 %v4041_v34, %v3349_v43 }
 0x875   :  { %v6201_v47 = vmul.f32 -1.442695, %v4071_v21  ;;  %v6202_v22 = vmul.f32 -1.442695, %v4072_v52 }
 0x877   :  { %6802 = vpow2.f32 %v6201_v47 }
 0x878   :  { %6804 = vpow2.f32 %v6202_v22 }
 0x879   :  { %v4054_v4 = vpop.f32.mrf.mxu2  ;;  %v4067_v3 = vpop.f32.mrf.mxu3 }
 0x87a   :  { %v4073_v57 = vadd.f32 %v4054_v4, %v3378_v18  ;;  %v4030_v6 = vpop.f32.mrf.mxu0  ;;  %v4043_v37 = vpop.f32.mrf.mxu1  ;;  %v4074_v16 = vadd.f32 %v4067_v3, %v3407_v46 }
 0x87c   :  { %v6203_v25 = vmul.f32 -1.442695, %v4073_v57 }
 0x87d   :  { %v6803_v29 = vpop.eup %6802 }
 0x87e   :  { %v6805_v51 = vpop.eup %6804  ;;  %v4084_v26 = vadd.f32 1.0, %v6803_v29  ;;  %6806 = vpow2.f32 %v6203_v25 }
 0x87f   :  { %v4085_v56 = vadd.f32 1.0, %v6805_v51 }
 0x880   :  { %6808 = vrcp.f32 %v4084_v26  ;;  %v4098_v47 = vand.u32 2147483648, %v4084_v26  ;;  %v4096_v18 = vand.u32 2147483647, %v4084_v26  ;;  %vm4092_vm6 = vweird.f32 %v4084_v26 }
 0x881   :  { %6810 = vrcp.f32 %v4085_v56  ;;  %v4056_v8 = vpop.f32.mrf.mxu2  ;;  %v4069_v58 = vpop.f32.mrf.mxu3  ;;  %v4113_v22 = vand.u32 2147483648, %v4085_v56  ;;  %v4111_v57 = vand.u32 2147483647, %v4085_v56  ;;  %vm4107_vm7 = vweird.f32 %v4085_v56 }
 0x882   :  { %v4099_v25 = vor.u32 1.1754944e-38, %v4098_v47  ;;  %vm4097_vm10 = vcmp.eq.f32.partialorder %v4096_v18, 8.507059e+37 }
 0x883   :  { %v4114_v51 = vor.u32 1.1754944e-38, %v4113_v22  ;;  %vm4112_vm11 = vcmp.eq.f32.partialorder %v4111_v57, 8.507059e+37  ;;  %v8008_v57 = vld [vmem:[#allocation32_spill] sm:$0xff] }
 0x884   :  { %v6807_v14 = vpop.eup %6806 }
 0x885   :  { %v4086_v30 = vadd.f32 1.0, %v6807_v14 }
 0x886   :  { %v6809_v28 = vpop.eup %6808 }
 0x887   :  { %v6811_v43 = vpop.eup %6810  ;;  %v4088_v48 = vmul.f32 %v6809_v28, %v4084_v26  ;;  %6812 = vrcp.f32 %v4086_v30  ;;  %vm4093_vm4 = vweird.f32 %v6809_v28  ;;  %vm4122_vm13 = vweird.f32 %v4086_v30 }
 0x888   :  { %v4103_v34 = vmul.f32 %v6811_v43, %v4085_v56  ;;  %6814 = vtanh.f32 %v4074_v16  ;;  %vm4108_vm5 = vweird.f32 %v6811_v43  ;;  %vm4094_vm8 = vmor %vm4092_vm6, %vm4093_vm4 }
 0x889   :  { %v4089_v21 = vsub.f32 1.0, %v4088_v48  ;;  %vm4109_vm9 = vmor %vm4107_vm7, %vm4108_vm5 }
 0x88a   :  { %v4104_v52 = vsub.f32 1.0, %v4103_v34 }
 0x88b   :  { %v4090_v35 = vmul.f32 %v6809_v28, %v4089_v21 }
 0x88c   :  { %v4105_v4 = vmul.f32 %v6811_v43, %v4104_v52  ;;  %v4128_v52 = vand.u32 2147483648, %v4086_v30 }
 0x88d   :  { %v6813_v6 = vpop.eup %6812  ;;  %v4091_v37 = vadd.f32 %v6809_v28, %v4090_v35 }
 0x88e   :  { %v4118_v3 = vmul.f32 %v6813_v6, %v4086_v30  ;;  %v4106_v29 = vadd.f32 %v6811_v43, %v4105_v4  ;;  %v6815_v58 = vpop.eup %6814  ;;  %vm4123_vm12 = vweird.f32 %v6813_v6  ;;  %v4129_v22 = vor.u32 1.1754944e-38, %v4128_v52 }
 0x88f   :  { %v4095_v8 = vsel %vm4094_vm8, %v6809_v28, %v4091_v37  ;;  %v4126_v28 = vand.u32 2147483647, %v4086_v30  ;;  %vm4124_vm14 = vmor %vm4122_vm13, %vm4123_vm12 }
 0x890   :  { %v4119_v14 = vsub.f32 1.0, %v4118_v3  ;;  %v4100_v40 = vsel %vm4097_vm10, %v4099_v25, %v4095_v8  ;;  %v4110_v46 = vsel %vm4109_vm9, %v6811_v43, %v4106_v29 }
 0x891   :  { %v4115_v16 = vsel %vm4112_vm11, %v4114_v51, %v4110_v46  ;;  %v4134_v48 = vmul.f32 %v6815_v58, %v4100_v40  ;;  %vm4127_vm15 = vcmp.eq.f32.partialorder %v4126_v28, 8.507059e+37  ;;  %v8009_v58 = vld [vmem:[#allocation33_spill] sm:$0xff] }
 0x892   :  { %v4120_v34 = vmul.f32 %v6813_v6, %v4119_v14  ;;  %v4133_v21 = vmul.f32 %v4115_v16, %v7795_v5  ;;  %v8007_v5 = vld [vmem:[#allocation31_spill] sm:$0xff]  ;;  %v3381_v14 = vadd.f32 %v8009_v58, %v7701_v42 }
 0x893   :  { %v3323_v30 = vadd.f32 %v8007_v5, %v7691_v45 }
 0x894   :  { %v7839_v26 = vadd.f32 %v4134_v48, %v4133_v21  ;;  %v4121_v56 = vadd.f32 %v6813_v6, %v4120_v34 }
 0x896   :  { %6816 = vtanh.f32 %v7839_v26  ;;  %v4125_v47 = vsel %vm4124_vm14, %v6813_v6, %v4121_v56  ;;  %v3352_v6 = vadd.f32 %v8008_v57, %v7693_v53 }
 0x897   :  { %v4130_v35 = vsel %vm4127_vm15, %v4129_v22, %v4125_v47 }
 0x89c   :  { %v6817_v43 = vpop.eup %6816 }
 0x89d   :  { %v4137_v18 = vmul.f32 %v6817_v43, %v4130_v35 }
 0x89f   :  { %v4142_v4 = vpack.c.bf16 %v4137_v18, %v4137_v18  ;;  %v8010_v18 = vld [vmem:[#allocation34_spill] sm:$0xff] }
 0x8a1   :  { %4151 = vmatmul.bf16.vlgmr.msra.gmra.mxu0 %v4142_v4  ;;  %4164 = vmatmul.bf16.vlgmr.msra.gmra.mxu1 %v4142_v4 }
 0x8a2   :  { %4177 = vmatmul.bf16.vlgmr.msra.gmra.mxu2 %v4142_v4  ;;  %4190 = vmatmul.bf16.vlgmr.msra.gmra.mxu3 %v4142_v4  ;;  %v3410_v4 = vadd.f32 %v8010_v18, %v7997_v9 }
 0x8a3   :  { %4391 = vmatpush.bf16.msra.mxu0 %v7416_v59  ;;  %4404 = vmatpush.bf16.msra.mxu1 %v7418_v60 }
 0x8a4   :  { %4417 = vmatpush.bf16.msra.mxu2 %v7426_v61  ;;  %4430 = vmatpush.bf16.msra.mxu3 %v7429_v24 }
 0x8a7   :  { %4392 = vmatpush.bf16.msra.mxu0 %v7436_v38  ;;  %4405 = vmatpush.bf16.msra.mxu1 %v7438_v12 }
 0x8a8   :  { %4418 = vmatpush.bf16.msra.mxu2 %v7440_v44  ;;  %4431 = vmatpush.bf16.msra.mxu3 %v7455_v27 }
 0x8ab   :  { %4393 = vmatpush.bf16.msra.mxu0 %v7445_v39  ;;  %4406 = vmatpush.bf16.msra.mxu1 %v7449_v17 }
 0x8ac   :  { %4419 = vmatpush.bf16.msra.mxu2 %v7451_v10  ;;  %4432 = vmatpush.bf16.msra.mxu3 %v7467_v7 }
 0x8af   :  { %4394 = vmatpush.bf16.msra.mxu0 %v7458_v20  ;;  %4407 = vmatpush.bf16.msra.mxu1 %v7462_v15 }
 0x8b0   :  { %4420 = vmatpush.bf16.msra.mxu2 %v7464_v2  ;;  %4433 = vmatpush.bf16.msra.mxu3 %v7484_v1 }
 0x8b3   :  { %4395 = vmatpush.bf16.msra.mxu0 %v7472_v54  ;;  %4408 = vmatpush.bf16.msra.mxu1 %v7478_v63 }
 0x8b4   :  { %4421 = vmatpush.bf16.msra.mxu2 %v7480_v0  ;;  %4434 = vmatpush.bf16.msra.mxu3 %v7499_v32 }
 0x8b7   :  { %4396 = vmatpush.bf16.msra.mxu0 %v7488_v62  ;;  %4409 = vmatpush.bf16.msra.mxu1 %v7492_v50 }
 0x8b8   :  { %4422 = vmatpush.bf16.msra.mxu2 %v7494_v11  ;;  %4435 = vmatpush.bf16.msra.mxu3 %v7525_v55 }
 0x8bb   :  { %4397 = vmatpush.bf16.msra.mxu0 %v7507_v36  ;;  %4410 = vmatpush.bf16.msra.mxu1 %v7516_v33 }
 0x8bc   :  { %4423 = vmatpush.bf16.msra.mxu2 %v7518_v31  ;;  %4436 = vmatpush.bf16.msra.mxu3 %v7541_v19 }
 0x8bf   :  { %4398 = vmatpush.bf16.msra.mxu0 %v7537_v13  ;;  %4411 = vmatpush.bf16.msra.mxu1 %v7539_v41 }
 0x8c0   :  { %4424 = vmatpush.bf16.msra.mxu2 %v7545_v23  ;;  %4437 = vmatpush.bf16.msra.mxu3 %v7560_v49 }
 0x91e   :  { %v4152_v37 = vpop.f32.mrf.mxu0  ;;  %v4165_v3 = vpop.f32.mrf.mxu1 }
 0x91f   :  { %v4195_v25 = vadd.f32 %v4152_v37, %v3323_v30  ;;  %v4196_v29 = vadd.f32 %v4165_v3, %v3352_v6 }
 0x921   :  { %v6204_v51 = vmul.f32 -1.442695, %v4195_v25  ;;  %v6205_v8 = vmul.f32 -1.442695, %v4196_v29 }
 0x923   :  { %6818 = vpow2.f32 %v6204_v51 }
 0x924   :  { %6820 = vpow2.f32 %v6205_v8 }
 0x925   :  { %v4178_v40 = vpop.f32.mrf.mxu2  ;;  %v4191_v46 = vpop.f32.mrf.mxu3 }
 0x926   :  { %v4197_v16 = vadd.f32 %v4178_v40, %v3381_v14  ;;  %v4154_v48 = vpop.f32.mrf.mxu0  ;;  %v4167_v34 = vpop.f32.mrf.mxu1  ;;  %v4198_v57 = vadd.f32 %v4191_v46, %v3410_v4 }
 0x928   :  { %v6206_v21 = vmul.f32 -1.442695, %v4197_v16 }
 0x929   :  { %v6819_v56 = vpop.eup %6818 }
 0x92a   :  { %v6821_v52 = vpop.eup %6820  ;;  %v4208_v28 = vadd.f32 1.0, %v6819_v56  ;;  %6822 = vpow2.f32 %v6206_v21 }
 0x92b   :  { %v4209_v47 = vadd.f32 1.0, %v6821_v52 }
 0x92c   :  { %6824 = vrcp.f32 %v4208_v28  ;;  %v4222_v51 = vand.u32 2147483648, %v4208_v28  ;;  %v4220_v14 = vand.u32 2147483647, %v4208_v28  ;;  %vm4216_vm2 = vweird.f32 %v4208_v28 }
 0x92d   :  { %6826 = vrcp.f32 %v4209_v47  ;;  %v4180_v22 = vpop.f32.mrf.mxu2  ;;  %v4193_v43 = vpop.f32.mrf.mxu3  ;;  %v4237_v8 = vand.u32 2147483648, %v4209_v47  ;;  %v4235_v16 = vand.u32 2147483647, %v4209_v47  ;;  %vm4231_vm3 = vweird.f32 %v4209_v47 }
 0x92e   :  { %v4223_v21 = vor.u32 1.1754944e-38, %v4222_v51  ;;  %vm4221_vm6 = vcmp.eq.f32.partialorder %v4220_v14, 8.507059e+37 }
 0x92f   :  { %v4238_v52 = vor.u32 1.1754944e-38, %v4237_v8  ;;  %vm4236_vm7 = vcmp.eq.f32.partialorder %v4235_v16, 8.507059e+37 }
 0x930   :  { %v6823_v35 = vpop.eup %6822 }
 0x931   :  { %v4210_v5 = vadd.f32 1.0, %v6823_v35 }
 0x932   :  { %v6825_v30 = vpop.eup %6824 }
 0x933   :  { %v6827_v6 = vpop.eup %6826  ;;  %v4212_v37 = vmul.f32 %v6825_v30, %v4208_v28  ;;  %6828 = vrcp.f32 %v4210_v5  ;;  %vm4217_vm0 = vweird.f32 %v6825_v30  ;;  %vm4246_vm9 = vweird.f32 %v4210_v5 }
 0x934   :  { %v4227_v3 = vmul.f32 %v6827_v6, %v4209_v47  ;;  %6830 = vtanh.f32 %v4198_v57  ;;  %vm4232_vm1 = vweird.f32 %v6827_v6  ;;  %vm4218_vm4 = vmor %vm4216_vm2, %vm4217_vm0 }
 0x935   :  { %v4213_v25 = vsub.f32 1.0, %v4212_v37  ;;  %vm4233_vm5 = vmor %vm4231_vm3, %vm4232_vm1 }
 0x936   :  { %v4228_v29 = vsub.f32 1.0, %v4227_v3 }
 0x937   :  { %v4214_v58 = vmul.f32 %v6825_v30, %v4213_v25 }
 0x938   :  { %v4229_v40 = vmul.f32 %v6827_v6, %v4228_v29  ;;  %v4252_v29 = vand.u32 2147483648, %v4210_v5 }
 0x939   :  { %v6829_v48 = vpop.eup %6828  ;;  %v4215_v34 = vadd.f32 %v6825_v30, %v4214_v58 }
 0x93a   :  { %v4242_v46 = vmul.f32 %v6829_v48, %v4210_v5  ;;  %v4230_v56 = vadd.f32 %v6827_v6, %v4229_v40  ;;  %v6831_v43 = vpop.eup %6830  ;;  %vm4247_vm8 = vweird.f32 %v6829_v48  ;;  %v4253_v8 = vor.u32 1.1754944e-38, %v4252_v29 }
 0x93b   :  { %v4219_v22 = vsel %vm4218_vm4, %v6825_v30, %v4215_v34  ;;  %v4250_v30 = vand.u32 2147483647, %v4210_v5  ;;  %vm4248_vm10 = vmor %vm4246_vm9, %vm4247_vm8 }
 0x93c   :  { %v4243_v35 = vsub.f32 1.0, %v4242_v46  ;;  %v4224_v18 = vsel %vm4221_vm6, %v4223_v21, %v4219_v22  ;;  %v4234_v4 = vsel %vm4233_vm5, %v6827_v6, %v4230_v56 }
 0x93d   :  { %v4239_v57 = vsel %vm4236_vm7, %v4238_v52, %v4234_v4  ;;  %v4258_v37 = vmul.f32 %v6831_v43, %v4224_v18  ;;  %vm4251_vm11 = vcmp.eq.f32.partialorder %v4250_v30, 8.507059e+37 }
 0x93e   :  { %v4244_v3 = vmul.f32 %v6829_v48, %v4243_v35  ;;  %v4257_v25 = vmul.f32 %v4239_v57, %v7839_v26 }
 0x940   :  { %v7883_v28 = vadd.f32 %v4258_v37, %v4257_v25  ;;  %v4245_v47 = vadd.f32 %v6829_v48, %v4244_v3 }
 0x942   :  { %6832 = vtanh.f32 %v7883_v28  ;;  %v4249_v51 = vsel %vm4248_vm10, %v6829_v48, %v4245_v47 }
 0x943   :  { %v4254_v58 = vsel %vm4251_vm11, %v4253_v8, %v4249_v51 }
 0x948   :  { %v6833_v6 = vpop.eup %6832 }
 0x949   :  { %v4261_v14 = vmul.f32 %v6833_v6, %v4254_v58 }
 0x94b   :  { %v4266_v40 = vpack.c.bf16 %v4261_v14, %v4261_v14 }
 0x94d   :  { %4275 = vmatmul.bf16.vlgmr.msrb.gmra.mxu0 %v4266_v40  ;;  %4288 = vmatmul.bf16.vlgmr.msrb.gmra.mxu1 %v4266_v40 }
 0x94e   :  { %4301 = vmatmul.bf16.vlgmr.msrb.gmra.mxu2 %v4266_v40  ;;  %4314 = vmatmul.bf16.vlgmr.msrb.gmra.mxu3 %v4266_v40 }
 0x94f   :  { %4515 = vmatpush.bf16.msrb.mxu0 %v7416_v59  ;;  %4528 = vmatpush.bf16.msrb.mxu1 %v7418_v60  ;;  %v8011_v59 = vld [vmem:[#allocation35_spill] sm:$0xff] }
 0x950   :  { %4541 = vmatpush.bf16.msrb.mxu2 %v7426_v61  ;;  %4554 = vmatpush.bf16.msrb.mxu3 %v7429_v24  ;;  %v3325_v60 = vadd.f32 %v8011_v59, %v7691_v45  ;;  %v8012_v61 = vld [vmem:[#allocation36_spill] sm:$0xff] }
 0x951   :  { %v3354_v24 = vadd.f32 %v8012_v61, %v7693_v53 }
 0x953   :  { %4516 = vmatpush.bf16.msrb.mxu0 %v7436_v38  ;;  %4529 = vmatpush.bf16.msrb.mxu1 %v7438_v12 }
 0x954   :  { %4542 = vmatpush.bf16.msrb.mxu2 %v7440_v44  ;;  %4555 = vmatpush.bf16.msrb.mxu3 %v7455_v27  ;;  %v8013_v27 = vld [vmem:[#allocation37_spill] sm:$0xff] }
 0x957   :  { %4517 = vmatpush.bf16.msrb.mxu0 %v7445_v39  ;;  %4530 = vmatpush.bf16.msrb.mxu1 %v7449_v17 }
 0x958   :  { %4543 = vmatpush.bf16.msrb.mxu2 %v7451_v10  ;;  %4556 = vmatpush.bf16.msrb.mxu3 %v7467_v7 }
 0x95b   :  { %4518 = vmatpush.bf16.msrb.mxu0 %v7458_v20  ;;  %4531 = vmatpush.bf16.msrb.mxu1 %v7462_v15  ;;  %v3383_v20 = vadd.f32 %v8013_v27, %v7701_v42 }
 0x95c   :  { %4544 = vmatpush.bf16.msrb.mxu2 %v7464_v2  ;;  %4557 = vmatpush.bf16.msrb.mxu3 %v7484_v1 }
 0x95f   :  { %4519 = vmatpush.bf16.msrb.mxu0 %v7472_v54  ;;  %4532 = vmatpush.bf16.msrb.mxu1 %v7478_v63 }
 0x960   :  { %4545 = vmatpush.bf16.msrb.mxu2 %v7480_v0  ;;  %4558 = vmatpush.bf16.msrb.mxu3 %v7499_v32 }
 0x963   :  { %4520 = vmatpush.bf16.msrb.mxu0 %v7488_v62  ;;  %4533 = vmatpush.bf16.msrb.mxu1 %v7492_v50 }
 0x964   :  { %4546 = vmatpush.bf16.msrb.mxu2 %v7494_v11  ;;  %4559 = vmatpush.bf16.msrb.mxu3 %v7525_v55 }
 0x967   :  { %4521 = vmatpush.bf16.msrb.mxu0 %v7507_v36  ;;  %4534 = vmatpush.bf16.msrb.mxu1 %v7516_v33 }
 0x968   :  { %4547 = vmatpush.bf16.msrb.mxu2 %v7518_v31  ;;  %4560 = vmatpush.bf16.msrb.mxu3 %v7541_v19  ;;  %v8014_v31 = vld [vmem:[#allocation38_spill] sm:$0xff] }
 0x969   :  { %v3412_v55 = vadd.f32 %v8014_v31, %v7997_v9 }
 0x96b   :  { %4522 = vmatpush.bf16.msrb.mxu0 %v7537_v13  ;;  %4535 = vmatpush.bf16.msrb.mxu1 %v7539_v41 }
 0x96c   :  { %4548 = vmatpush.bf16.msrb.mxu2 %v7545_v23  ;;  %4561 = vmatpush.bf16.msrb.mxu3 %v7560_v49 }
 0x9ca   :  { %v4276_v38 = vpop.f32.mrf.mxu0  ;;  %v4289_v12 = vpop.f32.mrf.mxu1 }
 0x9cb   :  { %v4319_v44 = vadd.f32 %v4276_v38, %v3325_v60  ;;  %v4320_v39 = vadd.f32 %v4289_v12, %v3354_v24 }
 0x9cd   :  { %v6207_v17 = vmul.f32 -1.442695, %v4319_v44  ;;  %v6208_v10 = vmul.f32 -1.442695, %v4320_v39 }
 0x9cf   :  { %6834 = vpow2.f32 %v6207_v17  ;;  %v8016_v17 = vld [vmem:[#allocation40_spill] sm:$0xff] }
 0x9d0   :  { %6836 = vpow2.f32 %v6208_v10  ;;  %v3357_v10 = vadd.f32 %v8016_v17, %v7693_v53 }
 0x9d1   :  { %v4302_v15 = vpop.f32.mrf.mxu2  ;;  %v4315_v2 = vpop.f32.mrf.mxu3 }
 0x9d2   :  { %v4321_v7 = vadd.f32 %v4302_v15, %v3383_v20  ;;  %v4278_v54 = vpop.f32.mrf.mxu0  ;;  %v4291_v63 = vpop.f32.mrf.mxu1  ;;  %v4322_v19 = vadd.f32 %v4315_v2, %v3412_v55 }
 0x9d3   :  { %v8017_v63 = vld [vmem:[#allocation41_spill] sm:$0xff] }
 0x9d4   :  { %v6209_v0 = vmul.f32 -1.442695, %v4321_v7 }
 0x9d5   :  { %v6835_v1 = vpop.eup %6834 }
 0x9d6   :  { %v6837_v62 = vpop.eup %6836  ;;  %v4332_v50 = vadd.f32 1.0, %v6835_v1  ;;  %6838 = vpow2.f32 %v6209_v0  ;;  %v3386_v0 = vadd.f32 %v8017_v63, %v7701_v42  ;;  %v8019_v63 = vld [vmem:[#allocation43_spill] sm:$0xff] }
 0x9d7   :  { %v4333_v11 = vadd.f32 1.0, %v6837_v62 }
 0x9d8   :  { %6840 = vrcp.f32 %v4332_v50  ;;  %v4346_v48 = vand.u32 2147483648, %v4332_v50  ;;  %v4344_v21 = vand.u32 2147483647, %v4332_v50  ;;  %vm4340_vm14 = vweird.f32 %v4332_v50 }
 0x9d9   :  { %6842 = vrcp.f32 %v4333_v11  ;;  %v4304_v32 = vpop.f32.mrf.mxu2  ;;  %v4317_v36 = vpop.f32.mrf.mxu3  ;;  %v4361_v34 = vand.u32 2147483648, %v4333_v11  ;;  %v4359_v52 = vand.u32 2147483647, %v4333_v11  ;;  %vm4355_vm15 = vweird.f32 %v4333_v11 }
 0x9da   :  { %v4347_v18 = vor.u32 1.1754944e-38, %v4346_v48  ;;  %vm4345_vm2 = vcmp.eq.f32.partialorder %v4344_v21, 8.507059e+37 }
 0x9db   :  { %v4362_v57 = vor.u32 1.1754944e-38, %v4361_v34  ;;  %vm4360_vm3 = vcmp.eq.f32.partialorder %v4359_v52, 8.507059e+37 }
 0x9dc   :  { %v6839_v33 = vpop.eup %6838 }
 0x9dd   :  { %v4334_v13 = vadd.f32 1.0, %v6839_v33 }
 0x9de   :  { %v6841_v41 = vpop.eup %6840 }
 0x9df   :  { %v6843_v23 = vpop.eup %6842  ;;  %v4336_v49 = vmul.f32 %v6841_v41, %v4332_v50  ;;  %6844 = vrcp.f32 %v4334_v13  ;;  %vm4341_vm12 = vweird.f32 %v6841_v41  ;;  %v4376_v40 = vand.u32 2147483648, %v4334_v13 }
 0x9e0   :  { %v4351_v26 = vmul.f32 %v6843_v23, %v4333_v11  ;;  %6846 = vtanh.f32 %v4322_v19  ;;  %vm4356_vm13 = vweird.f32 %v6843_v23  ;;  %vm4342_vm0 = vmor %vm4340_vm14, %vm4341_vm12  ;;  %vm4370_vm5 = vweird.f32 %v4334_v13 }
 0x9e1   :  { %v4337_v5 = vsub.f32 1.0, %v4336_v49  ;;  %vm4357_vm1 = vmor %vm4355_vm15, %vm4356_vm13  ;;  %v4374_v59 = vand.u32 2147483647, %v4334_v13  ;;  %v4377_v61 = vor.u32 1.1754944e-38, %v4376_v40  ;;  %v8018_v49 = vld [vmem:[#allocation42_spill] sm:$0xff] }
 0x9e2   :  { %v4352_v16 = vsub.f32 1.0, %v4351_v26  ;;  %v3415_v26 = vadd.f32 %v8018_v49, %v7997_v9 }
 0x9e3   :  { %v4338_v46 = vmul.f32 %v6841_v41, %v4337_v5  ;;  %vm4375_vm7 = vcmp.eq.f32.partialorder %v4374_v59, 8.507059e+37 }
 0x9e4   :  { %v4353_v56 = vmul.f32 %v6843_v23, %v4352_v16 }
 0x9e5   :  { %v6845_v22 = vpop.eup %6844  ;;  %v4339_v43 = vadd.f32 %v6841_v41, %v4338_v46 }
 0x9e6   :  { %v4366_v35 = vmul.f32 %v6845_v22, %v4334_v13  ;;  %v4354_v4 = vadd.f32 %v6843_v23, %v4353_v56  ;;  %v6847_v3 = vpop.eup %6846  ;;  %vm4371_vm4 = vweird.f32 %v6845_v22 }
 0x9e7   :  { %v4343_v37 = vsel %vm4342_vm0, %v6841_v41, %v4339_v43  ;;  %vm4372_vm6 = vmor %vm4370_vm5, %vm4371_vm4 }
 0x9e8   :  { %v4367_v25 = vsub.f32 1.0, %v4366_v35  ;;  %v4348_v47 = vsel %vm4345_vm2, %v4347_v18, %v4343_v37  ;;  %v4358_v29 = vsel %vm4357_vm1, %v6843_v23, %v4354_v4 }
 0x9e9   :  { %v4363_v30 = vsel %vm4360_vm3, %v4362_v57, %v4358_v29  ;;  %v4382_v51 = vmul.f32 %v6847_v3, %v4348_v47 }
 0x9ea   :  { %v4368_v8 = vmul.f32 %v6845_v22, %v4367_v25  ;;  %v4381_v6 = vmul.f32 %v4363_v30, %v7883_v28  ;;  %v8015_v28 = vld [vmem:[#allocation39_spill] sm:$0xff] }
 0x9eb   :  { %v3328_v39 = vadd.f32 %v8015_v28, %v7691_v45 }
 0x9ec   :  { %v7927_v58 = vadd.f32 %v4382_v51, %v4381_v6  ;;  %v4369_v14 = vadd.f32 %v6845_v22, %v4368_v8 }
 0x9ee   :  { %6848 = vtanh.f32 %v7927_v58  ;;  %v4373_v60 = vsel %vm4372_vm6, %v6845_v22, %v4369_v14 }
 0x9ef   :  { %v4378_v38 = vsel %vm4375_vm7, %v4377_v61, %v4373_v60 }
 0x9f4   :  { %v6849_v24 = vpop.eup %6848 }
 0x9f5   :  { %v4385_v12 = vmul.f32 %v6849_v24, %v4378_v38 }
 0x9f7   :  { %v4390_v44 = vpack.c.bf16 %v4385_v12, %v4385_v12 }
 0x9f9   :  { %4399 = vmatmul.bf16.vlgmr.msra.gmra.mxu0 %v4390_v44  ;;  %4412 = vmatmul.bf16.vlgmr.msra.gmra.mxu1 %v4390_v44 }
 0x9fa   :  { %4425 = vmatmul.bf16.vlgmr.msra.gmra.mxu2 %v4390_v44  ;;  %4438 = vmatmul.bf16.vlgmr.msra.gmra.mxu3 %v4390_v44 }
 0xa76   :  { %v4400_v27 = vpop.f32.mrf.mxu0  ;;  %v4413_v20 = vpop.f32.mrf.mxu1 }
 0xa77   :  { %v4443_v15 = vadd.f32 %v4400_v27, %v3328_v39  ;;  %v4444_v2 = vadd.f32 %v4413_v20, %v3357_v10 }
 0xa79   :  { %v6210_v7 = vmul.f32 -1.442695, %v4443_v15  ;;  %v6211_v54 = vmul.f32 -1.442695, %v4444_v2  ;;  %v6610_v2 = vld [vmem:[#allocation15 + $0x30] sm:$0xff] }
 0xa7b   :  { %6850 = vpow2.f32 %v6210_v7  ;;  %v6609_v7 = vld [vmem:[#allocation15 + $0x28] sm:$0xff] }
 0xa7c   :  { %6852 = vpow2.f32 %v6211_v54  ;;  %v6608_v54 = vld [vmem:[#allocation15 + $0x20] sm:$0xff] }
 0xa7d   :  { %v4426_v1 = vpop.f32.mrf.mxu2  ;;  %v4439_v62 = vpop.f32.mrf.mxu3 }
 0xa7e   :  { %v4445_v50 = vadd.f32 %v4426_v1, %v3386_v0  ;;  %v4402_v11 = vpop.f32.mrf.mxu0  ;;  %v4415_v32 = vpop.f32.mrf.mxu1  ;;  %v4446_v48 = vadd.f32 %v4439_v62, %v3415_v26  ;;  %v3330_v0 = vadd.f32 %v8019_v63, %v7691_v45  ;;  %v8020_v1 = vld [vmem:[#allocation44_spill] sm:$0xff] }
 0xa7f   :  { %v3359_v62 = vadd.f32 %v8020_v1, %v7693_v53 }
 0xa80   :  { %v6212_v36 = vmul.f32 -1.442695, %v4445_v50  ;;  %v6607_v50 = vld [vmem:[#allocation15 + $0x18] sm:$0xff] }
 0xa81   :  { %v6851_v33 = vpop.eup %6850 }
 0xa82   :  { %v6853_v31 = vpop.eup %6852  ;;  %v4456_v55 = vadd.f32 1.0, %v6851_v33  ;;  %6854 = vpow2.f32 %v6212_v36 }
 0xa83   :  { %v4457_v13 = vadd.f32 1.0, %v6853_v31 }
 0xa84   :  { %6856 = vrcp.f32 %v4456_v55  ;;  %v4470_v22 = vand.u32 2147483648, %v4456_v55  ;;  %v4468_v18 = vand.u32 2147483647, %v4456_v55  ;;  %vm4464_vm10 = vweird.f32 %v4456_v55 }
 0xa85   :  { %6858 = vrcp.f32 %v4457_v13  ;;  %v4428_v41 = vpop.f32.mrf.mxu2  ;;  %v4441_v19 = vpop.f32.mrf.mxu3  ;;  %v4485_v43 = vand.u32 2147483648, %v4457_v13  ;;  %v4483_v57 = vand.u32 2147483647, %v4457_v13  ;;  %vm4479_vm11 = vweird.f32 %v4457_v13 }
 0xa86   :  { %v4471_v47 = vor.u32 1.1754944e-38, %v4470_v22  ;;  %vm4469_vm14 = vcmp.eq.f32.partialorder %v4468_v18, 8.507059e+37  ;;  %v6605_v41 = vld [vmem:[#allocation15 + $0x8] sm:$0xff]  ;;  %v8021_v19 = vld [vmem:[#allocation45_spill] sm:$0xff] }
 0xa87   :  { %v4486_v30 = vor.u32 1.1754944e-38, %v4485_v43  ;;  %vm4484_vm15 = vcmp.eq.f32.partialorder %v4483_v57, 8.507059e+37  ;;  %v8022_v43 = vld [vmem:[#allocation46_spill] sm:$0xff] }
 0xa88   :  { %v6855_v23 = vpop.eup %6854 }
 0xa89   :  { %v4458_v5 = vadd.f32 1.0, %v6855_v23  ;;  %v3388_v23 = vadd.f32 %v8021_v19, %v7701_v42 }
 0xa8a   :  { %v6857_v16 = vpop.eup %6856 }
 0xa8b   :  { %v6859_v34 = vpop.eup %6858  ;;  %v4460_v46 = vmul.f32 %v6857_v16, %v4456_v55  ;;  %6860 = vrcp.f32 %v4458_v5  ;;  %vm4465_vm8 = vweird.f32 %v6857_v16  ;;  %v4500_v44 = vand.u32 2147483648, %v4458_v5 }
 0xa8c   :  { %v4475_v21 = vmul.f32 %v6859_v34, %v4457_v13  ;;  %6862 = vtanh.f32 %v4446_v48  ;;  %vm4480_vm9 = vweird.f32 %v6859_v34  ;;  %vm4466_vm12 = vmor %vm4464_vm10, %vm4465_vm8  ;;  %vm4494_vm1 = vweird.f32 %v4458_v5  ;;  %v6606_v13 = vld [vmem:[#allocation15 + $0x10] sm:$0xff] }
 0xa8d   :  { %v4461_v56 = vsub.f32 1.0, %v4460_v46  ;;  %vm4481_vm13 = vmor %vm4479_vm11, %vm4480_vm9  ;;  %v4498_v28 = vand.u32 2147483647, %v4458_v5  ;;  %v4501_v17 = vor.u32 1.1754944e-38, %v4500_v44 }
 0xa8e   :  { %v4476_v52 = vsub.f32 1.0, %v4475_v21 }
 0xa8f   :  { %v4462_v35 = vmul.f32 %v6857_v16, %v4461_v56  ;;  %vm4499_vm3 = vcmp.eq.f32.partialorder %v4498_v28, 8.507059e+37 }
 0xa90   :  { %v4477_v4 = vmul.f32 %v6859_v34, %v4476_v52 }
 0xa91   :  { %v6861_v37 = vpop.eup %6860  ;;  %v4463_v3 = vadd.f32 %v6857_v16, %v4462_v35  ;;  %v3417_v35 = vadd.f32 %v8022_v43, %v7997_v9 }
 0xa92   :  { %v4490_v25 = vmul.f32 %v6861_v37, %v4458_v5  ;;  %v4478_v29 = vadd.f32 %v6859_v34, %v4477_v4  ;;  %v6863_v8 = vpop.eup %6862  ;;  %vm4495_vm0 = vweird.f32 %v6861_v37 }
 0xa93   :  { %v4467_v51 = vsel %vm4466_vm12, %v6857_v16, %v4463_v3  ;;  %vm4496_vm2 = vmor %vm4494_vm1, %vm4495_vm0  ;;  %v6604_v16 = vld [vmem:[#allocation15] sm:$0xff] }
 0xa94   :  { %v4491_v6 = vsub.f32 1.0, %v4490_v25  ;;  %v4472_v14 = vsel %vm4469_vm14, %v4471_v47, %v4467_v51  ;;  %v4482_v40 = vsel %vm4481_vm13, %v6859_v34, %v4478_v29 }
 0xa95   :  { %v4487_v59 = vsel %vm4484_vm15, %v4486_v30, %v4482_v40  ;;  %v4506_v60 = vmul.f32 %v6863_v8, %v4472_v14 }
 0xa96   :  { %v4492_v61 = vmul.f32 %v6861_v37, %v4491_v6  ;;  %v4505_v24 = vmul.f32 %v4487_v59, %v7927_v58  ;;  %v6611_v58 = vld [vmem:[#allocation15 + $0x38] sm:$0xff] }
 0xa97   :  { %4703 = vmatpush.bf16.msra.mxu0 %v6611_v58 }
 0xa98   :  { %v7939_v38 = vadd.f32 %v4506_v60, %v4505_v24  ;;  %v4493_v12 = vadd.f32 %v6861_v37, %v4492_v61 }
 0xa9a   :  { %6864 = vtanh.f32 %v7939_v38  ;;  %v4497_v39 = vsel %vm4496_vm2, %v6861_v37, %v4493_v12 }
 0xa9b   :  { %v4502_v27 = vsel %vm4499_vm3, %v4501_v17, %v4497_v39  ;;  %4704 = vmatpush.bf16.msra.mxu0 %v6610_v2 }
 0xa9f   :  { %4705 = vmatpush.bf16.msra.mxu0 %v6609_v7 }
 0xaa0   :  { %v6865_v10 = vpop.eup %6864 }
 0xaa1   :  { %v4509_v20 = vmul.f32 %v6865_v10, %v4502_v27 }
 0xaa3   :  { %v4514_v15 = vpack.c.bf16 %v4509_v20, %v4509_v20  ;;  %4706 = vmatpush.bf16.msra.mxu0 %v6608_v54 }
 0xaa5   :  { %4523 = vmatmul.bf16.vlgmr.msrb.gmra.mxu0 %v4514_v15  ;;  %4536 = vmatmul.bf16.vlgmr.msrb.gmra.mxu1 %v4514_v15 }
 0xaa6   :  { %4549 = vmatmul.bf16.vlgmr.msrb.gmra.mxu2 %v4514_v15  ;;  %4562 = vmatmul.bf16.vlgmr.msrb.gmra.mxu3 %v4514_v15 }
 0xaa7   :  { %4707 = vmatpush.bf16.msra.mxu0 %v6607_v50 }
 0xaab   :  { %4708 = vmatpush.bf16.msra.mxu0 %v6606_v13 }
 0xaaf   :  { %4709 = vmatpush.bf16.msra.mxu0 %v6605_v41 }
 0xab3   :  { %4710 = vmatpush.bf16.msra.mxu0 %v6604_v16 }
 0xb22   :  { %v4524_v11 = vpop.f32.mrf.mxu0  ;;  %v4537_v32 = vpop.f32.mrf.mxu1 }
 0xb23   :  { %v4567_v36 = vadd.f32 %v4524_v11, %v3330_v0  ;;  %v4568_v33 = vadd.f32 %v4537_v32, %v3359_v62 }
 0xb25   :  { %v6213_v31 = vmul.f32 -1.442695, %v4567_v36  ;;  %v6214_v55 = vmul.f32 -1.442695, %v4568_v33 }
 0xb27   :  { %6866 = vpow2.f32 %v6213_v31 }
 0xb28   :  { %6868 = vpow2.f32 %v6214_v55 }
 0xb29   :  { %v4550_v45 = vpop.f32.mrf.mxu2  ;;  %v4563_v49 = vpop.f32.mrf.mxu3 }
 0xb2a   :  { %v4569_v26 = vadd.f32 %v4550_v45, %v3388_v23  ;;  %v4526_v53 = vpop.f32.mrf.mxu0  ;;  %v4539_v5 = vpop.f32.mrf.mxu1  ;;  %v4570_v57 = vadd.f32 %v4563_v49, %v3417_v35 }
 0xb2c   :  { %v6215_v48 = vmul.f32 -1.442695, %v4569_v26 }
 0xb2d   :  { %v6867_v34 = vpop.eup %6866 }
 0xb2e   :  { %v6869_v46 = vpop.eup %6868  ;;  %v4580_v21 = vadd.f32 1.0, %v6867_v34  ;;  %6870 = vpow2.f32 %v6215_v48 }
 0xb2f   :  { %v4581_v56 = vadd.f32 1.0, %v6869_v46 }
 0xb30   :  { %6872 = vrcp.f32 %v4580_v21  ;;  %v4594_v30 = vand.u32 2147483648, %v4580_v21  ;;  %v4592_v6 = vand.u32 2147483647, %v4580_v21  ;;  %vm4588_vm6 = vweird.f32 %v4580_v21 }
 0xb31   :  { %6874 = vrcp.f32 %v4581_v56  ;;  %v4552_v52 = vpop.f32.mrf.mxu2  ;;  %v4565_v22 = vpop.f32.mrf.mxu3  ;;  %v4609_v51 = vand.u32 2147483648, %v4581_v56  ;;  %v4607_v40 = vand.u32 2147483647, %v4581_v56  ;;  %vm4603_vm7 = vweird.f32 %v4581_v56 }
 0xb32   :  { %v4595_v61 = vor.u32 1.1754944e-38, %v4594_v30  ;;  %vm4593_vm10 = vcmp.eq.f32.partialorder %v4592_v6, 8.507059e+37 }
 0xb33   :  { %v4610_v12 = vor.u32 1.1754944e-38, %v4609_v51  ;;  %vm4608_vm11 = vcmp.eq.f32.partialorder %v4607_v40, 8.507059e+37 }
 0xb34   :  { %v6871_v42 = vpop.eup %6870 }
 0xb35   :  { %v4582_v18 = vadd.f32 1.0, %v6871_v42 }
 0xb36   :  { %v6873_v4 = vpop.eup %6872 }
 0xb37   :  { %v6875_v37 = vpop.eup %6874  ;;  %v4584_v3 = vmul.f32 %v6873_v4, %v4580_v21  ;;  %6876 = vrcp.f32 %v4582_v18  ;;  %vm4589_vm4 = vweird.f32 %v6873_v4  ;;  %v4624_v54 = vand.u32 2147483648, %v4582_v18 }
 0xb38   :  { %v4599_v25 = vmul.f32 %v6875_v37, %v4581_v56  ;;  %6878 = vtanh.f32 %v4570_v57  ;;  %vm4604_vm5 = vweird.f32 %v6875_v37  ;;  %vm4590_vm8 = vmor %vm4588_vm6, %vm4589_vm4  ;;  %vm4618_vm13 = vweird.f32 %v4582_v18 }
 0xb39   :  { %v4585_v47 = vsub.f32 1.0, %v4584_v3  ;;  %vm4605_vm9 = vmor %vm4603_vm7, %vm4604_vm5  ;;  %v4622_v63 = vand.u32 2147483647, %v4582_v18  ;;  %v4625_v1 = vor.u32 1.1754944e-38, %v4624_v54 }
 0xb3a   :  { %v4600_v29 = vsub.f32 1.0, %v4599_v25 }
 0xb3b   :  { %v4586_v8 = vmul.f32 %v6873_v4, %v4585_v47  ;;  %vm4623_vm15 = vcmp.eq.f32.partialorder %v4622_v63, 8.507059e+37 }
 0xb3c   :  { %v4601_v14 = vmul.f32 %v6875_v37, %v4600_v29 }
 0xb3d   :  { %v6877_v59 = vpop.eup %6876  ;;  %v4587_v9 = vadd.f32 %v6873_v4, %v4586_v8 }
 0xb3e   :  { %v4614_v60 = vmul.f32 %v6877_v59, %v4582_v18  ;;  %v4602_v24 = vadd.f32 %v6875_v37, %v4601_v14  ;;  %v6879_v28 = vpop.eup %6878  ;;  %vm4619_vm12 = vweird.f32 %v6877_v59 }
 0xb3f   :  { %v4591_v44 = vsel %vm4590_vm8, %v6873_v4, %v4587_v9  ;;  %vm4620_vm14 = vmor %vm4618_vm13, %vm4619_vm12 }
 0xb40   :  { %v4615_v39 = vsub.f32 1.0, %v4614_v60  ;;  %v4596_v17 = vsel %vm4593_vm10, %v4595_v61, %v4591_v44  ;;  %v4606_v10 = vsel %vm4605_vm9, %v6875_v37, %v4602_v24 }
 0xb41   :  { %v4611_v27 = vsel %vm4608_vm11, %v4610_v12, %v4606_v10  ;;  %v4630_v20 = vmul.f32 %v6879_v28, %v4596_v17 }
 0xb42   :  { %v4616_v15 = vmul.f32 %v6877_v59, %v4615_v39  ;;  %v4629_v58 = vmul.f32 %v4611_v27, %v7939_v38  ;;  %v6625_v38 = vld [vmem:[%s7965_s8] ss:$0 sm:$0xff] }
 0xb44   :  { %v4631_v2 = vadd.f32 %v4630_v20, %v4629_v58  ;;  %v4617_v7 = vadd.f32 %v6877_v59, %v4616_v15 }
 0xb46   :  { %6880 = vtanh.f32 %v4631_v2  ;;  %v4621_v0 = vsel %vm4620_vm14, %v6877_v59, %v4617_v7 }
 0xb47   :  { %v4626_v50 = vsel %vm4623_vm15, %v4625_v1, %v4621_v0 }
 0xb4c   :  { %v6881_v62 = vpop.eup %6880 }
 0xb4d   :  { %v4633_v11 = vmul.f32 %v6881_v62, %v4626_v50 }
 0xb4f   :  { %v4634_v32 = vpack.c.bf16 %v4633_v11, %v4633_v11 }
 0xb51   :  { %4711 = vmatmul.bf16.vlgmr.msra.gmra.mxu0 %v4634_v32 }
 0xbce   :  { %v4712_v36 = vpop.f32.mrf.mxu0 }
 0xbcf   :  { %v4713_v33 = vadd.f32 %v6625_v38, %v4712_v36 }
 0xbd1   :  { %4716 = vst [vmem:[#allocation16] sm:$0xff] %v4713_v33 }
 0xbd2   :  { %4727 = dma.vmem_to_hbm [thread:$0]  %s4723_s23, 128, %s4725_s25, [#allocation6]  }
 0xbd6   :  { %v4714_v31 = vpop.f32.mrf.mxu0 }
 0xbd7   :  { %7082 = dma.done.wait [#allocation6], 128  }
 0xbd8   :  { %7083 = vsyncadd [#allocation6], 4294967168 }
 0xbd9   :  { %4732 = vsyncpa [#allocation5], 1 }
 0xbda   :  { %4733 = vsyncpa [#allocation8], 1 }
 0xbdb   :  { %4734 = vsyncpa [#allocation11], 1 }
 0xbdc   :  { %4735 = vsyncpa [#allocation14], 1 }
 0xbdd   :  { %4736 = vsyncpa [#allocation6], 1 }

</bundles_post_ra>
